<compile_context>
chip_gen: v5e
topology: v5e:2x2
jax: 0.10.0
libtpu: 0.0.40
codegen_flags: <defaults>
</compile_context>

<pallas_src>
import numpy as np
import jax
import jax.numpy as jnp
from jax.experimental import pallas as pl
from jax.experimental.pallas import tpu as pltpu

HIDDEN = 64
INPUT = 1
OUTPUT = 1
NUM_LAYERS = 3


# ----------------------------- Pallas kernel ------------------------------ #
def make_gru_kernel(S, B, H):
    def gru_kernel(x_ref, wih0_ref, wih_ref, whh_ref, gbias_ref, bhn_ref,
                   fcw_ref, fcb_ref, out_ref):
        # x_ref:    (S*B, 1)      raw input sequence (time-major, batch minor)
        # wih0_ref: (1, 3H)       layer-0 input->hidden weights (transposed)
        # wih_ref:  (L-1, H, 3H)  layers 1..L-1 input->hidden weights (transposed)
        # whh_ref:  (L, H, 3H)    hidden->hidden weights (transposed)
        # gbias_ref:(L, 1, 3H)    b_ih + [b_hr, b_hz, 0]   (r/z hidden bias folded in)
        # bhn_ref:  (L, 1, H)     b_hn (must stay inside r * (gh_n + b_hn))
        # fcw_ref:  (1, H), fcb_ref: (1, O)
        # out_ref:  (B, O)
        seq = None                      # previous layer's output sequence (value)
        h = jnp.zeros((B, H), jnp.float32)

        for l in range(NUM_LAYERS):
            whh = whh_ref[l]                                    # (H, 3H)
            gbias = gbias_ref[l]                                # (1, 3H)
            bhn = jnp.broadcast_to(bhn_ref[l], (B, H))          # hoisted once/layer

            # ---- hoisted input projection for the whole sequence (a value) ----
            if l == 0:
                # INPUT == 1: pure outer product on the VPU, biases folded in.
                gi = x_ref[...] * wih0_ref[...] + gbias         # (S*B, 3H)
            else:
                gi = jnp.dot(seq, wih_ref[l - 1],
                             preferred_element_type=jnp.float32) + gbias

            gi_rz = gi[:, :2 * H]                               # (S*B, 2H)
            gi_n = gi[:, 2 * H:]                                # (S*B, H)

            # ---- serial recurrence (fully unrolled, h stays in vregs) ----
            h = jnp.zeros((B, H), jnp.float32)
            write_seq = l < NUM_LAYERS - 1
            hs = []
            for t in range(S):
                gh = jnp.dot(h, whh,
                             preferred_element_type=jnp.float32)   # (B, 3H)
                # fused, lane-aligned 128-wide sigmoid for r and z
                rz = jax.nn.sigmoid(gi_rz[t * B:(t + 1) * B, :] + gh[:, :2 * H])
                r = rz[:, :H]
                z = rz[:, H:2 * H]
                n = jnp.tanh(gi_n[t * B:(t + 1) * B, :]
                             + r * (gh[:, 2 * H:] + bhn))
                h = n + z * (h - n)                             # == (1-z)*n + z*h
                if write_seq:
                    hs.append(h)
            if write_seq:
                # one concatenate per layer, off the per-step serial chain
                seq = jnp.concatenate(hs, axis=0)               # (S*B, H)

        # FC head: VPU multiply + lane reduction instead of a 1-column MXU dot.
        out = jnp.sum(h * fcw_ref[...], axis=-1, keepdims=True) + fcb_ref[...]
        out_ref[...] = out.astype(out_ref.dtype)

    return gru_kernel


# ------------------------------- wrapper ----------------------------------- #
def gru_forward(x, kparams):
    """x: (B, S, INPUT) float32 -> (B, OUTPUT) float32."""
    B, S, _ = x.shape
    H = HIDDEN

    # time-major, batch-minor flat layout: row t*B + b  <->  (t, b)
    x_tb = jnp.transpose(x.astype(jnp.float32), (1, 0, 2)).reshape(S * B, INPUT)

    kernel = make_gru_kernel(S, B, H)
    return pl.pallas_call(
        kernel,
        out_shape=jax.ShapeDtypeStruct((B, OUTPUT), jnp.float32),
        in_specs=[pl.BlockSpec(memory_space=pltpu.MemorySpace.VMEM)] * 8,
        out_specs=pl.BlockSpec(memory_space=pltpu.MemorySpace.VMEM),
    )(x_tb, kparams["wih0"], kparams["wih"], kparams["whh"],
      kparams["gbias"], kparams["bhn"], kparams["fcw"], kparams["fcb"])


# -------------------------- parameter construction ------------------------- #
def init_raw_params(key):
    """PyTorch-style uniform(-1/sqrt(H), 1/sqrt(H)) init, deterministic."""
    bound = 1.0 / np.sqrt(HIDDEN)
    layers = []
    for l in range(NUM_LAYERS):
        in_dim = INPUT if l == 0 else HIDDEN
        key, k1, k2, k3, k4 = jax.random.split(key, 5)
        wih = jax.random.uniform(k1, (3 * HIDDEN, in_dim), jnp.float32, -bound, bound)
        whh = jax.random.uniform(k2, (3 * HIDDEN, HIDDEN), jnp.float32, -bound, bound)
        bih = jax.random.uniform(k3, (3 * HIDDEN,), jnp.float32, -bound, bound)
        bhh = jax.random.uniform(k4, (3 * HIDDEN,), jnp.float32, -bound, bound)
        layers.append((wih, whh, bih, bhh))
    key, k5, k6 = jax.random.split(key, 3)
    fc_bound = 1.0 / np.sqrt(HIDDEN)
    fc_w = jax.random.uniform(k5, (OUTPUT, HIDDEN), jnp.float32, -fc_bound, fc_bound)
    fc_b = jax.random.uniform(k6, (OUTPUT,), jnp.float32, -fc_bound, fc_bound)
    return {"layers": layers, "fc_w": fc_w, "fc_b": fc_b}


def pack_kernel_params(raw):
    """Transpose / stack raw PyTorch-shaped params for the kernel.

    Folds b_hr / b_hz into the GI bias (gbias); keeps b_hn separate since it
    must remain inside r * (gh_n + b_hn) per PyTorch GRU semantics.
    """
    H = HIDDEN
    wih0 = raw["layers"][0][0].T                                        # (1, 3H)
    wih = jnp.stack([raw["layers"][l][0].T for l in range(1, NUM_LAYERS)])  # (L-1, H, 3H)
    whh = jnp.stack([raw["layers"][l][1].T for l in range(NUM_LAYERS)])     # (L, H, 3H)
    gbias_list, bhn_list = [], []
    for l in range(NUM_LAYERS):
        bih = raw["layers"][l][2]
        bhh = raw["layers"][l][3]
        gbias = bih + jnp.concatenate([bhh[:2 * H], jnp.zeros((H,), jnp.float32)])
        gbias_list.append(gbias[None, :])                               # (1, 3H)
        bhn_list.append(bhh[None, 2 * H:])                              # (1, H)
    return {
        "wih0": wih0,                                  # (1, 3H)
        "wih": wih,                                    # (L-1, H, 3H)
        "whh": whh,                                    # (L, H, 3H)
        "gbias": jnp.stack(gbias_list),                # (L, 1, 3H)
        "bhn": jnp.stack(bhn_list),                    # (L, 1, H)
        "fcw": raw["fc_w"],                            # (1, H)  (= fc_w, already row)
        "fcb": raw["fc_b"][None, :],                   # (1, O)
    }


# ------------------------------ JAX reference ------------------------------ #
def gru_reference(x, raw):
    B, S, _ = x.shape
    inp = x.astype(jnp.float32)
    H = HIDDEN
    for l in range(NUM_LAYERS):
        wih, whh, bih, bhh = raw["layers"][l]
        h = jnp.zeros((B, H), jnp.float32)
        outs = []
        for t in range(S):
            x_t = inp[:, t, :]
            gi = x_t @ wih.T + bih
            gh = h @ whh.T + bhh
            r = jax.nn.sigmoid(gi[:, :H] + gh[:, :H])
            z = jax.nn.sigmoid(gi[:, H:2 * H] + gh[:, H:2 * H])
            n = jnp.tanh(gi[:, 2 * H:] + r * gh[:, 2 * H:])
            h = (1.0 - z) * n + z * h
            outs.append(h)
        inp = jnp.stack(outs, axis=1)
    return inp[:, -1, :] @ raw["fc_w"].T + raw["fc_b"]


# ----------------------------------- main ----------------------------------- #
if __name__ == "__main__":
    key = jax.random.PRNGKey(0)
    key, kx, kp = jax.random.split(key, 3)

    B, S = 2, 8
    x = jax.random.normal(kx, (B, S, INPUT), jnp.float32)

    raw = init_raw_params(kp)
    kparams = pack_kernel_params(raw)

    out = gru_forward(x, kparams)
    out = jax.block_until_ready(out)

    ref = gru_reference(x, raw)
    np.testing.assert_allclose(np.asarray(out), np.asarray(ref),
                               rtol=1e-4, atol=1e-4)
    print("KERNEL_OK")
</pallas_src>

<mosaic_0001>
module attributes {stable_mosaic.version = 11 : i64} {
  func.func @gru_kernel(%arg0: memref<16x1xf32, #tpu.memory_space<vmem>>, %arg1: memref<1x192xf32, #tpu.memory_space<vmem>>, %arg2: memref<2x64x192xf32, #tpu.memory_space<vmem>>, %arg3: memref<3x64x192xf32, #tpu.memory_space<vmem>>, %arg4: memref<3x1x192xf32, #tpu.memory_space<vmem>>, %arg5: memref<3x1x64xf32, #tpu.memory_space<vmem>>, %arg6: memref<1x64xf32, #tpu.memory_space<vmem>>, %arg7: memref<1x1xf32, #tpu.memory_space<vmem>>, %arg8: memref<2x1xf32, #tpu.memory_space<vmem>>) attributes {dimension_semantics = [], scalar_prefetch = 0 : i64, scratch_operands = 0 : i64, tpu.core_type = #tpu.core_type<tc>} {
    %c0 = arith.constant 0 : index
    %c0_0 = arith.constant 0 : index
    %c0_1 = arith.constant 0 : index
    %0 = vector.load %arg3[%c0, %c0_0, %c0_1] : memref<3x64x192xf32, #tpu.memory_space<vmem>>, vector<1x64x192xf32>
    %1 = vector.shape_cast %0 : vector<1x64x192xf32> to vector<64x192xf32>
    %c0_2 = arith.constant 0 : index
    %c0_3 = arith.constant 0 : index
    %c0_4 = arith.constant 0 : index
    %2 = vector.load %arg4[%c0_2, %c0_3, %c0_4] : memref<3x1x192xf32, #tpu.memory_space<vmem>>, vector<1x1x192xf32>
    %3 = vector.shape_cast %2 : vector<1x1x192xf32> to vector<1x192xf32>
    %c0_5 = arith.constant 0 : index
    %c0_6 = arith.constant 0 : index
    %c0_7 = arith.constant 0 : index
    %4 = vector.load %arg5[%c0_5, %c0_6, %c0_7] : memref<3x1x64xf32, #tpu.memory_space<vmem>>, vector<1x1x64xf32>
    %5 = vector.shape_cast %4 : vector<1x1x64xf32> to vector<1x64xf32>
    %6 = vector.shape_cast %5 : vector<1x64xf32> to vector<1x64xf32>
    %7 = vector.broadcast %6 : vector<1x64xf32> to vector<2x64xf32>
    %c0_8 = arith.constant 0 : index
    %c0_9 = arith.constant 0 : index
    %8 = vector.load %arg0[%c0_8, %c0_9] : memref<16x1xf32, #tpu.memory_space<vmem>>, vector<16x1xf32>
    %c0_10 = arith.constant 0 : index
    %c0_11 = arith.constant 0 : index
    %9 = vector.load %arg1[%c0_10, %c0_11] : memref<1x192xf32, #tpu.memory_space<vmem>>, vector<1x192xf32>
    %10 = vector.broadcast %8 : vector<16x1xf32> to vector<16x192xf32>
    %11 = vector.broadcast %9 : vector<1x192xf32> to vector<16x192xf32>
    %12 = arith.mulf %10, %11 : vector<16x192xf32>
    %13 = vector.broadcast %3 : vector<1x192xf32> to vector<16x192xf32>
    %14 = arith.addf %12, %13 : vector<16x192xf32>
    %15 = vector.extract_strided_slice %14 {offsets = [0, 0], sizes = [16, 128], strides = [1, 1]} : vector<16x192xf32> to vector<16x128xf32>
    %16 = vector.extract_strided_slice %14 {offsets = [0, 128], sizes = [16, 64], strides = [1, 1]} : vector<16x192xf32> to vector<16x64xf32>
    %cst = arith.constant 0.000000e+00 : f32
    %17 = vector.broadcast %cst : f32 to vector<2x64xf32>
    %cst_12 = arith.constant dense<0.000000e+00> : vector<2x192xf32>
    %18 = tpu.matmul %17, %1, %cst_12 {dimension_numbers = #tpu.dot_dimension_numbers<[1], [0], [0], [1], [0, 0, 1, 1], [], []>} : vector<2x64xf32>, vector<64x192xf32>, vector<2x192xf32> -> vector<2x192xf32>
    %19 = vector.extract_strided_slice %15 {offsets = [0, 0], sizes = [2, 128], strides = [1, 1]} : vector<16x128xf32> to vector<2x128xf32>
    %20 = vector.extract_strided_slice %18 {offsets = [0, 0], sizes = [2, 128], strides = [1, 1]} : vector<2x192xf32> to vector<2x128xf32>
    %21 = arith.addf %19, %20 : vector<2x128xf32>
    %22 = arith.negf %21 : vector<2x128xf32>
    %23 = math.exp %22 : vector<2x128xf32>
    %cst_13 = arith.constant 1.000000e+00 : f32
    %24 = vector.broadcast %cst_13 : f32 to vector<2x128xf32>
    %25 = arith.addf %24, %23 : vector<2x128xf32>
    %26 = arith.divf %24, %25 : vector<2x128xf32>
    %27 = vector.extract_strided_slice %26 {offsets = [0, 0], sizes = [2, 64], strides = [1, 1]} : vector<2x128xf32> to vector<2x64xf32>
    %28 = vector.extract_strided_slice %26 {offsets = [0, 64], sizes = [2, 64], strides = [1, 1]} : vector<2x128xf32> to vector<2x64xf32>
    %29 = vector.extract_strided_slice %16 {offsets = [0, 0], sizes = [2, 64], strides = [1, 1]} : vector<16x64xf32> to vector<2x64xf32>
    %30 = vector.extract_strided_slice %18 {offsets = [0, 128], sizes = [2, 64], strides = [1, 1]} : vector<2x192xf32> to vector<2x64xf32>
    %31 = arith.addf %30, %7 : vector<2x64xf32>
    %32 = arith.mulf %27, %31 : vector<2x64xf32>
    %33 = arith.addf %29, %32 : vector<2x64xf32>
    %34 = math.tanh %33 : vector<2x64xf32>
    %35 = arith.subf %17, %34 : vector<2x64xf32>
    %36 = arith.mulf %28, %35 : vector<2x64xf32>
    %37 = arith.addf %34, %36 : vector<2x64xf32>
    %cst_14 = arith.constant dense<0.000000e+00> : vector<2x192xf32>
    %38 = tpu.matmul %37, %1, %cst_14 {dimension_numbers = #tpu.dot_dimension_numbers<[1], [0], [0], [1], [0, 0, 1, 1], [], []>} : vector<2x64xf32>, vector<64x192xf32>, vector<2x192xf32> -> vector<2x192xf32>
    %39 = vector.extract_strided_slice %15 {offsets = [2, 0], sizes = [2, 128], strides = [1, 1]} : vector<16x128xf32> to vector<2x128xf32>
    %40 = vector.extract_strided_slice %38 {offsets = [0, 0], sizes = [2, 128], strides = [1, 1]} : vector<2x192xf32> to vector<2x128xf32>
    %41 = arith.addf %39, %40 : vector<2x128xf32>
    %42 = arith.negf %41 : vector<2x128xf32>
    %43 = math.exp %42 : vector<2x128xf32>
    %cst_15 = arith.constant 1.000000e+00 : f32
    %44 = vector.broadcast %cst_15 : f32 to vector<2x128xf32>
    %45 = arith.addf %44, %43 : vector<2x128xf32>
    %46 = arith.divf %44, %45 : vector<2x128xf32>
    %47 = vector.extract_strided_slice %46 {offsets = [0, 0], sizes = [2, 64], strides = [1, 1]} : vector<2x128xf32> to vector<2x64xf32>
    %48 = vector.extract_strided_slice %46 {offsets = [0, 64], sizes = [2, 64], strides = [1, 1]} : vector<2x128xf32> to vector<2x64xf32>
    %49 = vector.extract_strided_slice %16 {offsets = [2, 0], sizes = [2, 64], strides = [1, 1]} : vector<16x64xf32> to vector<2x64xf32>
    %50 = vector.extract_strided_slice %38 {offsets = [0, 128], sizes = [2, 64], strides = [1, 1]} : vector<2x192xf32> to vector<2x64xf32>
    %51 = arith.addf %50, %7 : vector<2x64xf32>
    %52 = arith.mulf %47, %51 : vector<2x64xf32>
    %53 = arith.addf %49, %52 : vector<2x64xf32>
    %54 = math.tanh %53 : vector<2x64xf32>
    %55 = arith.subf %37, %54 : vector<2x64xf32>
    %56 = arith.mulf %48, %55 : vector<2x64xf32>
    %57 = arith.addf %54, %56 : vector<2x64xf32>
    %cst_16 = arith.constant dense<0.000000e+00> : vector<2x192xf32>
    %58 = tpu.matmul %57, %1, %cst_16 {dimension_numbers = #tpu.dot_dimension_numbers<[1], [0], [0], [1], [0, 0, 1, 1], [], []>} : vector<2x64xf32>, vector<64x192xf32>, vector<2x192xf32> -> vector<2x192xf32>
    %59 = vector.extract_strided_slice %15 {offsets = [4, 0], sizes = [2, 128], strides = [1, 1]} : vector<16x128xf32> to vector<2x128xf32>
    %60 = vector.extract_strided_slice %58 {offsets = [0, 0], sizes = [2, 128], strides = [1, 1]} : vector<2x192xf32> to vector<2x128xf32>
    %61 = arith.addf %59, %60 : vector<2x128xf32>
    %62 = arith.negf %61 : vector<2x128xf32>
    %63 = math.exp %62 : vector<2x128xf32>
    %cst_17 = arith.constant 1.000000e+00 : f32
    %64 = vector.broadcast %cst_17 : f32 to vector<2x128xf32>
    %65 = arith.addf %64, %63 : vector<2x128xf32>
    %66 = arith.divf %64, %65 : vector<2x128xf32>
    %67 = vector.extract_strided_slice %66 {offsets = [0, 0], sizes = [2, 64], strides = [1, 1]} : vector<2x128xf32> to vector<2x64xf32>
    %68 = vector.extract_strided_slice %66 {offsets = [0, 64], sizes = [2, 64], strides = [1, 1]} : vector<2x128xf32> to vector<2x64xf32>
    %69 = vector.extract_strided_slice %16 {offsets = [4, 0], sizes = [2, 64], strides = [1, 1]} : vector<16x64xf32> to vector<2x64xf32>
    %70 = vector.extract_strided_slice %58 {offsets = [0, 128], sizes = [2, 64], strides = [1, 1]} : vector<2x192xf32> to vector<2x64xf32>
    %71 = arith.addf %70, %7 : vector<2x64xf32>
    %72 = arith.mulf %67, %71 : vector<2x64xf32>
    %73 = arith.addf %69, %72 : vector<2x64xf32>
    %74 = math.tanh %73 : vector<2x64xf32>
    %75 = arith.subf %57, %74 : vector<2x64xf32>
    %76 = arith.mulf %68, %75 : vector<2x64xf32>
    %77 = arith.addf %74, %76 : vector<2x64xf32>
    %cst_18 = arith.constant dense<0.000000e+00> : vector<2x192xf32>
    %78 = tpu.matmul %77, %1, %cst_18 {dimension_numbers = #tpu.dot_dimension_numbers<[1], [0], [0], [1], [0, 0, 1, 1], [], []>} : vector<2x64xf32>, vector<64x192xf32>, vector<2x192xf32> -> vector<2x192xf32>
    %79 = vector.extract_strided_slice %15 {offsets = [6, 0], sizes = [2, 128], strides = [1, 1]} : vector<16x128xf32> to vector<2x128xf32>
    %80 = vector.extract_strided_slice %78 {offsets = [0, 0], sizes = [2, 128], strides = [1, 1]} : vector<2x192xf32> to vector<2x128xf32>
    %81 = arith.addf %79, %80 : vector<2x128xf32>
    %82 = arith.negf %81 : vector<2x128xf32>
    %83 = math.exp %82 : vector<2x128xf32>
    %cst_19 = arith.constant 1.000000e+00 : f32
    %84 = vector.broadcast %cst_19 : f32 to vector<2x128xf32>
    %85 = arith.addf %84, %83 : vector<2x128xf32>
    %86 = arith.divf %84, %85 : vector<2x128xf32>
    %87 = vector.extract_strided_slice %86 {offsets = [0, 0], sizes = [2, 64], strides = [1, 1]} : vector<2x128xf32> to vector<2x64xf32>
    %88 = vector.extract_strided_slice %86 {offsets = [0, 64], sizes = [2, 64], strides = [1, 1]} : vector<2x128xf32> to vector<2x64xf32>
    %89 = vector.extract_strided_slice %16 {offsets = [6, 0], sizes = [2, 64], strides = [1, 1]} : vector<16x64xf32> to vector<2x64xf32>
    %90 = vector.extract_strided_slice %78 {offsets = [0, 128], sizes = [2, 64], strides = [1, 1]} : vector<2x192xf32> to vector<2x64xf32>
    %91 = arith.addf %90, %7 : vector<2x64xf32>
    %92 = arith.mulf %87, %91 : vector<2x64xf32>
    %93 = arith.addf %89, %92 : vector<2x64xf32>
    %94 = math.tanh %93 : vector<2x64xf32>
    %95 = arith.subf %77, %94 : vector<2x64xf32>
    %96 = arith.mulf %88, %95 : vector<2x64xf32>
    %97 = arith.addf %94, %96 : vector<2x64xf32>
    %cst_20 = arith.constant dense<0.000000e+00> : vector<2x192xf32>
    %98 = tpu.matmul %97, %1, %cst_20 {dimension_numbers = #tpu.dot_dimension_numbers<[1], [0], [0], [1], [0, 0, 1, 1], [], []>} : vector<2x64xf32>, vector<64x192xf32>, vector<2x192xf32> -> vector<2x192xf32>
    %99 = vector.extract_strided_slice %15 {offsets = [8, 0], sizes = [2, 128], strides = [1, 1]} : vector<16x128xf32> to vector<2x128xf32>
    %100 = vector.extract_strided_slice %98 {offsets = [0, 0], sizes = [2, 128], strides = [1, 1]} : vector<2x192xf32> to vector<2x128xf32>
    %101 = arith.addf %99, %100 : vector<2x128xf32>
    %102 = arith.negf %101 : vector<2x128xf32>
    %103 = math.exp %102 : vector<2x128xf32>
    %cst_21 = arith.constant 1.000000e+00 : f32
    %104 = vector.broadcast %cst_21 : f32 to vector<2x128xf32>
    %105 = arith.addf %104, %103 : vector<2x128xf32>
    %106 = arith.divf %104, %105 : vector<2x128xf32>
    %107 = vector.extract_strided_slice %106 {offsets = [0, 0], sizes = [2, 64], strides = [1, 1]} : vector<2x128xf32> to vector<2x64xf32>
    %108 = vector.extract_strided_slice %106 {offsets = [0, 64], sizes = [2, 64], strides = [1, 1]} : vector<2x128xf32> to vector<2x64xf32>
    %109 = vector.extract_strided_slice %16 {offsets = [8, 0], sizes = [2, 64], strides = [1, 1]} : vector<16x64xf32> to vector<2x64xf32>
    %110 = vector.extract_strided_slice %98 {offsets = [0, 128], sizes = [2, 64], strides = [1, 1]} : vector<2x192xf32> to vector<2x64xf32>
    %111 = arith.addf %110, %7 : vector<2x64xf32>
    %112 = arith.mulf %107, %111 : vector<2x64xf32>
    %113 = arith.addf %109, %112 : vector<2x64xf32>
    %114 = math.tanh %113 : vector<2x64xf32>
    %115 = arith.subf %97, %114 : vector<2x64xf32>
    %116 = arith.mulf %108, %115 : vector<2x64xf32>
    %117 = arith.addf %114, %116 : vector<2x64xf32>
    %cst_22 = arith.constant dense<0.000000e+00> : vector<2x192xf32>
    %118 = tpu.matmul %117, %1, %cst_22 {dimension_numbers = #tpu.dot_dimension_numbers<[1], [0], [0], [1], [0, 0, 1, 1], [], []>} : vector<2x64xf32>, vector<64x192xf32>, vector<2x192xf32> -> vector<2x192xf32>
    %119 = vector.extract_strided_slice %15 {offsets = [10, 0], sizes = [2, 128], strides = [1, 1]} : vector<16x128xf32> to vector<2x128xf32>
    %120 = vector.extract_strided_slice %118 {offsets = [0, 0], sizes = [2, 128], strides = [1, 1]} : vector<2x192xf32> to vector<2x128xf32>
    %121 = arith.addf %119, %120 : vector<2x128xf32>
    %122 = arith.negf %121 : vector<2x128xf32>
    %123 = math.exp %122 : vector<2x128xf32>
    %cst_23 = arith.constant 1.000000e+00 : f32
    %124 = vector.broadcast %cst_23 : f32 to vector<2x128xf32>
    %125 = arith.addf %124, %123 : vector<2x128xf32>
    %126 = arith.divf %124, %125 : vector<2x128xf32>
    %127 = vector.extract_strided_slice %126 {offsets = [0, 0], sizes = [2, 64], strides = [1, 1]} : vector<2x128xf32> to vector<2x64xf32>
    %128 = vector.extract_strided_slice %126 {offsets = [0, 64], sizes = [2, 64], strides = [1, 1]} : vector<2x128xf32> to vector<2x64xf32>
    %129 = vector.extract_strided_slice %16 {offsets = [10, 0], sizes = [2, 64], strides = [1, 1]} : vector<16x64xf32> to vector<2x64xf32>
    %130 = vector.extract_strided_slice %118 {offsets = [0, 128], sizes = [2, 64], strides = [1, 1]} : vector<2x192xf32> to vector<2x64xf32>
    %131 = arith.addf %130, %7 : vector<2x64xf32>
    %132 = arith.mulf %127, %131 : vector<2x64xf32>
    %133 = arith.addf %129, %132 : vector<2x64xf32>
    %134 = math.tanh %133 : vector<2x64xf32>
    %135 = arith.subf %117, %134 : vector<2x64xf32>
    %136 = arith.mulf %128, %135 : vector<2x64xf32>
    %137 = arith.addf %134, %136 : vector<2x64xf32>
    %cst_24 = arith.constant dense<0.000000e+00> : vector<2x192xf32>
    %138 = tpu.matmul %137, %1, %cst_24 {dimension_numbers = #tpu.dot_dimension_numbers<[1], [0], [0], [1], [0, 0, 1, 1], [], []>} : vector<2x64xf32>, vector<64x192xf32>, vector<2x192xf32> -> vector<2x192xf32>
    %139 = vector.extract_strided_slice %15 {offsets = [12, 0], sizes = [2, 128], strides = [1, 1]} : vector<16x128xf32> to vector<2x128xf32>
    %140 = vector.extract_strided_slice %138 {offsets = [0, 0], sizes = [2, 128], strides = [1, 1]} : vector<2x192xf32> to vector<2x128xf32>
    %141 = arith.addf %139, %140 : vector<2x128xf32>
    %142 = arith.negf %141 : vector<2x128xf32>
    %143 = math.exp %142 : vector<2x128xf32>
    %cst_25 = arith.constant 1.000000e+00 : f32
    %144 = vector.broadcast %cst_25 : f32 to vector<2x128xf32>
    %145 = arith.addf %144, %143 : vector<2x128xf32>
    %146 = arith.divf %144, %145 : vector<2x128xf32>
    %147 = vector.extract_strided_slice %146 {offsets = [0, 0], sizes = [2, 64], strides = [1, 1]} : vector<2x128xf32> to vector<2x64xf32>
    %148 = vector.extract_strided_slice %146 {offsets = [0, 64], sizes = [2, 64], strides = [1, 1]} : vector<2x128xf32> to vector<2x64xf32>
    %149 = vector.extract_strided_slice %16 {offsets = [12, 0], sizes = [2, 64], strides = [1, 1]} : vector<16x64xf32> to vector<2x64xf32>
    %150 = vector.extract_strided_slice %138 {offsets = [0, 128], sizes = [2, 64], strides = [1, 1]} : vector<2x192xf32> to vector<2x64xf32>
    %151 = arith.addf %150, %7 : vector<2x64xf32>
    %152 = arith.mulf %147, %151 : vector<2x64xf32>
    %153 = arith.addf %149, %152 : vector<2x64xf32>
    %154 = math.tanh %153 : vector<2x64xf32>
    %155 = arith.subf %137, %154 : vector<2x64xf32>
    %156 = arith.mulf %148, %155 : vector<2x64xf32>
    %157 = arith.addf %154, %156 : vector<2x64xf32>
    %cst_26 = arith.constant dense<0.000000e+00> : vector<2x192xf32>
    %158 = tpu.matmul %157, %1, %cst_26 {dimension_numbers = #tpu.dot_dimension_numbers<[1], [0], [0], [1], [0, 0, 1, 1], [], []>} : vector<2x64xf32>, vector<64x192xf32>, vector<2x192xf32> -> vector<2x192xf32>
    %159 = vector.extract_strided_slice %15 {offsets = [14, 0], sizes = [2, 128], strides = [1, 1]} : vector<16x128xf32> to vector<2x128xf32>
    %160 = vector.extract_strided_slice %158 {offsets = [0, 0], sizes = [2, 128], strides = [1, 1]} : vector<2x192xf32> to vector<2x128xf32>
    %161 = arith.addf %159, %160 : vector<2x128xf32>
    %162 = arith.negf %161 : vector<2x128xf32>
    %163 = math.exp %162 : vector<2x128xf32>
    %cst_27 = arith.constant 1.000000e+00 : f32
    %164 = vector.broadcast %cst_27 : f32 to vector<2x128xf32>
    %165 = arith.addf %164, %163 : vector<2x128xf32>
    %166 = arith.divf %164, %165 : vector<2x128xf32>
    %167 = vector.extract_strided_slice %166 {offsets = [0, 0], sizes = [2, 64], strides = [1, 1]} : vector<2x128xf32> to vector<2x64xf32>
    %168 = vector.extract_strided_slice %166 {offsets = [0, 64], sizes = [2, 64], strides = [1, 1]} : vector<2x128xf32> to vector<2x64xf32>
    %169 = vector.extract_strided_slice %16 {offsets = [14, 0], sizes = [2, 64], strides = [1, 1]} : vector<16x64xf32> to vector<2x64xf32>
    %170 = vector.extract_strided_slice %158 {offsets = [0, 128], sizes = [2, 64], strides = [1, 1]} : vector<2x192xf32> to vector<2x64xf32>
    %171 = arith.addf %170, %7 : vector<2x64xf32>
    %172 = arith.mulf %167, %171 : vector<2x64xf32>
    %173 = arith.addf %169, %172 : vector<2x64xf32>
    %174 = math.tanh %173 : vector<2x64xf32>
    %175 = arith.subf %157, %174 : vector<2x64xf32>
    %176 = arith.mulf %168, %175 : vector<2x64xf32>
    %177 = arith.addf %174, %176 : vector<2x64xf32>
    %178 = tpu.concatenate %37, %57, %77, %97, %117, %137, %157, %177 in 0 : vector<2x64xf32>, vector<2x64xf32>, vector<2x64xf32>, vector<2x64xf32>, vector<2x64xf32>, vector<2x64xf32>, vector<2x64xf32>, vector<2x64xf32> -> vector<16x64xf32>
    %c1 = arith.constant 1 : index
    %c0_28 = arith.constant 0 : index
    %c0_29 = arith.constant 0 : index
    %179 = vector.load %arg3[%c1, %c0_28, %c0_29] : memref<3x64x192xf32, #tpu.memory_space<vmem>>, vector<1x64x192xf32>
    %180 = vector.shape_cast %179 : vector<1x64x192xf32> to vector<64x192xf32>
    %c1_30 = arith.constant 1 : index
    %c0_31 = arith.constant 0 : index
    %c0_32 = arith.constant 0 : index
    %181 = vector.load %arg4[%c1_30, %c0_31, %c0_32] : memref<3x1x192xf32, #tpu.memory_space<vmem>>, vector<1x1x192xf32>
    %182 = vector.shape_cast %181 : vector<1x1x192xf32> to vector<1x192xf32>
    %c1_33 = arith.constant 1 : index
    %c0_34 = arith.constant 0 : index
    %c0_35 = arith.constant 0 : index
    %183 = vector.load %arg5[%c1_33, %c0_34, %c0_35] : memref<3x1x64xf32, #tpu.memory_space<vmem>>, vector<1x1x64xf32>
    %184 = vector.shape_cast %183 : vector<1x1x64xf32> to vector<1x64xf32>
    %185 = vector.shape_cast %184 : vector<1x64xf32> to vector<1x64xf32>
    %186 = vector.broadcast %185 : vector<1x64xf32> to vector<2x64xf32>
    %c0_36 = arith.constant 0 : index
    %c0_37 = arith.constant 0 : index
    %c0_38 = arith.constant 0 : index
    %187 = vector.load %arg2[%c0_36, %c0_37, %c0_38] : memref<2x64x192xf32, #tpu.memory_space<vmem>>, vector<1x64x192xf32>
    %188 = vector.shape_cast %187 : vector<1x64x192xf32> to vector<64x192xf32>
    %cst_39 = arith.constant dense<0.000000e+00> : vector<16x192xf32>
    %189 = tpu.matmul %178, %188, %cst_39 {dimension_numbers = #tpu.dot_dimension_numbers<[1], [0], [0], [1], [0, 0, 1, 1], [], []>} : vector<16x64xf32>, vector<64x192xf32>, vector<16x192xf32> -> vector<16x192xf32>
    %190 = vector.broadcast %182 : vector<1x192xf32> to vector<16x192xf32>
    %191 = arith.addf %189, %190 : vector<16x192xf32>
    %192 = vector.extract_strided_slice %191 {offsets = [0, 0], sizes = [16, 128], strides = [1, 1]} : vector<16x192xf32> to vector<16x128xf32>
    %193 = vector.extract_strided_slice %191 {offsets = [0, 128], sizes = [16, 64], strides = [1, 1]} : vector<16x192xf32> to vector<16x64xf32>
    %cst_40 = arith.constant 0.000000e+00 : f32
    %194 = vector.broadcast %cst_40 : f32 to vector<2x64xf32>
    %cst_41 = arith.constant dense<0.000000e+00> : vector<2x192xf32>
    %195 = tpu.matmul %194, %180, %cst_41 {dimension_numbers = #tpu.dot_dimension_numbers<[1], [0], [0], [1], [0, 0, 1, 1], [], []>} : vector<2x64xf32>, vector<64x192xf32>, vector<2x192xf32> -> vector<2x192xf32>
    %196 = vector.extract_strided_slice %192 {offsets = [0, 0], sizes = [2, 128], strides = [1, 1]} : vector<16x128xf32> to vector<2x128xf32>
    %197 = vector.extract_strided_slice %195 {offsets = [0, 0], sizes = [2, 128], strides = [1, 1]} : vector<2x192xf32> to vector<2x128xf32>
    %198 = arith.addf %196, %197 : vector<2x128xf32>
    %199 = arith.negf %198 : vector<2x128xf32>
    %200 = math.exp %199 : vector<2x128xf32>
    %cst_42 = arith.constant 1.000000e+00 : f32
    %201 = vector.broadcast %cst_42 : f32 to vector<2x128xf32>
    %202 = arith.addf %201, %200 : vector<2x128xf32>
    %203 = arith.divf %201, %202 : vector<2x128xf32>
    %204 = vector.extract_strided_slice %203 {offsets = [0, 0], sizes = [2, 64], strides = [1, 1]} : vector<2x128xf32> to vector<2x64xf32>
    %205 = vector.extract_strided_slice %203 {offsets = [0, 64], sizes = [2, 64], strides = [1, 1]} : vector<2x128xf32> to vector<2x64xf32>
    %206 = vector.extract_strided_slice %193 {offsets = [0, 0], sizes = [2, 64], strides = [1, 1]} : vector<16x64xf32> to vector<2x64xf32>
    %207 = vector.extract_strided_slice %195 {offsets = [0, 128], sizes = [2, 64], strides = [1, 1]} : vector<2x192xf32> to vector<2x64xf32>
    %208 = arith.addf %207, %186 : vector<2x64xf32>
    %209 = arith.mulf %204, %208 : vector<2x64xf32>
    %210 = arith.addf %206, %209 : vector<2x64xf32>
    %211 = math.tanh %210 : vector<2x64xf32>
    %212 = arith.subf %194, %211 : vector<2x64xf32>
    %213 = arith.mulf %205, %212 : vector<2x64xf32>
    %214 = arith.addf %211, %213 : vector<2x64xf32>
    %cst_43 = arith.constant dense<0.000000e+00> : vector<2x192xf32>
    %215 = tpu.matmul %214, %180, %cst_43 {dimension_numbers = #tpu.dot_dimension_numbers<[1], [0], [0], [1], [0, 0, 1, 1], [], []>} : vector<2x64xf32>, vector<64x192xf32>, vector<2x192xf32> -> vector<2x192xf32>
    %216 = vector.extract_strided_slice %192 {offsets = [2, 0], sizes = [2, 128], strides = [1, 1]} : vector<16x128xf32> to vector<2x128xf32>
    %217 = vector.extract_strided_slice %215 {offsets = [0, 0], sizes = [2, 128], strides = [1, 1]} : vector<2x192xf32> to vector<2x128xf32>
    %218 = arith.addf %216, %217 : vector<2x128xf32>
    %219 = arith.negf %218 : vector<2x128xf32>
    %220 = math.exp %219 : vector<2x128xf32>
    %cst_44 = arith.constant 1.000000e+00 : f32
    %221 = vector.broadcast %cst_44 : f32 to vector<2x128xf32>
    %222 = arith.addf %221, %220 : vector<2x128xf32>
    %223 = arith.divf %221, %222 : vector<2x128xf32>
    %224 = vector.extract_strided_slice %223 {offsets = [0, 0], sizes = [2, 64], strides = [1, 1]} : vector<2x128xf32> to vector<2x64xf32>
    %225 = vector.extract_strided_slice %223 {offsets = [0, 64], sizes = [2, 64], strides = [1, 1]} : vector<2x128xf32> to vector<2x64xf32>
    %226 = vector.extract_strided_slice %193 {offsets = [2, 0], sizes = [2, 64], strides = [1, 1]} : vector<16x64xf32> to vector<2x64xf32>
    %227 = vector.extract_strided_slice %215 {offsets = [0, 128], sizes = [2, 64], strides = [1, 1]} : vector<2x192xf32> to vector<2x64xf32>
    %228 = arith.addf %227, %186 : vector<2x64xf32>
    %229 = arith.mulf %224, %228 : vector<2x64xf32>
    %230 = arith.addf %226, %229 : vector<2x64xf32>
    %231 = math.tanh %230 : vector<2x64xf32>
    %232 = arith.subf %214, %231 : vector<2x64xf32>
    %233 = arith.mulf %225, %232 : vector<2x64xf32>
    %234 = arith.addf %231, %233 : vector<2x64xf32>
    %cst_45 = arith.constant dense<0.000000e+00> : vector<2x192xf32>
    %235 = tpu.matmul %234, %180, %cst_45 {dimension_numbers = #tpu.dot_dimension_numbers<[1], [0], [0], [1], [0, 0, 1, 1], [], []>} : vector<2x64xf32>, vector<64x192xf32>, vector<2x192xf32> -> vector<2x192xf32>
    %236 = vector.extract_strided_slice %192 {offsets = [4, 0], sizes = [2, 128], strides = [1, 1]} : vector<16x128xf32> to vector<2x128xf32>
    %237 = vector.extract_strided_slice %235 {offsets = [0, 0], sizes = [2, 128], strides = [1, 1]} : vector<2x192xf32> to vector<2x128xf32>
    %238 = arith.addf %236, %237 : vector<2x128xf32>
    %239 = arith.negf %238 : vector<2x128xf32>
    %240 = math.exp %239 : vector<2x128xf32>
    %cst_46 = arith.constant 1.000000e+00 : f32
    %241 = vector.broadcast %cst_46 : f32 to vector<2x128xf32>
    %242 = arith.addf %241, %240 : vector<2x128xf32>
    %243 = arith.divf %241, %242 : vector<2x128xf32>
    %244 = vector.extract_strided_slice %243 {offsets = [0, 0], sizes = [2, 64], strides = [1, 1]} : vector<2x128xf32> to vector<2x64xf32>
    %245 = vector.extract_strided_slice %243 {offsets = [0, 64], sizes = [2, 64], strides = [1, 1]} : vector<2x128xf32> to vector<2x64xf32>
    %246 = vector.extract_strided_slice %193 {offsets = [4, 0], sizes = [2, 64], strides = [1, 1]} : vector<16x64xf32> to vector<2x64xf32>
    %247 = vector.extract_strided_slice %235 {offsets = [0, 128], sizes = [2, 64], strides = [1, 1]} : vector<2x192xf32> to vector<2x64xf32>
    %248 = arith.addf %247, %186 : vector<2x64xf32>
    %249 = arith.mulf %244, %248 : vector<2x64xf32>
    %250 = arith.addf %246, %249 : vector<2x64xf32>
    %251 = math.tanh %250 : vector<2x64xf32>
    %252 = arith.subf %234, %251 : vector<2x64xf32>
    %253 = arith.mulf %245, %252 : vector<2x64xf32>
    %254 = arith.addf %251, %253 : vector<2x64xf32>
    %cst_47 = arith.constant dense<0.000000e+00> : vector<2x192xf32>
    %255 = tpu.matmul %254, %180, %cst_47 {dimension_numbers = #tpu.dot_dimension_numbers<[1], [0], [0], [1], [0, 0, 1, 1], [], []>} : vector<2x64xf32>, vector<64x192xf32>, vector<2x192xf32> -> vector<2x192xf32>
    %256 = vector.extract_strided_slice %192 {offsets = [6, 0], sizes = [2, 128], strides = [1, 1]} : vector<16x128xf32> to vector<2x128xf32>
    %257 = vector.extract_strided_slice %255 {offsets = [0, 0], sizes = [2, 128], strides = [1, 1]} : vector<2x192xf32> to vector<2x128xf32>
    %258 = arith.addf %256, %257 : vector<2x128xf32>
    %259 = arith.negf %258 : vector<2x128xf32>
    %260 = math.exp %259 : vector<2x128xf32>
    %cst_48 = arith.constant 1.000000e+00 : f32
    %261 = vector.broadcast %cst_48 : f32 to vector<2x128xf32>
    %262 = arith.addf %261, %260 : vector<2x128xf32>
    %263 = arith.divf %261, %262 : vector<2x128xf32>
    %264 = vector.extract_strided_slice %263 {offsets = [0, 0], sizes = [2, 64], strides = [1, 1]} : vector<2x128xf32> to vector<2x64xf32>
    %265 = vector.extract_strided_slice %263 {offsets = [0, 64], sizes = [2, 64], strides = [1, 1]} : vector<2x128xf32> to vector<2x64xf32>
    %266 = vector.extract_strided_slice %193 {offsets = [6, 0], sizes = [2, 64], strides = [1, 1]} : vector<16x64xf32> to vector<2x64xf32>
    %267 = vector.extract_strided_slice %255 {offsets = [0, 128], sizes = [2, 64], strides = [1, 1]} : vector<2x192xf32> to vector<2x64xf32>
    %268 = arith.addf %267, %186 : vector<2x64xf32>
    %269 = arith.mulf %264, %268 : vector<2x64xf32>
    %270 = arith.addf %266, %269 : vector<2x64xf32>
    %271 = math.tanh %270 : vector<2x64xf32>
    %272 = arith.subf %254, %271 : vector<2x64xf32>
    %273 = arith.mulf %265, %272 : vector<2x64xf32>
    %274 = arith.addf %271, %273 : vector<2x64xf32>
    %cst_49 = arith.constant dense<0.000000e+00> : vector<2x192xf32>
    %275 = tpu.matmul %274, %180, %cst_49 {dimension_numbers = #tpu.dot_dimension_numbers<[1], [0], [0], [1], [0, 0, 1, 1], [], []>} : vector<2x64xf32>, vector<64x192xf32>, vector<2x192xf32> -> vector<2x192xf32>
    %276 = vector.extract_strided_slice %192 {offsets = [8, 0], sizes = [2, 128], strides = [1, 1]} : vector<16x128xf32> to vector<2x128xf32>
    %277 = vector.extract_strided_slice %275 {offsets = [0, 0], sizes = [2, 128], strides = [1, 1]} : vector<2x192xf32> to vector<2x128xf32>
    %278 = arith.addf %276, %277 : vector<2x128xf32>
    %279 = arith.negf %278 : vector<2x128xf32>
    %280 = math.exp %279 : vector<2x128xf32>
    %cst_50 = arith.constant 1.000000e+00 : f32
    %281 = vector.broadcast %cst_50 : f32 to vector<2x128xf32>
    %282 = arith.addf %281, %280 : vector<2x128xf32>
    %283 = arith.divf %281, %282 : vector<2x128xf32>
    %284 = vector.extract_strided_slice %283 {offsets = [0, 0], sizes = [2, 64], strides = [1, 1]} : vector<2x128xf32> to vector<2x64xf32>
    %285 = vector.extract_strided_slice %283 {offsets = [0, 64], sizes = [2, 64], strides = [1, 1]} : vector<2x128xf32> to vector<2x64xf32>
    %286 = vector.extract_strided_slice %193 {offsets = [8, 0], sizes = [2, 64], strides = [1, 1]} : vector<16x64xf32> to vector<2x64xf32>
    %287 = vector.extract_strided_slice %275 {offsets = [0, 128], sizes = [2, 64], strides = [1, 1]} : vector<2x192xf32> to vector<2x64xf32>
    %288 = arith.addf %287, %186 : vector<2x64xf32>
    %289 = arith.mulf %284, %288 : vector<2x64xf32>
    %290 = arith.addf %286, %289 : vector<2x64xf32>
    %291 = math.tanh %290 : vector<2x64xf32>
    %292 = arith.subf %274, %291 : vector<2x64xf32>
    %293 = arith.mulf %285, %292 : vector<2x64xf32>
    %294 = arith.addf %291, %293 : vector<2x64xf32>
    %cst_51 = arith.constant dense<0.000000e+00> : vector<2x192xf32>
    %295 = tpu.matmul %294, %180, %cst_51 {dimension_numbers = #tpu.dot_dimension_numbers<[1], [0], [0], [1], [0, 0, 1, 1], [], []>} : vector<2x64xf32>, vector<64x192xf32>, vector<2x192xf32> -> vector<2x192xf32>
    %296 = vector.extract_strided_slice %192 {offsets = [10, 0], sizes = [2, 128], strides = [1, 1]} : vector<16x128xf32> to vector<2x128xf32>
    %297 = vector.extract_strided_slice %295 {offsets = [0, 0], sizes = [2, 128], strides = [1, 1]} : vector<2x192xf32> to vector<2x128xf32>
    %298 = arith.addf %296, %297 : vector<2x128xf32>
    %299 = arith.negf %298 : vector<2x128xf32>
    %300 = math.exp %299 : vector<2x128xf32>
    %cst_52 = arith.constant 1.000000e+00 : f32
    %301 = vector.broadcast %cst_52 : f32 to vector<2x128xf32>
    %302 = arith.addf %301, %300 : vector<2x128xf32>
    %303 = arith.divf %301, %302 : vector<2x128xf32>
    %304 = vector.extract_strided_slice %303 {offsets = [0, 0], sizes = [2, 64], strides = [1, 1]} : vector<2x128xf32> to vector<2x64xf32>
    %305 = vector.extract_strided_slice %303 {offsets = [0, 64], sizes = [2, 64], strides = [1, 1]} : vector<2x128xf32> to vector<2x64xf32>
    %306 = vector.extract_strided_slice %193 {offsets = [10, 0], sizes = [2, 64], strides = [1, 1]} : vector<16x64xf32> to vector<2x64xf32>
    %307 = vector.extract_strided_slice %295 {offsets = [0, 128], sizes = [2, 64], strides = [1, 1]} : vector<2x192xf32> to vector<2x64xf32>
    %308 = arith.addf %307, %186 : vector<2x64xf32>
    %309 = arith.mulf %304, %308 : vector<2x64xf32>
    %310 = arith.addf %306, %309 : vector<2x64xf32>
    %311 = math.tanh %310 : vector<2x64xf32>
    %312 = arith.subf %294, %311 : vector<2x64xf32>
    %313 = arith.mulf %305, %312 : vector<2x64xf32>
    %314 = arith.addf %311, %313 : vector<2x64xf32>
    %cst_53 = arith.constant dense<0.000000e+00> : vector<2x192xf32>
    %315 = tpu.matmul %314, %180, %cst_53 {dimension_numbers = #tpu.dot_dimension_numbers<[1], [0], [0], [1], [0, 0, 1, 1], [], []>} : vector<2x64xf32>, vector<64x192xf32>, vector<2x192xf32> -> vector<2x192xf32>
    %316 = vector.extract_strided_slice %192 {offsets = [12, 0], sizes = [2, 128], strides = [1, 1]} : vector<16x128xf32> to vector<2x128xf32>
    %317 = vector.extract_strided_slice %315 {offsets = [0, 0], sizes = [2, 128], strides = [1, 1]} : vector<2x192xf32> to vector<2x128xf32>
    %318 = arith.addf %316, %317 : vector<2x128xf32>
    %319 = arith.negf %318 : vector<2x128xf32>
    %320 = math.exp %319 : vector<2x128xf32>
    %cst_54 = arith.constant 1.000000e+00 : f32
    %321 = vector.broadcast %cst_54 : f32 to vector<2x128xf32>
    %322 = arith.addf %321, %320 : vector<2x128xf32>
    %323 = arith.divf %321, %322 : vector<2x128xf32>
    %324 = vector.extract_strided_slice %323 {offsets = [0, 0], sizes = [2, 64], strides = [1, 1]} : vector<2x128xf32> to vector<2x64xf32>
    %325 = vector.extract_strided_slice %323 {offsets = [0, 64], sizes = [2, 64], strides = [1, 1]} : vector<2x128xf32> to vector<2x64xf32>
    %326 = vector.extract_strided_slice %193 {offsets = [12, 0], sizes = [2, 64], strides = [1, 1]} : vector<16x64xf32> to vector<2x64xf32>
    %327 = vector.extract_strided_slice %315 {offsets = [0, 128], sizes = [2, 64], strides = [1, 1]} : vector<2x192xf32> to vector<2x64xf32>
    %328 = arith.addf %327, %186 : vector<2x64xf32>
    %329 = arith.mulf %324, %328 : vector<2x64xf32>
    %330 = arith.addf %326, %329 : vector<2x64xf32>
    %331 = math.tanh %330 : vector<2x64xf32>
    %332 = arith.subf %314, %331 : vector<2x64xf32>
    %333 = arith.mulf %325, %332 : vector<2x64xf32>
    %334 = arith.addf %331, %333 : vector<2x64xf32>
    %cst_55 = arith.constant dense<0.000000e+00> : vector<2x192xf32>
    %335 = tpu.matmul %334, %180, %cst_55 {dimension_numbers = #tpu.dot_dimension_numbers<[1], [0], [0], [1], [0, 0, 1, 1], [], []>} : vector<2x64xf32>, vector<64x192xf32>, vector<2x192xf32> -> vector<2x192xf32>
    %336 = vector.extract_strided_slice %192 {offsets = [14, 0], sizes = [2, 128], strides = [1, 1]} : vector<16x128xf32> to vector<2x128xf32>
    %337 = vector.extract_strided_slice %335 {offsets = [0, 0], sizes = [2, 128], strides = [1, 1]} : vector<2x192xf32> to vector<2x128xf32>
    %338 = arith.addf %336, %337 : vector<2x128xf32>
    %339 = arith.negf %338 : vector<2x128xf32>
    %340 = math.exp %339 : vector<2x128xf32>
    %cst_56 = arith.constant 1.000000e+00 : f32
    %341 = vector.broadcast %cst_56 : f32 to vector<2x128xf32>
    %342 = arith.addf %341, %340 : vector<2x128xf32>
    %343 = arith.divf %341, %342 : vector<2x128xf32>
    %344 = vector.extract_strided_slice %343 {offsets = [0, 0], sizes = [2, 64], strides = [1, 1]} : vector<2x128xf32> to vector<2x64xf32>
    %345 = vector.extract_strided_slice %343 {offsets = [0, 64], sizes = [2, 64], strides = [1, 1]} : vector<2x128xf32> to vector<2x64xf32>
    %346 = vector.extract_strided_slice %193 {offsets = [14, 0], sizes = [2, 64], strides = [1, 1]} : vector<16x64xf32> to vector<2x64xf32>
    %347 = vector.extract_strided_slice %335 {offsets = [0, 128], sizes = [2, 64], strides = [1, 1]} : vector<2x192xf32> to vector<2x64xf32>
    %348 = arith.addf %347, %186 : vector<2x64xf32>
    %349 = arith.mulf %344, %348 : vector<2x64xf32>
    %350 = arith.addf %346, %349 : vector<2x64xf32>
    %351 = math.tanh %350 : vector<2x64xf32>
    %352 = arith.subf %334, %351 : vector<2x64xf32>
    %353 = arith.mulf %345, %352 : vector<2x64xf32>
    %354 = arith.addf %351, %353 : vector<2x64xf32>
    %355 = tpu.concatenate %214, %234, %254, %274, %294, %314, %334, %354 in 0 : vector<2x64xf32>, vector<2x64xf32>, vector<2x64xf32>, vector<2x64xf32>, vector<2x64xf32>, vector<2x64xf32>, vector<2x64xf32>, vector<2x64xf32> -> vector<16x64xf32>
    %c2 = arith.constant 2 : index
    %c0_57 = arith.constant 0 : index
    %c0_58 = arith.constant 0 : index
    %356 = vector.load %arg3[%c2, %c0_57, %c0_58] : memref<3x64x192xf32, #tpu.memory_space<vmem>>, vector<1x64x192xf32>
    %357 = vector.shape_cast %356 : vector<1x64x192xf32> to vector<64x192xf32>
    %c2_59 = arith.constant 2 : index
    %c0_60 = arith.constant 0 : index
    %c0_61 = arith.constant 0 : index
    %358 = vector.load %arg4[%c2_59, %c0_60, %c0_61] : memref<3x1x192xf32, #tpu.memory_space<vmem>>, vector<1x1x192xf32>
    %359 = vector.shape_cast %358 : vector<1x1x192xf32> to vector<1x192xf32>
    %c2_62 = arith.constant 2 : index
    %c0_63 = arith.constant 0 : index
    %c0_64 = arith.constant 0 : index
    %360 = vector.load %arg5[%c2_62, %c0_63, %c0_64] : memref<3x1x64xf32, #tpu.memory_space<vmem>>, vector<1x1x64xf32>
    %361 = vector.shape_cast %360 : vector<1x1x64xf32> to vector<1x64xf32>
    %362 = vector.shape_cast %361 : vector<1x64xf32> to vector<1x64xf32>
    %363 = vector.broadcast %362 : vector<1x64xf32> to vector<2x64xf32>
    %c1_65 = arith.constant 1 : index
    %c0_66 = arith.constant 0 : index
    %c0_67 = arith.constant 0 : index
    %364 = vector.load %arg2[%c1_65, %c0_66, %c0_67] : memref<2x64x192xf32, #tpu.memory_space<vmem>>, vector<1x64x192xf32>
    %365 = vector.shape_cast %364 : vector<1x64x192xf32> to vector<64x192xf32>
    %cst_68 = arith.constant dense<0.000000e+00> : vector<16x192xf32>
    %366 = tpu.matmul %355, %365, %cst_68 {dimension_numbers = #tpu.dot_dimension_numbers<[1], [0], [0], [1], [0, 0, 1, 1], [], []>} : vector<16x64xf32>, vector<64x192xf32>, vector<16x192xf32> -> vector<16x192xf32>
    %367 = vector.broadcast %359 : vector<1x192xf32> to vector<16x192xf32>
    %368 = arith.addf %366, %367 : vector<16x192xf32>
    %369 = vector.extract_strided_slice %368 {offsets = [0, 0], sizes = [16, 128], strides = [1, 1]} : vector<16x192xf32> to vector<16x128xf32>
    %370 = vector.extract_strided_slice %368 {offsets = [0, 128], sizes = [16, 64], strides = [1, 1]} : vector<16x192xf32> to vector<16x64xf32>
    %cst_69 = arith.constant 0.000000e+00 : f32
    %371 = vector.broadcast %cst_69 : f32 to vector<2x64xf32>
    %cst_70 = arith.constant dense<0.000000e+00> : vector<2x192xf32>
    %372 = tpu.matmul %371, %357, %cst_70 {dimension_numbers = #tpu.dot_dimension_numbers<[1], [0], [0], [1], [0, 0, 1, 1], [], []>} : vector<2x64xf32>, vector<64x192xf32>, vector<2x192xf32> -> vector<2x192xf32>
    %373 = vector.extract_strided_slice %369 {offsets = [0, 0], sizes = [2, 128], strides = [1, 1]} : vector<16x128xf32> to vector<2x128xf32>
    %374 = vector.extract_strided_slice %372 {offsets = [0, 0], sizes = [2, 128], strides = [1, 1]} : vector<2x192xf32> to vector<2x128xf32>
    %375 = arith.addf %373, %374 : vector<2x128xf32>
    %376 = arith.negf %375 : vector<2x128xf32>
    %377 = math.exp %376 : vector<2x128xf32>
    %cst_71 = arith.constant 1.000000e+00 : f32
    %378 = vector.broadcast %cst_71 : f32 to vector<2x128xf32>
    %379 = arith.addf %378, %377 : vector<2x128xf32>
    %380 = arith.divf %378, %379 : vector<2x128xf32>
    %381 = vector.extract_strided_slice %380 {offsets = [0, 0], sizes = [2, 64], strides = [1, 1]} : vector<2x128xf32> to vector<2x64xf32>
    %382 = vector.extract_strided_slice %380 {offsets = [0, 64], sizes = [2, 64], strides = [1, 1]} : vector<2x128xf32> to vector<2x64xf32>
    %383 = vector.extract_strided_slice %370 {offsets = [0, 0], sizes = [2, 64], strides = [1, 1]} : vector<16x64xf32> to vector<2x64xf32>
    %384 = vector.extract_strided_slice %372 {offsets = [0, 128], sizes = [2, 64], strides = [1, 1]} : vector<2x192xf32> to vector<2x64xf32>
    %385 = arith.addf %384, %363 : vector<2x64xf32>
    %386 = arith.mulf %381, %385 : vector<2x64xf32>
    %387 = arith.addf %383, %386 : vector<2x64xf32>
    %388 = math.tanh %387 : vector<2x64xf32>
    %389 = arith.subf %371, %388 : vector<2x64xf32>
    %390 = arith.mulf %382, %389 : vector<2x64xf32>
    %391 = arith.addf %388, %390 : vector<2x64xf32>
    %cst_72 = arith.constant dense<0.000000e+00> : vector<2x192xf32>
    %392 = tpu.matmul %391, %357, %cst_72 {dimension_numbers = #tpu.dot_dimension_numbers<[1], [0], [0], [1], [0, 0, 1, 1], [], []>} : vector<2x64xf32>, vector<64x192xf32>, vector<2x192xf32> -> vector<2x192xf32>
    %393 = vector.extract_strided_slice %369 {offsets = [2, 0], sizes = [2, 128], strides = [1, 1]} : vector<16x128xf32> to vector<2x128xf32>
    %394 = vector.extract_strided_slice %392 {offsets = [0, 0], sizes = [2, 128], strides = [1, 1]} : vector<2x192xf32> to vector<2x128xf32>
    %395 = arith.addf %393, %394 : vector<2x128xf32>
    %396 = arith.negf %395 : vector<2x128xf32>
    %397 = math.exp %396 : vector<2x128xf32>
    %cst_73 = arith.constant 1.000000e+00 : f32
    %398 = vector.broadcast %cst_73 : f32 to vector<2x128xf32>
    %399 = arith.addf %398, %397 : vector<2x128xf32>
    %400 = arith.divf %398, %399 : vector<2x128xf32>
    %401 = vector.extract_strided_slice %400 {offsets = [0, 0], sizes = [2, 64], strides = [1, 1]} : vector<2x128xf32> to vector<2x64xf32>
    %402 = vector.extract_strided_slice %400 {offsets = [0, 64], sizes = [2, 64], strides = [1, 1]} : vector<2x128xf32> to vector<2x64xf32>
    %403 = vector.extract_strided_slice %370 {offsets = [2, 0], sizes = [2, 64], strides = [1, 1]} : vector<16x64xf32> to vector<2x64xf32>
    %404 = vector.extract_strided_slice %392 {offsets = [0, 128], sizes = [2, 64], strides = [1, 1]} : vector<2x192xf32> to vector<2x64xf32>
    %405 = arith.addf %404, %363 : vector<2x64xf32>
    %406 = arith.mulf %401, %405 : vector<2x64xf32>
    %407 = arith.addf %403, %406 : vector<2x64xf32>
    %408 = math.tanh %407 : vector<2x64xf32>
    %409 = arith.subf %391, %408 : vector<2x64xf32>
    %410 = arith.mulf %402, %409 : vector<2x64xf32>
    %411 = arith.addf %408, %410 : vector<2x64xf32>
    %cst_74 = arith.constant dense<0.000000e+00> : vector<2x192xf32>
    %412 = tpu.matmul %411, %357, %cst_74 {dimension_numbers = #tpu.dot_dimension_numbers<[1], [0], [0], [1], [0, 0, 1, 1], [], []>} : vector<2x64xf32>, vector<64x192xf32>, vector<2x192xf32> -> vector<2x192xf32>
    %413 = vector.extract_strided_slice %369 {offsets = [4, 0], sizes = [2, 128], strides = [1, 1]} : vector<16x128xf32> to vector<2x128xf32>
    %414 = vector.extract_strided_slice %412 {offsets = [0, 0], sizes = [2, 128], strides = [1, 1]} : vector<2x192xf32> to vector<2x128xf32>
    %415 = arith.addf %413, %414 : vector<2x128xf32>
    %416 = arith.negf %415 : vector<2x128xf32>
    %417 = math.exp %416 : vector<2x128xf32>
    %cst_75 = arith.constant 1.000000e+00 : f32
    %418 = vector.broadcast %cst_75 : f32 to vector<2x128xf32>
    %419 = arith.addf %418, %417 : vector<2x128xf32>
    %420 = arith.divf %418, %419 : vector<2x128xf32>
    %421 = vector.extract_strided_slice %420 {offsets = [0, 0], sizes = [2, 64], strides = [1, 1]} : vector<2x128xf32> to vector<2x64xf32>
    %422 = vector.extract_strided_slice %420 {offsets = [0, 64], sizes = [2, 64], strides = [1, 1]} : vector<2x128xf32> to vector<2x64xf32>
    %423 = vector.extract_strided_slice %370 {offsets = [4, 0], sizes = [2, 64], strides = [1, 1]} : vector<16x64xf32> to vector<2x64xf32>
    %424 = vector.extract_strided_slice %412 {offsets = [0, 128], sizes = [2, 64], strides = [1, 1]} : vector<2x192xf32> to vector<2x64xf32>
    %425 = arith.addf %424, %363 : vector<2x64xf32>
    %426 = arith.mulf %421, %425 : vector<2x64xf32>
    %427 = arith.addf %423, %426 : vector<2x64xf32>
    %428 = math.tanh %427 : vector<2x64xf32>
    %429 = arith.subf %411, %428 : vector<2x64xf32>
    %430 = arith.mulf %422, %429 : vector<2x64xf32>
    %431 = arith.addf %428, %430 : vector<2x64xf32>
    %cst_76 = arith.constant dense<0.000000e+00> : vector<2x192xf32>
    %432 = tpu.matmul %431, %357, %cst_76 {dimension_numbers = #tpu.dot_dimension_numbers<[1], [0], [0], [1], [0, 0, 1, 1], [], []>} : vector<2x64xf32>, vector<64x192xf32>, vector<2x192xf32> -> vector<2x192xf32>
    %433 = vector.extract_strided_slice %369 {offsets = [6, 0], sizes = [2, 128], strides = [1, 1]} : vector<16x128xf32> to vector<2x128xf32>
    %434 = vector.extract_strided_slice %432 {offsets = [0, 0], sizes = [2, 128], strides = [1, 1]} : vector<2x192xf32> to vector<2x128xf32>
    %435 = arith.addf %433, %434 : vector<2x128xf32>
    %436 = arith.negf %435 : vector<2x128xf32>
    %437 = math.exp %436 : vector<2x128xf32>
    %cst_77 = arith.constant 1.000000e+00 : f32
    %438 = vector.broadcast %cst_77 : f32 to vector<2x128xf32>
    %439 = arith.addf %438, %437 : vector<2x128xf32>
    %440 = arith.divf %438, %439 : vector<2x128xf32>
    %441 = vector.extract_strided_slice %440 {offsets = [0, 0], sizes = [2, 64], strides = [1, 1]} : vector<2x128xf32> to vector<2x64xf32>
    %442 = vector.extract_strided_slice %440 {offsets = [0, 64], sizes = [2, 64], strides = [1, 1]} : vector<2x128xf32> to vector<2x64xf32>
    %443 = vector.extract_strided_slice %370 {offsets = [6, 0], sizes = [2, 64], strides = [1, 1]} : vector<16x64xf32> to vector<2x64xf32>
    %444 = vector.extract_strided_slice %432 {offsets = [0, 128], sizes = [2, 64], strides = [1, 1]} : vector<2x192xf32> to vector<2x64xf32>
    %445 = arith.addf %444, %363 : vector<2x64xf32>
    %446 = arith.mulf %441, %445 : vector<2x64xf32>
    %447 = arith.addf %443, %446 : vector<2x64xf32>
    %448 = math.tanh %447 : vector<2x64xf32>
    %449 = arith.subf %431, %448 : vector<2x64xf32>
    %450 = arith.mulf %442, %449 : vector<2x64xf32>
    %451 = arith.addf %448, %450 : vector<2x64xf32>
    %cst_78 = arith.constant dense<0.000000e+00> : vector<2x192xf32>
    %452 = tpu.matmul %451, %357, %cst_78 {dimension_numbers = #tpu.dot_dimension_numbers<[1], [0], [0], [1], [0, 0, 1, 1], [], []>} : vector<2x64xf32>, vector<64x192xf32>, vector<2x192xf32> -> vector<2x192xf32>
    %453 = vector.extract_strided_slice %369 {offsets = [8, 0], sizes = [2, 128], strides = [1, 1]} : vector<16x128xf32> to vector<2x128xf32>
    %454 = vector.extract_strided_slice %452 {offsets = [0, 0], sizes = [2, 128], strides = [1, 1]} : vector<2x192xf32> to vector<2x128xf32>
    %455 = arith.addf %453, %454 : vector<2x128xf32>
    %456 = arith.negf %455 : vector<2x128xf32>
    %457 = math.exp %456 : vector<2x128xf32>
    %cst_79 = arith.constant 1.000000e+00 : f32
    %458 = vector.broadcast %cst_79 : f32 to vector<2x128xf32>
    %459 = arith.addf %458, %457 : vector<2x128xf32>
    %460 = arith.divf %458, %459 : vector<2x128xf32>
    %461 = vector.extract_strided_slice %460 {offsets = [0, 0], sizes = [2, 64], strides = [1, 1]} : vector<2x128xf32> to vector<2x64xf32>
    %462 = vector.extract_strided_slice %460 {offsets = [0, 64], sizes = [2, 64], strides = [1, 1]} : vector<2x128xf32> to vector<2x64xf32>
    %463 = vector.extract_strided_slice %370 {offsets = [8, 0], sizes = [2, 64], strides = [1, 1]} : vector<16x64xf32> to vector<2x64xf32>
    %464 = vector.extract_strided_slice %452 {offsets = [0, 128], sizes = [2, 64], strides = [1, 1]} : vector<2x192xf32> to vector<2x64xf32>
    %465 = arith.addf %464, %363 : vector<2x64xf32>
    %466 = arith.mulf %461, %465 : vector<2x64xf32>
    %467 = arith.addf %463, %466 : vector<2x64xf32>
    %468 = math.tanh %467 : vector<2x64xf32>
    %469 = arith.subf %451, %468 : vector<2x64xf32>
    %470 = arith.mulf %462, %469 : vector<2x64xf32>
    %471 = arith.addf %468, %470 : vector<2x64xf32>
    %cst_80 = arith.constant dense<0.000000e+00> : vector<2x192xf32>
    %472 = tpu.matmul %471, %357, %cst_80 {dimension_numbers = #tpu.dot_dimension_numbers<[1], [0], [0], [1], [0, 0, 1, 1], [], []>} : vector<2x64xf32>, vector<64x192xf32>, vector<2x192xf32> -> vector<2x192xf32>
    %473 = vector.extract_strided_slice %369 {offsets = [10, 0], sizes = [2, 128], strides = [1, 1]} : vector<16x128xf32> to vector<2x128xf32>
    %474 = vector.extract_strided_slice %472 {offsets = [0, 0], sizes = [2, 128], strides = [1, 1]} : vector<2x192xf32> to vector<2x128xf32>
    %475 = arith.addf %473, %474 : vector<2x128xf32>
    %476 = arith.negf %475 : vector<2x128xf32>
    %477 = math.exp %476 : vector<2x128xf32>
    %cst_81 = arith.constant 1.000000e+00 : f32
    %478 = vector.broadcast %cst_81 : f32 to vector<2x128xf32>
    %479 = arith.addf %478, %477 : vector<2x128xf32>
    %480 = arith.divf %478, %479 : vector<2x128xf32>
    %481 = vector.extract_strided_slice %480 {offsets = [0, 0], sizes = [2, 64], strides = [1, 1]} : vector<2x128xf32> to vector<2x64xf32>
    %482 = vector.extract_strided_slice %480 {offsets = [0, 64], sizes = [2, 64], strides = [1, 1]} : vector<2x128xf32> to vector<2x64xf32>
    %483 = vector.extract_strided_slice %370 {offsets = [10, 0], sizes = [2, 64], strides = [1, 1]} : vector<16x64xf32> to vector<2x64xf32>
    %484 = vector.extract_strided_slice %472 {offsets = [0, 128], sizes = [2, 64], strides = [1, 1]} : vector<2x192xf32> to vector<2x64xf32>
    %485 = arith.addf %484, %363 : vector<2x64xf32>
    %486 = arith.mulf %481, %485 : vector<2x64xf32>
    %487 = arith.addf %483, %486 : vector<2x64xf32>
    %488 = math.tanh %487 : vector<2x64xf32>
    %489 = arith.subf %471, %488 : vector<2x64xf32>
    %490 = arith.mulf %482, %489 : vector<2x64xf32>
    %491 = arith.addf %488, %490 : vector<2x64xf32>
    %cst_82 = arith.constant dense<0.000000e+00> : vector<2x192xf32>
    %492 = tpu.matmul %491, %357, %cst_82 {dimension_numbers = #tpu.dot_dimension_numbers<[1], [0], [0], [1], [0, 0, 1, 1], [], []>} : vector<2x64xf32>, vector<64x192xf32>, vector<2x192xf32> -> vector<2x192xf32>
    %493 = vector.extract_strided_slice %369 {offsets = [12, 0], sizes = [2, 128], strides = [1, 1]} : vector<16x128xf32> to vector<2x128xf32>
    %494 = vector.extract_strided_slice %492 {offsets = [0, 0], sizes = [2, 128], strides = [1, 1]} : vector<2x192xf32> to vector<2x128xf32>
    %495 = arith.addf %493, %494 : vector<2x128xf32>
    %496 = arith.negf %495 : vector<2x128xf32>
    %497 = math.exp %496 : vector<2x128xf32>
    %cst_83 = arith.constant 1.000000e+00 : f32
    %498 = vector.broadcast %cst_83 : f32 to vector<2x128xf32>
    %499 = arith.addf %498, %497 : vector<2x128xf32>
    %500 = arith.divf %498, %499 : vector<2x128xf32>
    %501 = vector.extract_strided_slice %500 {offsets = [0, 0], sizes = [2, 64], strides = [1, 1]} : vector<2x128xf32> to vector<2x64xf32>
    %502 = vector.extract_strided_slice %500 {offsets = [0, 64], sizes = [2, 64], strides = [1, 1]} : vector<2x128xf32> to vector<2x64xf32>
    %503 = vector.extract_strided_slice %370 {offsets = [12, 0], sizes = [2, 64], strides = [1, 1]} : vector<16x64xf32> to vector<2x64xf32>
    %504 = vector.extract_strided_slice %492 {offsets = [0, 128], sizes = [2, 64], strides = [1, 1]} : vector<2x192xf32> to vector<2x64xf32>
    %505 = arith.addf %504, %363 : vector<2x64xf32>
    %506 = arith.mulf %501, %505 : vector<2x64xf32>
    %507 = arith.addf %503, %506 : vector<2x64xf32>
    %508 = math.tanh %507 : vector<2x64xf32>
    %509 = arith.subf %491, %508 : vector<2x64xf32>
    %510 = arith.mulf %502, %509 : vector<2x64xf32>
    %511 = arith.addf %508, %510 : vector<2x64xf32>
    %cst_84 = arith.constant dense<0.000000e+00> : vector<2x192xf32>
    %512 = tpu.matmul %511, %357, %cst_84 {dimension_numbers = #tpu.dot_dimension_numbers<[1], [0], [0], [1], [0, 0, 1, 1], [], []>} : vector<2x64xf32>, vector<64x192xf32>, vector<2x192xf32> -> vector<2x192xf32>
    %513 = vector.extract_strided_slice %369 {offsets = [14, 0], sizes = [2, 128], strides = [1, 1]} : vector<16x128xf32> to vector<2x128xf32>
    %514 = vector.extract_strided_slice %512 {offsets = [0, 0], sizes = [2, 128], strides = [1, 1]} : vector<2x192xf32> to vector<2x128xf32>
    %515 = arith.addf %513, %514 : vector<2x128xf32>
    %516 = arith.negf %515 : vector<2x128xf32>
    %517 = math.exp %516 : vector<2x128xf32>
    %cst_85 = arith.constant 1.000000e+00 : f32
    %518 = vector.broadcast %cst_85 : f32 to vector<2x128xf32>
    %519 = arith.addf %518, %517 : vector<2x128xf32>
    %520 = arith.divf %518, %519 : vector<2x128xf32>
    %521 = vector.extract_strided_slice %520 {offsets = [0, 0], sizes = [2, 64], strides = [1, 1]} : vector<2x128xf32> to vector<2x64xf32>
    %522 = vector.extract_strided_slice %520 {offsets = [0, 64], sizes = [2, 64], strides = [1, 1]} : vector<2x128xf32> to vector<2x64xf32>
    %523 = vector.extract_strided_slice %370 {offsets = [14, 0], sizes = [2, 64], strides = [1, 1]} : vector<16x64xf32> to vector<2x64xf32>
    %524 = vector.extract_strided_slice %512 {offsets = [0, 128], sizes = [2, 64], strides = [1, 1]} : vector<2x192xf32> to vector<2x64xf32>
    %525 = arith.addf %524, %363 : vector<2x64xf32>
    %526 = arith.mulf %521, %525 : vector<2x64xf32>
    %527 = arith.addf %523, %526 : vector<2x64xf32>
    %528 = math.tanh %527 : vector<2x64xf32>
    %529 = arith.subf %511, %528 : vector<2x64xf32>
    %530 = arith.mulf %522, %529 : vector<2x64xf32>
    %531 = arith.addf %528, %530 : vector<2x64xf32>
    %c0_86 = arith.constant 0 : index
    %c0_87 = arith.constant 0 : index
    %532 = vector.load %arg6[%c0_86, %c0_87] : memref<1x64xf32, #tpu.memory_space<vmem>>, vector<1x64xf32>
    %533 = vector.broadcast %532 : vector<1x64xf32> to vector<2x64xf32>
    %534 = arith.mulf %531, %533 : vector<2x64xf32>
    %cst_88 = arith.constant dense<0.000000e+00> : vector<2xf32>
    %535 = vector.multi_reduction <add>, %534, %cst_88 [1] : vector<2x64xf32> to vector<2xf32>
    %536 = vector.shape_cast %535 : vector<2xf32> to vector<2x1xf32>
    %c0_89 = arith.constant 0 : index
    %c0_90 = arith.constant 0 : index
    %537 = vector.load %arg7[%c0_89, %c0_90] : memref<1x1xf32, #tpu.memory_space<vmem>>, vector<1x1xf32>
    %538 = vector.broadcast %537 : vector<1x1xf32> to vector<2x1xf32>
    %539 = arith.addf %536, %538 : vector<2x1xf32>
    %c0_91 = arith.constant 0 : index
    %c0_92 = arith.constant 0 : index
    %540 = vector.load %arg8[%c0_91, %c0_92] : memref<2x1xf32, #tpu.memory_space<vmem>>, vector<2x1xf32>
    tpu.vector_store %arg8[%c0_91, %c0_92], %539 {strides = array<i32>} : memref<2x1xf32, #tpu.memory_space<vmem>>, vector<2x1xf32>,
    return
  }
}

</mosaic_0001>

<bundles_post_ra>
// kernel: tpu_custom_call.1
= control target key start
LH: loop header
LB: loop body
LE: loop exit
PB: predicated region body
PF: predicated region fallthrough
CT: control target
= control target key end

     0   :  { %s3642_s0 = inlined_call_operand.vmem [shape: f32[16,1], index: 0, kind: input, shape index: {}]   ;;  %s3643_s1 = inlined_call_operand.vmem [shape: f32[1,192], index: 1, kind: input, shape index: {}]   ;;  %s3644_s2 = inlined_call_operand.hbm [shape: f32[2,64,192], index: 2, kind: input, shape index: {}]   ;;  %s3645_s3 = inlined_call_operand.hbm [shape: f32[3,64,192], index: 3, kind: input, shape index: {}]   ;;  %s3646_s4 = inlined_call_operand.vmem [shape: f32[3,1,192], index: 4, kind: input, shape index: {}]   ;;  %s3647_s5 = inlined_call_operand.vmem [shape: f32[3,1,64], index: 5, kind: input, shape index: {}]   ;;  %s3648_s6 = inlined_call_operand.vmem [shape: f32[1,64], index: 6, kind: input, shape index: {}]   ;;  %s3649_s7 = inlined_call_operand.<no memory space> [shape: f32[1,1], index: 7, kind: input, shape index: {}]   ;;  %s3650_s8 = inlined_call_operand.vmem [shape: f32[2,1], index: 8, kind: output, shape index: {}]  }
   0x1   :  { %v13_v0 = vstv %s3649_s7 }
   0x2   :  { %14 = vst [vmem:[#allocation2] sm:$0x1] %v13_v0 }
   0x3   :  { %15 = vsyncpa [#allocation4], 0  ;;  %s25_s9 = sshll.u32 %s3644_s2, 4  ;;  %s26_s9 = int_to_ptr.hbm [resolvable:$true] %s25_s9 }
   0x4   :  { %16 = vsyncpa [#allocation6], 0  ;;  %s2708_s10 = smov [#allocation3]   ;;  %s38_s14 = sshll.u32 %s3645_s3, 4  ;;  %s39_s14 = int_to_ptr.hbm [resolvable:$true] %s38_s14 }
   0x5   :  { %s27_s11 = sshll.u32 %s2708_s10, 4  ;;  %s2709_s15 = smov 256   ;;  %s28_s11 = int_to_ptr.vmem [resolvable:$true] %s27_s11 }
   0x6   :  { %s2710_s16 = smov 16   ;;  %s2711_s7 = smov [#allocation5]  }
   0x7   :  { %33 = dma.hbm_to_vmem [thread:$0]  %s26_s9, 4096, %s28_s11, [#allocation4], %s2709_s15, %s2709_s15, %s2710_s16  }
   0x8   :  { %s40_s17 = sshll.u32 %s2711_s7, 4  ;;  %s41_s17 = int_to_ptr.vmem [resolvable:$true] %s40_s17 }
   0x9   :  { %46 = dma.hbm_to_vmem [thread:$0]  %s39_s14, 6144, %s41_s17, [#allocation6], %s2709_s15, %s2709_s15, %s2710_s16  }
   0xa   :  { %2704 = dma.done.wait [#allocation4], 4096  }
   0xb   :  { %2705 = vsyncadd [#allocation4], 4294963200 }
   0xc   :  { %2706 = dma.done.wait [#allocation6], 6144  }
   0xd   :  { %2707 = vsyncadd [#allocation6], 4294961152  ;;  %v2712_v1 = vmov 0   ;;  %v2769_v2 = vld [vmem:[#allocation5 + $0x70] sm:$0xff]  ;;  %v2771_v3 = vld [vmem:[#allocation5 + $0x60] sm:$0xff]  ;;  %v2713_v19 = vmov 0.0  }
   0xe   :  { %2506 = vset.pattern.permute.xlu0 %v2712_v1  ;;  %127 = vmatpush.msra.mxu0 %v2769_v2  ;;  %v2775_v4 = vld [vmem:[#allocation5 + $0x50] sm:$0xff]  ;;  %v84_v5 = vld [vmem:[%s3642_s0] sm:$0xff]  ;;  %v2783_v7 = vld [vmem:[#allocation5 + $0x68] sm:$0xff]  ;;  %s2714_s23 = smov 64   ;;  %vm115_vm4 = vcmask 523264  }
   0xf   :  { %205 = vmatpush.msra.mxu2 %v2769_v2  ;;  %89 = vperm.xlu0 %2506, %v84_v5   ;;  %v2781_v6 = vld [vmem:[#allocation5 + $0x78] sm:$0xff]  ;;  %v2785_v8 = vld [vmem:[#allocation5 + $0x40] sm:$0xff]  ;;  %v2790_v9 = vld [vmem:[#allocation5 + $0x30] sm:$0xff] }
  0x10   :  { %128 = vmatpush.msra.mxu0 %v2771_v3  ;;  %147 = vmatpush.msra.mxu1 %v2781_v6  ;;  %v2792_v10 = vld [vmem:[#allocation5 + $0x58] sm:$0xff]  ;;  %v2796_v11 = vld [vmem:[#allocation5 + $0x48] sm:$0xff]  ;;  %v2801_v12 = vld [vmem:[#allocation5 + $0x20] sm:$0xff] }
  0x11   :  { %225 = vmatpush.msra.mxu3 %v2781_v6  ;;  %206 = vmatpush.msra.mxu2 %v2771_v3  ;;  %v2806_v13 = vld [vmem:[#allocation5 + $0x38] sm:$0xff]  ;;  %v2809_v14 = vld [vmem:[#allocation5 + $0x10] sm:$0xff]  ;;  %v2814_v15 = vld [vmem:[#allocation5 + $0x28] sm:$0xff] }
  0x12   :  { %129 = vmatpush.msra.mxu0 %v2775_v4  ;;  %148 = vmatpush.msra.mxu1 %v2783_v7  ;;  %v2817_v16 = vld [vmem:[#allocation5] sm:$0xff]  ;;  %v2822_v17 = vld [vmem:[#allocation5 + $0x18] sm:$0xff]  ;;  %v2828_v18 = vld [vmem:[#allocation5 + $0x8] sm:$0xff] }
  0x13   :  { %226 = vmatpush.msra.mxu3 %v2783_v7  ;;  %207 = vmatpush.msra.mxu2 %v2775_v4  ;;  %v2889_v20 = vld [vmem:[%s3643_s1] sm:$0x3] }
  0x14   :  { %130 = vmatpush.msra.mxu0 %v2785_v8  ;;  %149 = vmatpush.msra.mxu1 %v2792_v10  ;;  %v98_v21 = vperm.slane %v2889_v20, 0  ;;  %v2895_v23 = vld [vmem:[%s3646_s4] sm:$0x3]  ;;  %v99_v34 = vperm.slane %v2889_v20, 1 }
  0x15   :  { %227 = vmatpush.msra.mxu3 %v2792_v10  ;;  %208 = vmatpush.msra.mxu2 %v2785_v8  ;;  %v107_v25 = vperm.slane %v2895_v23, 0  ;;  %v2909_v35 = vld [vmem:[%s3647_s5] ss:$0 sm:$0xff]  ;;  %v108_v41 = vperm.slane %v2895_v23, 1 }
  0x16   :  { %131 = vmatpush.msra.mxu0 %v2790_v9  ;;  %150 = vmatpush.msra.mxu1 %v2796_v11 }
  0x17   :  { %228 = vmatpush.msra.mxu3 %v2796_v11  ;;  %209 = vmatpush.msra.mxu2 %v2790_v9 }
  0x18   :  { %132 = vmatpush.msra.mxu0 %v2801_v12  ;;  %151 = vmatpush.msra.mxu1 %v2806_v13 }
  0x19   :  { %229 = vmatpush.msra.mxu3 %v2806_v13  ;;  %210 = vmatpush.msra.mxu2 %v2801_v12 }
  0x1a   :  { %133 = vmatpush.msra.mxu0 %v2809_v14  ;;  %152 = vmatpush.msra.mxu1 %v2814_v15 }
  0x1b   :  { %230 = vmatpush.msra.mxu3 %v2814_v15  ;;  %211 = vmatpush.msra.mxu2 %v2809_v14 }
  0x1c   :  { %134 = vmatpush.msra.mxu0 %v2817_v16  ;;  %153 = vmatpush.msra.mxu1 %v2822_v17 }
  0x1d   :  { %135 = vmatmul.f32.vlgmr.msra.gmra.mxu0 %v2713_v19  ;;  %231 = vmatpush.msra.mxu3 %v2822_v17 }
  0x1e   :  { %212 = vmatpush.msra.mxu2 %v2817_v16  ;;  %154 = vmatpush.msra.mxu1 %v2828_v18 }
  0x1f   :  { %294 = vmatpush.msrb.mxu0 %v2769_v2  ;;  %155 = vmatmul.f32.vlgmr.msra.gmra.mxu1 %v2713_v19 }
  0x20   :  { %232 = vmatpush.msra.mxu3 %v2828_v18  ;;  %314 = vmatpush.msrb.mxu1 %v2781_v6 }
  0x21   :  { %295 = vmatpush.msrb.mxu0 %v2771_v3  ;;  %383 = vmatpush.msrb.mxu2 %v2769_v2 }
  0x22   :  { %403 = vmatpush.msrb.mxu3 %v2781_v6  ;;  %315 = vmatpush.msrb.mxu1 %v2783_v7 }
  0x23   :  { %296 = vmatpush.msrb.mxu0 %v2775_v4  ;;  %384 = vmatpush.msrb.mxu2 %v2771_v3 }
  0x24   :  { %404 = vmatpush.msrb.mxu3 %v2783_v7  ;;  %316 = vmatpush.msrb.mxu1 %v2792_v10 }
  0x25   :  { %297 = vmatpush.msrb.mxu0 %v2785_v8  ;;  %385 = vmatpush.msrb.mxu2 %v2775_v4 }
  0x26   :  { %405 = vmatpush.msrb.mxu3 %v2792_v10  ;;  %317 = vmatpush.msrb.mxu1 %v2796_v11 }
  0x27   :  { %298 = vmatpush.msrb.mxu0 %v2790_v9  ;;  %386 = vmatpush.msrb.mxu2 %v2785_v8 }
  0x28   :  { %406 = vmatpush.msrb.mxu3 %v2796_v11  ;;  %318 = vmatpush.msrb.mxu1 %v2806_v13 }
  0x29   :  { %299 = vmatpush.msrb.mxu0 %v2801_v12  ;;  %387 = vmatpush.msrb.mxu2 %v2790_v9 }
  0x2a   :  { %407 = vmatpush.msrb.mxu3 %v2806_v13  ;;  %319 = vmatpush.msrb.mxu1 %v2814_v15 }
  0x2b   :  { %300 = vmatpush.msrb.mxu0 %v2809_v14  ;;  %388 = vmatpush.msrb.mxu2 %v2801_v12 }
  0x2c   :  { %408 = vmatpush.msrb.mxu3 %v2814_v15  ;;  %320 = vmatpush.msrb.mxu1 %v2822_v17 }
  0x2d   :  { %301 = vmatpush.msrb.mxu0 %v2817_v16  ;;  %389 = vmatpush.msrb.mxu2 %v2809_v14 }
  0x2e   :  { %409 = vmatpush.msrb.mxu3 %v2822_v17  ;;  %321 = vmatpush.msrb.mxu1 %v2828_v18 }
  0x2f   :  { %472 = vmatpush.msra.mxu0 %v2769_v2  ;;  %390 = vmatpush.msrb.mxu2 %v2817_v16 }
  0x30   :  { %410 = vmatpush.msrb.mxu3 %v2828_v18  ;;  %492 = vmatpush.msra.mxu1 %v2781_v6 }
  0x31   :  { %473 = vmatpush.msra.mxu0 %v2771_v3 }
  0x32   :  { %493 = vmatpush.msra.mxu1 %v2783_v7 }
  0x33   :  { %474 = vmatpush.msra.mxu0 %v2775_v4 }
  0x34   :  { %494 = vmatpush.msra.mxu1 %v2792_v10 }
  0x35   :  { %475 = vmatpush.msra.mxu0 %v2785_v8 }
  0x36   :  { %495 = vmatpush.msra.mxu1 %v2796_v11 }
  0x37   :  { %476 = vmatpush.msra.mxu0 %v2790_v9 }
  0x38   :  { %496 = vmatpush.msra.mxu1 %v2806_v13 }
  0x39   :  { %477 = vmatpush.msra.mxu0 %v2801_v12 }
  0x3a   :  { %497 = vmatpush.msra.mxu1 %v2814_v15 }
  0x3b   :  { %478 = vmatpush.msra.mxu0 %v2809_v14 }
  0x3c   :  { %498 = vmatpush.msra.mxu1 %v2822_v17 }
  0x3d   :  { %479 = vmatpush.msra.mxu0 %v2817_v16 }
  0x3e   :  { %499 = vmatpush.msra.mxu1 %v2828_v18 }
  0x81   :  { %v90_v22 = vpop.permute.xlu0 %89 }
  0x82   :  { %v102_v24 = vmul.f32 %v98_v21, %v90_v22  ;;  %v103_v42 = vmul.f32 %v99_v34, %v90_v22 }
  0x84   :  { %v2902_v26 = vadd.f32 %v107_v25, %v102_v24  ;;  %v2917_v48 = vadd.f32 %v108_v41, %v103_v42 }
  0x9a   :  { %v136_v27 = vpop.f32.mrf.mxu0 }
  0x9b   :  { %v159_v28 = vadd.f32 %v136_v27, %v2902_v26 }
  0x9c   :  { %v156_v37 = vpop.f32.mrf.mxu1 }
  0x9d   :  { %v2421_v29 = vmul.f32 -1.442695, %v159_v28  ;;  %v179_v44 = vadd.f32 %v2909_v35, %v156_v37 }
  0x9f   :  { %2512 = vpow2.f32 %v2421_v29 }
  0xa5   :  { %v2513_v30 = vpop.eup %2512 }
  0xa6   :  { %v163_v31 = vadd.f32 1.0, %v2513_v30 }
  0xa8   :  { %2514 = vrcp.f32 %v163_v31  ;;  %v175_v38 = vand.u32 2147483648, %v163_v31  ;;  %v173_v40 = vand.u32 2147483647, %v163_v31  ;;  %vm169_vm1 = vweird.f32 %v163_v31 }
  0xaa   :  { %v176_v45 = vor.u32 1.1754944e-38, %v175_v38  ;;  %vm174_vm3 = vcmp.eq.f32.partialorder %v173_v40, 8.507059e+37 }
  0xae   :  { %v2515_v32 = vpop.eup %2514 }
  0xaf   :  { %v165_v33 = vmul.f32 %v2515_v32, %v163_v31  ;;  %vm170_vm0 = vweird.f32 %v2515_v32 }
  0xb0   :  { %vm171_vm2 = vmor %vm169_vm1, %vm170_vm0 }
  0xb1   :  { %v166_v36 = vsub.f32 1.0, %v165_v33 }
  0xb3   :  { %v167_v39 = vmul.f32 %v2515_v32, %v166_v36 }
  0xb5   :  { %v168_v43 = vadd.f32 %v2515_v32, %v167_v39 }
  0xb7   :  { %v172_v46 = vsel %vm171_vm2, %v2515_v32, %v168_v43 }
  0xb8   :  { %v177_v47 = vsel %vm174_vm3, %v176_v45, %v172_v46 }
  0xb9   :  { %v180_v49 = vmul.f32 %v179_v44, %v177_v47 }
  0xbb   :  { %v181_v50 = vadd.f32 %v180_v49, %v2917_v48 }
  0xbd   :  { %2516 = vtanh.f32 %v181_v50 }
  0xc3   :  { %v2517_v51 = vpop.eup %2516 }
  0xc4   :  { %v183_v52 = vsub.f32 0.0, %v2517_v51 }
  0xc6   :  { %185 = vrot.lane.b32.xlu0 %v183_v52, %s2714_s23 }
 0x138   :  { %v186_v53 = vpop.permute.xlu0 %185 }
 0x139   :  { %v188_v54 = vmul.f32 %v186_v53, %v177_v47 }
 0x13b   :  { %190 = vrot.lane.b32.xlu1 %v188_v54, %s2714_s23 }
 0x1ad   :  { %v191_v55 = vpop.permute.xlu1 %190 }
 0x1ae   :  { %v2922_v56 = vadd.f32 %v2517_v51, %v191_v55 }
 0x1b0   :  { %2422 = vmatmul.msk.f32.vlgmr.msra.gmra.mxu2 %vm115_vm4, %v2922_v56  ;;  %2423 = vmatmul.msk.f32.vlgmr.msra.gmra.mxu3 %vm115_vm4, %v2922_v56 }
 0x1b1   :  { %554 = vmatpush.msra.mxu2 %v2769_v2  ;;  %574 = vmatpush.msra.mxu3 %v2781_v6 }
 0x1b3   :  { %555 = vmatpush.msra.mxu2 %v2771_v3  ;;  %575 = vmatpush.msra.mxu3 %v2783_v7 }
 0x1b5   :  { %556 = vmatpush.msra.mxu2 %v2775_v4  ;;  %576 = vmatpush.msra.mxu3 %v2792_v10 }
 0x1b7   :  { %557 = vmatpush.msra.mxu2 %v2785_v8  ;;  %577 = vmatpush.msra.mxu3 %v2796_v11 }
 0x1b9   :  { %558 = vmatpush.msra.mxu2 %v2790_v9  ;;  %578 = vmatpush.msra.mxu3 %v2806_v13 }
 0x1bb   :  { %559 = vmatpush.msra.mxu2 %v2801_v12  ;;  %579 = vmatpush.msra.mxu3 %v2814_v15 }
 0x1bd   :  { %560 = vmatpush.msra.mxu2 %v2809_v14  ;;  %580 = vmatpush.msra.mxu3 %v2822_v17 }
 0x1bf   :  { %561 = vmatpush.msra.mxu2 %v2817_v16  ;;  %581 = vmatpush.msra.mxu3 %v2828_v18 }
 0x233   :  { %v214_v57 = vpop.f32.mrf.mxu2  ;;  %v234_v1 = vpop.f32.mrf.mxu3 }
 0x234   :  { %v238_v58 = vrot.slane %v214_v57, 6  ;;  %v260_v28 = vadd.f32 %v2909_v35, %v234_v1 }
 0x236   :  { %v240_v59 = vadd.f32 %v238_v58, %v2902_v26  ;;  %v262_v32 = vrot.slane %v260_v28, 6 }
 0x238   :  { %v2424_v60 = vmul.f32 -1.442695, %v240_v59 }
 0x23a   :  { %2518 = vpow2.f32 %v2424_v60 }
 0x240   :  { %v2519_v61 = vpop.eup %2518 }
 0x241   :  { %v244_v62 = vadd.f32 1.0, %v2519_v61 }
 0x243   :  { %2520 = vrcp.f32 %v244_v62  ;;  %v256_v22 = vand.u32 2147483648, %v244_v62  ;;  %v254_v27 = vand.u32 2147483647, %v244_v62  ;;  %vm250_vm6 = vweird.f32 %v244_v62 }
 0x245   :  { %v257_v30 = vor.u32 1.1754944e-38, %v256_v22  ;;  %vm255_vm8 = vcmp.eq.f32.partialorder %v254_v27, 8.507059e+37 }
 0x249   :  { %v2521_v63 = vpop.eup %2520 }
 0x24a   :  { %v246_v0 = vmul.f32 %v2521_v63, %v244_v62  ;;  %vm251_vm5 = vweird.f32 %v2521_v63 }
 0x24b   :  { %vm252_vm7 = vmor %vm250_vm6, %vm251_vm5 }
 0x24c   :  { %v247_v5 = vsub.f32 1.0, %v246_v0 }
 0x24e   :  { %v248_v24 = vmul.f32 %v2521_v63, %v247_v5 }
 0x250   :  { %v249_v29 = vadd.f32 %v2521_v63, %v248_v24 }
 0x252   :  { %v253_v31 = vsel %vm252_vm7, %v2521_v63, %v249_v29 }
 0x253   :  { %v258_v33 = vsel %vm255_vm8, %v257_v30, %v253_v31 }
 0x254   :  { %v264_v36 = vmul.f32 %v262_v32, %v258_v33 }
 0x256   :  { %v265_v37 = vadd.f32 %v264_v36, %v2917_v48 }
 0x258   :  { %2522 = vtanh.f32 %v265_v37  ;;  %v85_v37 = vld [vmem:[%s3642_s0 + $0x8] sm:$0xff] }
 0x25e   :  { %v2523_v38 = vpop.eup %2522 }
 0x25f   :  { %v268_v39 = vrot.slane %v2523_v38, 2 }
 0x261   :  { %v270_v40 = vsub.f32 %v2922_v56, %v268_v39 }
 0x263   :  { %v272_v42 = vrot.slane %v270_v40, 6 }
 0x265   :  { %273 = vrot.lane.b32.xlu1 %v272_v42, %s2714_s23 }
 0x2d7   :  { %v274_v43 = vpop.permute.xlu1 %273 }
 0x2d8   :  { %v276_v44 = vmul.f32 %v274_v43, %v258_v33 }
 0x2da   :  { %278 = vrot.lane.b32.xlu2 %v276_v44, %s2714_s23 }
 0x334   :  { %v279_v45 = vpop.permute.xlu2 %278 }
 0x335   :  { %v2950_v46 = vadd.f32 %v2523_v38, %v279_v45 }
 0x337   :  { %v283_v47 = vrot.slane %v2950_v46, 2 }
 0x339   :  { %2425 = vmatmul.msk.f32.vlgmr.msrb.gmra.mxu0 %vm115_vm4, %v283_v47  ;;  %2426 = vmatmul.msk.f32.vlgmr.msrb.gmra.mxu1 %vm115_vm4, %v283_v47 }
 0x33a   :  { %643 = vmatpush.msrb.mxu0 %v2769_v2  ;;  %663 = vmatpush.msrb.mxu1 %v2781_v6 }
 0x33c   :  { %644 = vmatpush.msrb.mxu0 %v2771_v3  ;;  %664 = vmatpush.msrb.mxu1 %v2783_v7 }
 0x33e   :  { %645 = vmatpush.msrb.mxu0 %v2775_v4  ;;  %665 = vmatpush.msrb.mxu1 %v2792_v10 }
 0x340   :  { %646 = vmatpush.msrb.mxu0 %v2785_v8  ;;  %666 = vmatpush.msrb.mxu1 %v2796_v11 }
 0x342   :  { %647 = vmatpush.msrb.mxu0 %v2790_v9  ;;  %667 = vmatpush.msrb.mxu1 %v2806_v13 }
 0x344   :  { %648 = vmatpush.msrb.mxu0 %v2801_v12  ;;  %668 = vmatpush.msrb.mxu1 %v2814_v15 }
 0x346   :  { %649 = vmatpush.msrb.mxu0 %v2809_v14  ;;  %669 = vmatpush.msrb.mxu1 %v2822_v17 }
 0x348   :  { %650 = vmatpush.msrb.mxu0 %v2817_v16  ;;  %670 = vmatpush.msrb.mxu1 %v2828_v18 }
 0x3b6   :  { %v303_v49 = vpop.f32.mrf.mxu0  ;;  %v323_v58 = vpop.f32.mrf.mxu1 }
 0x3b7   :  { %v327_v50 = vrot.slane %v303_v49, 4  ;;  %v349_v63 = vadd.f32 %v2909_v35, %v323_v58 }
 0x3b9   :  { %v329_v51 = vadd.f32 %v327_v50, %v2902_v26  ;;  %v351_v22 = vrot.slane %v349_v63, 4 }
 0x3bb   :  { %v2427_v52 = vmul.f32 -1.442695, %v329_v51 }
 0x3bd   :  { %2524 = vpow2.f32 %v2427_v52 }
 0x3c3   :  { %v2525_v53 = vpop.eup %2524 }
 0x3c4   :  { %v333_v54 = vadd.f32 1.0, %v2525_v53 }
 0x3c6   :  { %2526 = vrcp.f32 %v333_v54  ;;  %v345_v60 = vand.u32 2147483648, %v333_v54  ;;  %v343_v62 = vand.u32 2147483647, %v333_v54  ;;  %vm339_vm10 = vweird.f32 %v333_v54 }
 0x3c8   :  { %v346_v1 = vor.u32 1.1754944e-38, %v345_v60  ;;  %vm344_vm12 = vcmp.eq.f32.partialorder %v343_v62, 8.507059e+37 }
 0x3cc   :  { %v2527_v55 = vpop.eup %2526 }
 0x3cd   :  { %v335_v57 = vmul.f32 %v2527_v55, %v333_v54  ;;  %vm340_vm9 = vweird.f32 %v2527_v55 }
 0x3ce   :  { %vm341_vm11 = vmor %vm339_vm10, %vm340_vm9  ;;  %vm809_vm10 = vcmask 1041408  }
 0x3cf   :  { %v336_v59 = vsub.f32 1.0, %v335_v57 }
 0x3d1   :  { %v337_v61 = vmul.f32 %v2527_v55, %v336_v59 }
 0x3d3   :  { %v338_v0 = vadd.f32 %v2527_v55, %v337_v61 }
 0x3d5   :  { %v342_v5 = vsel %vm341_vm11, %v2527_v55, %v338_v0  ;;  %vm811_vm11 = vcmask 1043456  }
 0x3d6   :  { %v347_v24 = vsel %vm344_vm12, %v346_v1, %v342_v5  ;;  %vm813_vm12 = vcmask 1045504  }
 0x3d7   :  { %v353_v27 = vmul.f32 %v351_v22, %v347_v24 }
 0x3d9   :  { %v354_v28 = vadd.f32 %v353_v27, %v2917_v48 }
 0x3db   :  { %2528 = vtanh.f32 %v354_v28 }
 0x3e1   :  { %v2529_v29 = vpop.eup %2528 }
 0x3e2   :  { %v357_v30 = vrot.slane %v2529_v29, 2 }
 0x3e4   :  { %v359_v31 = vsub.f32 %v2950_v46, %v357_v30 }
 0x3e6   :  { %v361_v32 = vrot.slane %v359_v31, 6 }
 0x3e8   :  { %362 = vrot.lane.b32.xlu2 %v361_v32, %s2714_s23 }
 0x442   :  { %v363_v33 = vpop.permute.xlu2 %362 }
 0x443   :  { %v365_v36 = vmul.f32 %v363_v33, %v347_v24 }
 0x445   :  { %367 = vrot.lane.b32.xlu0 %v365_v36, %s2714_s23 }
 0x44d   :  { %94 = vperm.xlu0 %2506, %v85_v37  }
 0x4b7   :  { %v368_v38 = vpop.permute.xlu0 %367 }
 0x4b8   :  { %v2980_v39 = vadd.f32 %v2529_v29, %v368_v38 }
 0x4ba   :  { %v372_v40 = vrot.slane %v2980_v39, 4 }
 0x4bc   :  { %2428 = vmatmul.msk.f32.vlgmr.msrb.gmra.mxu2 %vm115_vm4, %v372_v40  ;;  %2429 = vmatmul.msk.f32.vlgmr.msrb.gmra.mxu3 %vm115_vm4, %v372_v40 }
 0x4bd   :  { %732 = vmatpush.msrb.mxu2 %v2769_v2  ;;  %752 = vmatpush.msrb.mxu3 %v2781_v6 }
 0x4bf   :  { %733 = vmatpush.msrb.mxu2 %v2771_v3  ;;  %753 = vmatpush.msrb.mxu3 %v2783_v7 }
 0x4c1   :  { %734 = vmatpush.msrb.mxu2 %v2775_v4  ;;  %754 = vmatpush.msrb.mxu3 %v2792_v10 }
 0x4c3   :  { %735 = vmatpush.msrb.mxu2 %v2785_v8  ;;  %755 = vmatpush.msrb.mxu3 %v2796_v11 }
 0x4c5   :  { %736 = vmatpush.msrb.mxu2 %v2790_v9  ;;  %756 = vmatpush.msrb.mxu3 %v2806_v13 }
 0x4c7   :  { %737 = vmatpush.msrb.mxu2 %v2801_v12  ;;  %757 = vmatpush.msrb.mxu3 %v2814_v15 }
 0x4c9   :  { %738 = vmatpush.msrb.mxu2 %v2809_v14  ;;  %758 = vmatpush.msrb.mxu3 %v2822_v17 }
 0x4cb   :  { %739 = vmatpush.msrb.mxu2 %v2817_v16  ;;  %759 = vmatpush.msrb.mxu3 %v2828_v18 }
 0x53f   :  { %v392_v2 = vpop.f32.mrf.mxu2  ;;  %v412_v11 = vpop.f32.mrf.mxu3 }
 0x540   :  { %v416_v3 = vrot.slane %v392_v2, 2  ;;  %v438_v16 = vadd.f32 %v2909_v35, %v412_v11 }
 0x542   :  { %v418_v4 = vadd.f32 %v416_v3, %v2902_v26  ;;  %v440_v42 = vrot.slane %v438_v16, 2 }
 0x544   :  { %v2430_v6 = vmul.f32 -1.442695, %v418_v4 }
 0x546   :  { %2530 = vpow2.f32 %v2430_v6 }
 0x54c   :  { %v2531_v7 = vpop.eup %2530 }
 0x54d   :  { %v422_v8 = vadd.f32 1.0, %v2531_v7 }
 0x54f   :  { %2532 = vrcp.f32 %v422_v8  ;;  %v434_v13 = vand.u32 2147483648, %v422_v8  ;;  %v432_v15 = vand.u32 2147483647, %v422_v8  ;;  %vm428_vm14 = vweird.f32 %v422_v8 }
 0x551   :  { %v435_v18 = vor.u32 1.1754944e-38, %v434_v13  ;;  %vm433_vm0 = vcmp.eq.f32.partialorder %v432_v15, 8.507059e+37 }
 0x555   :  { %v2533_v9 = vpop.eup %2532 }
 0x556   :  { %v424_v10 = vmul.f32 %v2533_v9, %v422_v8  ;;  %vm429_vm13 = vweird.f32 %v2533_v9 }
 0x557   :  { %vm430_vm15 = vmor %vm428_vm14, %vm429_vm13 }
 0x558   :  { %v425_v12 = vsub.f32 1.0, %v424_v10 }
 0x55a   :  { %v426_v14 = vmul.f32 %v2533_v9, %v425_v12 }
 0x55c   :  { %v427_v17 = vadd.f32 %v2533_v9, %v426_v14 }
 0x55e   :  { %v431_v26 = vsel %vm430_vm15, %v2533_v9, %v427_v17 }
 0x55f   :  { %v436_v43 = vsel %vm433_vm0, %v435_v18, %v431_v26 }
 0x560   :  { %v442_v44 = vmul.f32 %v440_v42, %v436_v43 }
 0x562   :  { %v443_v45 = vadd.f32 %v442_v44, %v2917_v48  ;;  %v95_v48 = vpop.permute.xlu0 %94 }
 0x563   :  { %v104_v58 = vmul.f32 %v98_v21, %v95_v48 }
 0x564   :  { %2534 = vtanh.f32 %v443_v45 }
 0x565   :  { %v3016_v59 = vadd.f32 %v107_v25, %v104_v58  ;;  %v105_v25 = vmul.f32 %v99_v34, %v95_v48  ;;  %v857_v48 = vld [vmem:[#allocation3 + $0x78] sm:$0xff]  ;;  %v854_v58 = vld [vmem:[#allocation3 + $0x60] sm:$0xff] }
 0x567   :  { %v3024_v36 = vadd.f32 %v108_v41, %v105_v25  ;;  %v845_v25 = vld [vmem:[#allocation3 + $0x18] sm:$0xff] }
 0x56a   :  { %v2535_v47 = vpop.eup %2534 }
 0x56b   :  { %v446_v49 = vrot.slane %v2535_v47, 2 }
 0x56d   :  { %v448_v50 = vsub.f32 %v2980_v39, %v446_v49 }
 0x56f   :  { %v450_v51 = vrot.slane %v448_v50, 6 }
 0x571   :  { %451 = vrot.lane.b32.xlu1 %v450_v51, %s2714_s23 }
 0x5e3   :  { %v452_v52 = vpop.permute.xlu1 %451 }
 0x5e4   :  { %v454_v53 = vmul.f32 %v452_v52, %v436_v43 }
 0x5e6   :  { %456 = vrot.lane.b32.xlu2 %v454_v53, %s2714_s23 }
 0x640   :  { %v457_v54 = vpop.permute.xlu2 %456 }
 0x641   :  { %v3007_v55 = vadd.f32 %v2535_v47, %v457_v54 }
 0x643   :  { %v461_v57 = vrot.slane %v3007_v55, 6 }
 0x645   :  { %2431 = vmatmul.msk.f32.vlgmr.msra.gmra.mxu0 %vm115_vm4, %v461_v57  ;;  %2432 = vmatmul.msk.f32.vlgmr.msra.gmra.mxu1 %vm115_vm4, %v461_v57  ;;  %v856_v57 = vld [vmem:[#allocation3 + $0x70] sm:$0xff] }
 0x646   :  { %877 = vmatpush.msra.mxu0 %v856_v57  ;;  %900 = vmatpush.msra.mxu1 %v857_v48  ;;  %v3097_v57 = vld [vmem:[#allocation5 + $0xf8] sm:$0xff]  ;;  %v3099_v48 = vld [vmem:[#allocation5 + $0xe8] sm:$0xff] }
 0x648   :  { %878 = vmatpush.msra.mxu0 %v854_v58  ;;  %v3104_v58 = vld [vmem:[#allocation5 + $0xd8] sm:$0xff] }
 0x6c2   :  { %v481_v60 = vpop.f32.mrf.mxu0  ;;  %v501_v21 = vpop.f32.mrf.mxu1 }
 0x6c3   :  { %v504_v61 = vadd.f32 %v481_v60, %v3016_v59  ;;  %v524_v32 = vadd.f32 %v2909_v35, %v501_v21  ;;  %v855_v60 = vld [vmem:[#allocation3 + $0x68] sm:$0xff]  ;;  %v844_v21 = vld [vmem:[#allocation3 + $0x10] sm:$0xff] }
 0x6c4   :  { %901 = vmatpush.msra.mxu1 %v855_v60  ;;  %v3109_v60 = vld [vmem:[#allocation5 + $0xc8] sm:$0xff] }
 0x6c5   :  { %v2433_v62 = vmul.f32 -1.442695, %v504_v61 }
 0x6c7   :  { %2536 = vpow2.f32 %v2433_v62 }
 0x6cd   :  { %v2537_v63 = vpop.eup %2536 }
 0x6ce   :  { %v508_v0 = vadd.f32 1.0, %v2537_v63  ;;  %v852_v63 = vld [vmem:[#allocation3 + $0x50] sm:$0xff] }
 0x6cf   :  { %879 = vmatpush.msra.mxu0 %v852_v63  ;;  %v3124_v63 = vld [vmem:[#allocation5 + $0x98] sm:$0xff] }
 0x6d0   :  { %2538 = vrcp.f32 %v508_v0  ;;  %v520_v24 = vand.u32 2147483648, %v508_v0  ;;  %v518_v28 = vand.u32 2147483647, %v508_v0  ;;  %vm514_vm2 = vweird.f32 %v508_v0 }
 0x6d2   :  { %v521_v30 = vor.u32 1.1754944e-38, %v520_v24  ;;  %vm519_vm5 = vcmp.eq.f32.partialorder %v518_v28, 8.507059e+37  ;;  %v849_v24 = vld [vmem:[#allocation3 + $0x38] sm:$0xff]  ;;  %v847_v28 = vld [vmem:[#allocation3 + $0x28] sm:$0xff] }
 0x6d6   :  { %v2539_v1 = vpop.eup %2538 }
 0x6d7   :  { %v510_v5 = vmul.f32 %v2539_v1, %v508_v0  ;;  %vm515_vm1 = vweird.f32 %v2539_v1  ;;  %v853_v0 = vld [vmem:[#allocation3 + $0x58] sm:$0xff] }
 0x6d8   :  { %vm516_vm3 = vmor %vm514_vm2, %vm515_vm1  ;;  %902 = vmatpush.msra.mxu1 %v853_v0  ;;  %v3129_v0 = vld [vmem:[#allocation5 + $0x88] sm:$0xff] }
 0x6d9   :  { %v511_v22 = vsub.f32 1.0, %v510_v5  ;;  %v851_v5 = vld [vmem:[#allocation3 + $0x48] sm:$0xff] }
 0x6da   :  { %903 = vmatpush.msra.mxu1 %v851_v5 }
 0x6db   :  { %v512_v27 = vmul.f32 %v2539_v1, %v511_v22  ;;  %v848_v22 = vld [vmem:[#allocation3 + $0x30] sm:$0xff] }
 0x6dc   :  { %904 = vmatpush.msra.mxu1 %v849_v24  ;;  %v3188_v24 = vld [vmem:[%s3646_s4 + $0x2] sm:$0x3] }
 0x6dd   :  { %v513_v29 = vadd.f32 %v2539_v1, %v512_v27  ;;  %v846_v27 = vld [vmem:[#allocation3 + $0x20] sm:$0xff] }
 0x6de   :  { %905 = vmatpush.msra.mxu1 %v847_v28 }
 0x6df   :  { %v517_v31 = vsel %vm516_vm3, %v2539_v1, %v513_v29  ;;  %v850_v1 = vld [vmem:[#allocation3 + $0x40] sm:$0xff] }
 0x6e0   :  { %v522_v33 = vsel %vm519_vm5, %v521_v30, %v517_v31  ;;  %880 = vmatpush.msra.mxu0 %v850_v1  ;;  %v842_v29 = vld [vmem:[#allocation3] sm:$0xff]  ;;  %v843_v30 = vld [vmem:[#allocation3 + $0x8] sm:$0xff]  ;;  %906 = vmatpush.msra.mxu1 %v845_v25 }
 0x6e1   :  { %v525_v37 = vmul.f32 %v524_v32, %v522_v33 }
 0x6e2   :  { %881 = vmatpush.msra.mxu0 %v848_v22  ;;  %907 = vmatpush.msra.mxu1 %v843_v30 }
 0x6e3   :  { %v526_v38 = vadd.f32 %v525_v37, %v3024_v36  ;;  %v810_v37 = vsel %vm809_vm10, %v2922_v56, %v2950_v46 }
 0x6e4   :  { %882 = vmatpush.msra.mxu0 %v846_v27 }
 0x6e5   :  { %2540 = vtanh.f32 %v526_v38  ;;  %v812_v38 = vsel %vm811_vm11, %v810_v37, %v2980_v39 }
 0x6e6   :  { %883 = vmatpush.msra.mxu0 %v844_v21  ;;  %v859_v21 = vperm.slane %v3188_v24, 0 }
 0x6e8   :  { %884 = vmatpush.msra.mxu0 %v842_v29 }
 0x6eb   :  { %v2541_v40 = vpop.eup %2540 }
 0x6ec   :  { %v529_v20 = vrot.slane %v2541_v40, 2 }
 0x6ee   :  { %v531_v34 = vsub.f32 %v3007_v55, %v529_v20 }
 0x6f0   :  { %v533_v2 = vrot.slane %v531_v34, 6 }
 0x6f2   :  { %534 = vrot.lane.b32.xlu1 %v533_v2, %s2714_s23 }
 0x764   :  { %v535_v3 = vpop.permute.xlu1 %534 }
 0x765   :  { %v537_v4 = vmul.f32 %v535_v3, %v522_v33 }
 0x767   :  { %539 = vrot.lane.b32.xlu2 %v537_v4, %s2714_s23 }
 0x7c1   :  { %v540_v6 = vpop.permute.xlu2 %539 }
 0x7c2   :  { %v3030_v7 = vadd.f32 %v2541_v40, %v540_v6  ;;  %v814_v40 = vsel %vm813_vm12, %v812_v38, %v3007_v55 }
 0x7c4   :  { %2434 = vmatmul.msk.f32.vlgmr.msra.gmra.mxu2 %vm115_vm4, %v3030_v7  ;;  %2435 = vmatmul.msk.f32.vlgmr.msra.gmra.mxu3 %vm115_vm4, %v3030_v7 }
 0x7c5   :  { %943 = vmatpush.msra.mxu3 %v3097_v57 }
 0x7c7   :  { %944 = vmatpush.msra.mxu3 %v3099_v48 }
 0x7c9   :  { %945 = vmatpush.msra.mxu3 %v3104_v58 }
 0x7cb   :  { %946 = vmatpush.msra.mxu3 %v3109_v60 }
 0x847   :  { %v563_v23 = vpop.f32.mrf.mxu2  ;;  %v583_v14 = vpop.f32.mrf.mxu3 }
 0x848   :  { %v587_v41 = vrot.slane %v563_v23, 6  ;;  %v609_v26 = vadd.f32 %v2909_v35, %v583_v14 }
 0x84a   :  { %v589_v8 = vadd.f32 %v587_v41, %v3016_v59  ;;  %v611_v45 = vrot.slane %v609_v26, 6 }
 0x84c   :  { %v2436_v9 = vmul.f32 -1.442695, %v589_v8 }
 0x84e   :  { %2542 = vpow2.f32 %v2436_v9 }
 0x854   :  { %v2543_v10 = vpop.eup %2542 }
 0x855   :  { %v593_v11 = vadd.f32 1.0, %v2543_v10 }
 0x857   :  { %2544 = vrcp.f32 %v593_v11  ;;  %v605_v16 = vand.u32 2147483648, %v593_v11  ;;  %v603_v18 = vand.u32 2147483647, %v593_v11  ;;  %vm599_vm7 = vweird.f32 %v593_v11 }
 0x859   :  { %v606_v43 = vor.u32 1.1754944e-38, %v605_v16  ;;  %vm604_vm9 = vcmp.eq.f32.partialorder %v603_v18, 8.507059e+37 }
 0x85d   :  { %v2545_v12 = vpop.eup %2544 }
 0x85e   :  { %v595_v13 = vmul.f32 %v2545_v12, %v593_v11  ;;  %vm600_vm6 = vweird.f32 %v2545_v12 }
 0x85f   :  { %vm601_vm8 = vmor %vm599_vm7, %vm600_vm6 }
 0x860   :  { %v596_v15 = vsub.f32 1.0, %v595_v13 }
 0x862   :  { %v597_v17 = vmul.f32 %v2545_v12, %v596_v15 }
 0x864   :  { %v598_v42 = vadd.f32 %v2545_v12, %v597_v17 }
 0x866   :  { %v602_v44 = vsel %vm601_vm8, %v2545_v12, %v598_v42 }
 0x867   :  { %v607_v47 = vsel %vm604_vm9, %v606_v43, %v602_v44  ;;  %v3064_v43 = vld [vmem:[#allocation5 + $0xf0] sm:$0xff]  ;;  %v3066_v44 = vld [vmem:[#allocation5 + $0xe0] sm:$0xff] }
 0x868   :  { %v613_v49 = vmul.f32 %v611_v45, %v607_v47  ;;  %923 = vmatpush.msra.mxu2 %v3064_v43 }
 0x86a   :  { %v614_v50 = vadd.f32 %v613_v49, %v3024_v36  ;;  %924 = vmatpush.msra.mxu2 %v3066_v44  ;;  %v3073_v49 = vld [vmem:[#allocation5 + $0xd0] sm:$0xff] }
 0x86c   :  { %2546 = vtanh.f32 %v614_v50  ;;  %925 = vmatpush.msra.mxu2 %v3073_v49  ;;  %v3077_v50 = vld [vmem:[#allocation5 + $0xc0] sm:$0xff] }
 0x86e   :  { %926 = vmatpush.msra.mxu2 %v3077_v50 }
 0x872   :  { %v2547_v51 = vpop.eup %2546 }
 0x873   :  { %v617_v52 = vrot.slane %v2547_v51, 2 }
 0x875   :  { %v619_v53 = vsub.f32 %v3030_v7, %v617_v52  ;;  %v3083_v52 = vld [vmem:[#allocation5 + $0xa0] sm:$0xff] }
 0x877   :  { %v621_v54 = vrot.slane %v619_v53, 6  ;;  %v3087_v53 = vld [vmem:[#allocation5 + $0x90] sm:$0xff] }
 0x879   :  { %622 = vrot.lane.b32.xlu0 %v621_v54, %s2714_s23  ;;  %v3091_v54 = vld [vmem:[#allocation5 + $0x80] sm:$0xff] }
 0x8eb   :  { %v623_v61 = vpop.permute.xlu0 %622 }
 0x8ec   :  { %v625_v62 = vmul.f32 %v623_v61, %v607_v47  ;;  %v3114_v61 = vld [vmem:[#allocation5 + $0xb8] sm:$0xff] }
 0x8ed   :  { %947 = vmatpush.msra.mxu3 %v3114_v61 }
 0x8ee   :  { %627 = vrot.lane.b32.xlu1 %v625_v62, %s2714_s23  ;;  %v3119_v62 = vld [vmem:[#allocation5 + $0xa8] sm:$0xff] }
 0x8ef   :  { %948 = vmatpush.msra.mxu3 %v3119_v62 }
 0x8f1   :  { %949 = vmatpush.msra.mxu3 %v3124_v63 }
 0x8f3   :  { %950 = vmatpush.msra.mxu3 %v3129_v0 }
 0x960   :  { %v628_v31 = vpop.permute.xlu1 %627 }
 0x961   :  { %v3042_v32 = vadd.f32 %v2547_v51, %v628_v31  ;;  %v3081_v51 = vld [vmem:[#allocation5 + $0xb0] sm:$0xff] }
 0x962   :  { %927 = vmatpush.msra.mxu2 %v3081_v51 }
 0x963   :  { %v632_v33 = vrot.slane %v3042_v32, 2 }
 0x964   :  { %928 = vmatpush.msra.mxu2 %v3083_v52 }
 0x965   :  { %2437 = vmatmul.msk.f32.vlgmr.msrb.gmra.mxu0 %vm115_vm4, %v632_v33  ;;  %2438 = vmatmul.msk.f32.vlgmr.msrb.gmra.mxu1 %vm115_vm4, %v632_v33 }
 0x966   :  { %1001 = vmatpush.msrb.mxu0 %v3064_v43  ;;  %929 = vmatpush.msra.mxu2 %v3087_v53 }
 0x967   :  { %1021 = vmatpush.msrb.mxu1 %v3097_v57 }
 0x968   :  { %1002 = vmatpush.msrb.mxu0 %v3066_v44  ;;  %930 = vmatpush.msra.mxu2 %v3091_v54 }
 0x969   :  { %1022 = vmatpush.msrb.mxu1 %v3099_v48 }
 0x96a   :  { %1003 = vmatpush.msrb.mxu0 %v3073_v49 }
 0x96b   :  { %1023 = vmatpush.msrb.mxu1 %v3104_v58 }
 0x96c   :  { %1004 = vmatpush.msrb.mxu0 %v3077_v50 }
 0x96d   :  { %2445 = vmatmul.msk.f32.vlgmr.msra.gmra.mxu0 %vm115_vm4, %v814_v40  ;;  %2447 = vmatmul.msk.f32.vlgmr.msra.gmra.mxu1 %vm115_vm4, %v814_v40 }
 0x96e   :  { %1005 = vmatpush.msrb.mxu0 %v3081_v51  ;;  %1024 = vmatpush.msrb.mxu1 %v3109_v60 }
 0x970   :  { %1006 = vmatpush.msrb.mxu0 %v3083_v52  ;;  %1025 = vmatpush.msrb.mxu1 %v3114_v61 }
 0x972   :  { %1007 = vmatpush.msrb.mxu0 %v3087_v53  ;;  %1026 = vmatpush.msrb.mxu1 %v3119_v62 }
 0x974   :  { %1008 = vmatpush.msrb.mxu0 %v3091_v54  ;;  %1027 = vmatpush.msrb.mxu1 %v3124_v63 }
 0x976   :  { %1179 = vmatpush.msra.mxu0 %v3064_v43  ;;  %1028 = vmatpush.msrb.mxu1 %v3129_v0 }
 0x978   :  { %1180 = vmatpush.msra.mxu0 %v3066_v44  ;;  %1199 = vmatpush.msra.mxu1 %v3097_v57 }
 0x97a   :  { %1181 = vmatpush.msra.mxu0 %v3073_v49  ;;  %1200 = vmatpush.msra.mxu1 %v3099_v48 }
 0x97c   :  { %1182 = vmatpush.msra.mxu0 %v3077_v50  ;;  %1201 = vmatpush.msra.mxu1 %v3104_v58 }
 0x97e   :  { %1183 = vmatpush.msra.mxu0 %v3081_v51  ;;  %1202 = vmatpush.msra.mxu1 %v3109_v60 }
 0x980   :  { %1184 = vmatpush.msra.mxu0 %v3083_v52  ;;  %1203 = vmatpush.msra.mxu1 %v3114_v61 }
 0x982   :  { %1185 = vmatpush.msra.mxu0 %v3087_v53  ;;  %1204 = vmatpush.msra.mxu1 %v3119_v62 }
 0x984   :  { %1186 = vmatpush.msra.mxu0 %v3091_v54  ;;  %1205 = vmatpush.msra.mxu1 %v3124_v63 }
 0x986   :  { %1206 = vmatpush.msra.mxu1 %v3129_v0 }
 0x9e2   :  { %v652_v20 = vpop.f32.mrf.mxu0  ;;  %v672_v23 = vpop.f32.mrf.mxu1 }
 0x9e3   :  { %v676_v34 = vrot.slane %v652_v20, 4  ;;  %v698_v9 = vadd.f32 %v2909_v35, %v672_v23 }
 0x9e5   :  { %v678_v2 = vadd.f32 %v676_v34, %v3016_v59  ;;  %v700_v13 = vrot.slane %v698_v9, 4 }
 0x9e7   :  { %v2439_v3 = vmul.f32 -1.442695, %v678_v2 }
 0x9e9   :  { %2548 = vpow2.f32 %v2439_v3 }
 0x9ea   :  { %v886_v29 = vpop.f32.mrf.mxu0 }
 0x9eb   :  { %v3194_v31 = vadd.f32 %v886_v29, %v859_v21 }
 0x9ef   :  { %v2549_v4 = vpop.eup %2548 }
 0x9f0   :  { %v682_v6 = vadd.f32 1.0, %v2549_v4 }
 0x9f2   :  { %2550 = vrcp.f32 %v682_v6  ;;  %v694_v41 = vand.u32 2147483648, %v682_v6  ;;  %v692_v55 = vand.u32 2147483647, %v682_v6  ;;  %vm688_vm14 = vweird.f32 %v682_v6 }
 0x9f4   :  { %v695_v11 = vor.u32 1.1754944e-38, %v694_v41  ;;  %vm693_vm0 = vcmp.eq.f32.partialorder %v692_v55, 8.507059e+37 }
 0x9f8   :  { %v2551_v56 = vpop.eup %2550 }
 0x9f9   :  { %v684_v46 = vmul.f32 %v2551_v56, %v682_v6  ;;  %vm689_vm13 = vweird.f32 %v2551_v56 }
 0x9fa   :  { %vm690_vm15 = vmor %vm688_vm14, %vm689_vm13 }
 0x9fb   :  { %v685_v39 = vsub.f32 1.0, %v684_v46 }
 0x9fd   :  { %v686_v8 = vmul.f32 %v2551_v56, %v685_v39 }
 0x9ff   :  { %v687_v10 = vadd.f32 %v2551_v56, %v686_v8 }
 0xa01   :  { %v691_v12 = vsel %vm690_vm15, %v2551_v56, %v687_v10 }
 0xa02   :  { %v696_v14 = vsel %vm693_vm0, %v695_v11, %v691_v12  ;;  %v3201_v12 = vld [vmem:[%s3647_s5 + $0x1] ss:$0 sm:$0xff] }
 0xa03   :  { %v702_v15 = vmul.f32 %v700_v13, %v696_v14 }
 0xa05   :  { %v703_v16 = vadd.f32 %v702_v15, %v3024_v36 }
 0xa07   :  { %2552 = vtanh.f32 %v703_v16 }
 0xa0d   :  { %v3059_v17 = vpop.eup %2552 }
 0xa0e   :  { %v706_v18 = vrot.slane %v3059_v17, 2 }
 0xa10   :  { %v708_v26 = vsub.f32 %v3042_v32, %v706_v18 }
 0xa12   :  { %v710_v42 = vrot.slane %v708_v26, 6  ;;  %v860_v26 = vperm.slane %v3188_v24, 1 }
 0xa14   :  { %711 = vrot.lane.b32.xlu2 %v710_v42, %s2714_s23 }
 0xa6e   :  { %v712_v45 = vpop.permute.xlu2 %711 }
 0xa6f   :  { %v714_v47 = vmul.f32 %v712_v45, %v696_v14 }
 0xa71   :  { %716 = vrot.lane.b32.xlu0 %v714_v47, %s2714_s23 }
 0xae3   :  { %v717_v1 = vpop.permute.xlu0 %716 }
 0xae4   :  { %v3140_v5 = vadd.f32 %v3059_v17, %v717_v1  ;;  %v909_v1 = vpop.f32.mrf.mxu1 }
 0xae6   :  { %v721_v22 = vrot.slane %v3140_v5, 4 }
 0xae8   :  { %2440 = vmatmul.msk.f32.vlgmr.msrb.gmra.mxu2 %vm115_vm4, %v721_v22  ;;  %2441 = vmatmul.msk.f32.vlgmr.msrb.gmra.mxu3 %vm115_vm4, %v721_v22 }
 0xae9   :  { %1090 = vmatpush.msrb.mxu2 %v3064_v43  ;;  %1110 = vmatpush.msrb.mxu3 %v3097_v57 }
 0xaeb   :  { %1091 = vmatpush.msrb.mxu2 %v3066_v44  ;;  %1111 = vmatpush.msrb.mxu3 %v3099_v48 }
 0xaed   :  { %1092 = vmatpush.msrb.mxu2 %v3073_v49  ;;  %1112 = vmatpush.msrb.mxu3 %v3104_v58 }
 0xaef   :  { %1093 = vmatpush.msrb.mxu2 %v3077_v50  ;;  %1113 = vmatpush.msrb.mxu3 %v3109_v60 }
 0xaf0   :  { %931 = vmatmul.f32.vlgmr.msra.gmra.mxu2 %v2713_v19  ;;  %951 = vmatmul.f32.vlgmr.msra.gmra.mxu3 %v2713_v19 }
 0xaf1   :  { %1094 = vmatpush.msrb.mxu2 %v3081_v51  ;;  %1114 = vmatpush.msrb.mxu3 %v3114_v61 }
 0xaf3   :  { %1095 = vmatpush.msrb.mxu2 %v3083_v52  ;;  %1115 = vmatpush.msrb.mxu3 %v3119_v62 }
 0xaf5   :  { %1096 = vmatpush.msrb.mxu2 %v3087_v53  ;;  %1116 = vmatpush.msrb.mxu3 %v3124_v63 }
 0xaf7   :  { %1097 = vmatpush.msrb.mxu2 %v3091_v54  ;;  %1117 = vmatpush.msrb.mxu3 %v3129_v0 }
 0xaf9   :  { %1268 = vmatpush.msra.mxu2 %v3064_v43  ;;  %1288 = vmatpush.msra.mxu3 %v3097_v57 }
 0xafb   :  { %1269 = vmatpush.msra.mxu2 %v3066_v44  ;;  %1289 = vmatpush.msra.mxu3 %v3099_v48 }
 0xafd   :  { %1270 = vmatpush.msra.mxu2 %v3073_v49  ;;  %1290 = vmatpush.msra.mxu3 %v3104_v58 }
 0xaff   :  { %1271 = vmatpush.msra.mxu2 %v3077_v50  ;;  %1291 = vmatpush.msra.mxu3 %v3109_v60 }
 0xb01   :  { %1272 = vmatpush.msra.mxu2 %v3081_v51  ;;  %1292 = vmatpush.msra.mxu3 %v3114_v61 }
 0xb03   :  { %1273 = vmatpush.msra.mxu2 %v3083_v52  ;;  %1293 = vmatpush.msra.mxu3 %v3119_v62 }
 0xb05   :  { %1274 = vmatpush.msra.mxu2 %v3087_v53  ;;  %1294 = vmatpush.msra.mxu3 %v3124_v63 }
 0xb07   :  { %1275 = vmatpush.msra.mxu2 %v3091_v54  ;;  %1295 = vmatpush.msra.mxu3 %v3129_v0 }
 0xb6b   :  { %v741_v27 = vpop.f32.mrf.mxu2  ;;  %v761_v4 = vpop.f32.mrf.mxu3 }
 0xb6c   :  { %v765_v28 = vrot.slane %v741_v27, 2  ;;  %v787_v39 = vadd.f32 %v2909_v35, %v761_v4 }
 0xb6e   :  { %v767_v25 = vadd.f32 %v765_v28, %v3016_v59  ;;  %v789_v11 = vrot.slane %v787_v39, 2 }
 0xb70   :  { %v2442_v30 = vmul.f32 -1.442695, %v767_v25  ;;  %v3208_v25 = vadd.f32 %v909_v1, %v860_v26 }
 0xb72   :  { %2554 = vpow2.f32 %v2442_v30 }
 0xb73   :  { %v932_v33 = vpop.f32.mrf.mxu2  ;;  %v952_v15 = vpop.f32.mrf.mxu3 }
 0xb74   :  { %v955_v37 = vadd.f32 %v932_v33, %v3194_v31  ;;  %v975_v47 = vadd.f32 %v3201_v12, %v952_v15 }
 0xb76   :  { %v2449_v38 = vmul.f32 -1.442695, %v955_v37 }
 0xb78   :  { %v2555_v40 = vpop.eup %2554  ;;  %2556 = vpow2.f32 %v2449_v38 }
 0xb79   :  { %v771_v20 = vadd.f32 1.0, %v2555_v40 }
 0xb7b   :  { %2558 = vrcp.f32 %v771_v20  ;;  %v783_v56 = vand.u32 2147483648, %v771_v20  ;;  %v781_v23 = vand.u32 2147483647, %v771_v20  ;;  %vm777_vm2 = vweird.f32 %v771_v20 }
 0xb7d   :  { %v784_v9 = vor.u32 1.1754944e-38, %v783_v56  ;;  %vm782_vm5 = vcmp.eq.f32.partialorder %v781_v23, 8.507059e+37 }
 0xb7e   :  { %v2557_v34 = vpop.eup %2556 }
 0xb7f   :  { %v959_v2 = vadd.f32 1.0, %v2557_v34 }
 0xb81   :  { %v2559_v3 = vpop.eup %2558  ;;  %2560 = vrcp.f32 %v959_v2  ;;  %v971_v16 = vand.u32 2147483648, %v959_v2  ;;  %v969_v18 = vand.u32 2147483647, %v959_v2  ;;  %vm965_vm7 = vweird.f32 %v959_v2 }
 0xb82   :  { %v773_v59 = vmul.f32 %v2559_v3, %v771_v20  ;;  %vm778_vm1 = vweird.f32 %v2559_v3 }
 0xb83   :  { %vm779_vm3 = vmor %vm777_vm2, %vm778_vm1  ;;  %v972_v22 = vor.u32 1.1754944e-38, %v971_v16  ;;  %vm970_vm9 = vcmp.eq.f32.partialorder %v969_v18, 8.507059e+37 }
 0xb84   :  { %v774_v6 = vsub.f32 1.0, %v773_v59 }
 0xb86   :  { %v775_v46 = vmul.f32 %v2559_v3, %v774_v6  ;;  %v815_v6 = vsel %vm809_vm10, %v3030_v7, %v3042_v32 }
 0xb87   :  { %v2561_v41 = vpop.eup %2560 }
 0xb88   :  { %v776_v8 = vadd.f32 %v2559_v3, %v775_v46  ;;  %v961_v55 = vmul.f32 %v2561_v41, %v959_v2  ;;  %vm966_vm6 = vweird.f32 %v2561_v41  ;;  %v816_v46 = vsel %vm811_vm11, %v815_v6, %v3140_v5 }
 0xb89   :  { %vm967_vm8 = vmor %vm965_vm7, %vm966_vm6 }
 0xb8a   :  { %v780_v10 = vsel %vm779_vm3, %v2559_v3, %v776_v8  ;;  %v962_v13 = vsub.f32 1.0, %v961_v55 }
 0xb8b   :  { %v785_v14 = vsel %vm782_vm5, %v784_v9, %v780_v10 }
 0xb8c   :  { %v791_v17 = vmul.f32 %v789_v11, %v785_v14  ;;  %v963_v35 = vmul.f32 %v2561_v41, %v962_v13 }
 0xb8e   :  { %v792_v42 = vadd.f32 %v791_v17, %v3024_v36  ;;  %v964_v45 = vadd.f32 %v2561_v41, %v963_v35 }
 0xb90   :  { %2562 = vtanh.f32 %v792_v42  ;;  %v968_v27 = vsel %vm967_vm8, %v2561_v41, %v964_v45 }
 0xb91   :  { %v973_v28 = vsel %vm970_vm9, %v972_v22, %v968_v27 }
 0xb92   :  { %v976_v29 = vmul.f32 %v975_v47, %v973_v28 }
 0xb94   :  { %v977_v30 = vadd.f32 %v976_v29, %v3208_v25 }
 0xb96   :  { %v2563_v33 = vpop.eup %2562  ;;  %2564 = vtanh.f32 %v977_v30 }
 0xb97   :  { %v795_v36 = vrot.slane %v2563_v33, 2 }
 0xb99   :  { %v797_v37 = vsub.f32 %v3140_v5, %v795_v36 }
 0xb9b   :  { %v799_v38 = vrot.slane %v797_v37, 6 }
 0xb9c   :  { %v2565_v40 = vpop.eup %2564 }
 0xb9d   :  { %800 = vrot.lane.b32.xlu1 %v799_v38, %s2714_s23  ;;  %v979_v20 = vsub.f32 0.0, %v2565_v40 }
 0xb9f   :  { %981 = vrot.lane.b32.xlu2 %v979_v20, %s2714_s23 }
 0xbf9   :  { %v982_v34 = vpop.permute.xlu2 %981 }
 0xbfa   :  { %v984_v2 = vmul.f32 %v982_v34, %v973_v28 }
 0xbfc   :  { %986 = vrot.lane.b32.xlu1 %v984_v2, %s2714_s23 }
 0xc0f   :  { %v801_v3 = vpop.permute.xlu1 %800 }
 0xc10   :  { %v803_v59 = vmul.f32 %v801_v3, %v785_v14 }
 0xc12   :  { %805 = vrot.lane.b32.xlu0 %v803_v59, %s2714_s23 }
 0xc6e   :  { %v987_v39 = vpop.permute.xlu1 %986 }
 0xc6f   :  { %v3224_v41 = vadd.f32 %v2565_v40, %v987_v39 }
 0xc84   :  { %v806_v4 = vpop.permute.xlu0 %805 }
 0xc85   :  { %v808_v56 = vadd.f32 %v2563_v33, %v806_v4 }
 0xc87   :  { %v817_v23 = vsel %vm813_vm12, %v816_v46, %v808_v56 }
 0xc88   :  { %2446 = vmatmul.msk.f32.gmra.mxu0 %vm115_vm4, %v817_v23  ;;  %2448 = vmatmul.msk.f32.gmra.mxu1 %vm115_vm4, %v817_v23 }
 0xc90   :  { %2450 = vmatmul.msk.f32.vlgmr.msrb.gmra.mxu0 %vm115_vm4, %v3224_v41  ;;  %2451 = vmatmul.msk.f32.vlgmr.msrb.gmra.mxu1 %vm115_vm4, %v3224_v41 }
 0xc91   :  { %1350 = vmatpush.msrb.mxu0 %v3064_v43  ;;  %1370 = vmatpush.msrb.mxu1 %v3097_v57 }
 0xc93   :  { %1351 = vmatpush.msrb.mxu0 %v3066_v44  ;;  %1371 = vmatpush.msrb.mxu1 %v3099_v48 }
 0xc95   :  { %1352 = vmatpush.msrb.mxu0 %v3073_v49  ;;  %1372 = vmatpush.msrb.mxu1 %v3104_v58 }
 0xc97   :  { %1353 = vmatpush.msrb.mxu0 %v3077_v50  ;;  %1373 = vmatpush.msrb.mxu1 %v3109_v60 }
 0xc99   :  { %1354 = vmatpush.msrb.mxu0 %v3081_v51  ;;  %1374 = vmatpush.msrb.mxu1 %v3114_v61 }
 0xc9b   :  { %1355 = vmatpush.msrb.mxu0 %v3083_v52  ;;  %1375 = vmatpush.msrb.mxu1 %v3119_v62 }
 0xc9d   :  { %1356 = vmatpush.msrb.mxu0 %v3087_v53  ;;  %1376 = vmatpush.msrb.mxu1 %v3124_v63 }
 0xc9f   :  { %1357 = vmatpush.msrb.mxu0 %v3091_v54  ;;  %1377 = vmatpush.msrb.mxu1 %v3129_v0 }
 0xd05   :  { %v3246_v7 = vpop.f32.mrf.mxu0  ;;  %v3249_v10 = vpop.f32.mrf.mxu1 }
 0xd0d   :  { %v1010_v32 = vpop.f32.mrf.mxu0  ;;  %v1030_v15 = vpop.f32.mrf.mxu1 }
 0xd0e   :  { %v1034_v5 = vrot.slane %v1010_v32, 6  ;;  %v1056_v42 = vadd.f32 %v3201_v12, %v1030_v15 }
 0xd10   :  { %v1036_v8 = vadd.f32 %v1034_v5, %v3194_v31  ;;  %v1058_v22 = vrot.slane %v1056_v42, 6 }
 0xd12   :  { %v2452_v55 = vmul.f32 -1.442695, %v1036_v8 }
 0xd14   :  { %2566 = vpow2.f32 %v2452_v55 }
 0xd1a   :  { %v2567_v9 = vpop.eup %2566 }
 0xd1b   :  { %v1040_v11 = vadd.f32 1.0, %v2567_v9 }
 0xd1d   :  { %2568 = vrcp.f32 %v1040_v11  ;;  %v1052_v17 = vand.u32 2147483648, %v1040_v11  ;;  %v1050_v18 = vand.u32 2147483647, %v1040_v11  ;;  %vm1046_vm14 = vweird.f32 %v1040_v11 }
 0xd1f   :  { %v1053_v47 = vor.u32 1.1754944e-38, %v1052_v17  ;;  %vm1051_vm0 = vcmp.eq.f32.partialorder %v1050_v18, 8.507059e+37 }
 0xd23   :  { %v2569_v13 = vpop.eup %2568 }
 0xd24   :  { %v1042_v14 = vmul.f32 %v2569_v13, %v1040_v11  ;;  %vm1047_vm13 = vweird.f32 %v2569_v13 }
 0xd25   :  { %vm1048_vm15 = vmor %vm1046_vm14, %vm1047_vm13 }
 0xd26   :  { %v1043_v16 = vsub.f32 1.0, %v1042_v14 }
 0xd28   :  { %v1044_v35 = vmul.f32 %v2569_v13, %v1043_v16 }
 0xd2a   :  { %v1045_v45 = vadd.f32 %v2569_v13, %v1044_v35 }
 0xd2c   :  { %v1049_v1 = vsel %vm1048_vm15, %v2569_v13, %v1045_v45 }
 0xd2d   :  { %v1054_v27 = vsel %vm1051_vm0, %v1053_v47, %v1049_v1 }
 0xd2e   :  { %v1060_v28 = vmul.f32 %v1058_v22, %v1054_v27 }
 0xd30   :  { %v1061_v29 = vadd.f32 %v1060_v28, %v3208_v25 }
 0xd32   :  { %2570 = vtanh.f32 %v1061_v29 }
 0xd38   :  { %v2571_v30 = vpop.eup %2570 }
 0xd39   :  { %v1064_v33 = vrot.slane %v2571_v30, 2 }
 0xd3b   :  { %v1066_v36 = vsub.f32 %v3224_v41, %v1064_v33 }
 0xd3d   :  { %v1068_v37 = vrot.slane %v1066_v36, 6 }
 0xd3f   :  { %1069 = vrot.lane.b32.xlu2 %v1068_v37, %s2714_s23 }
 0xd99   :  { %v1070_v38 = vpop.permute.xlu2 %1069 }
 0xd9a   :  { %v1072_v40 = vmul.f32 %v1070_v38, %v1054_v27 }
 0xd9c   :  { %1074 = vrot.lane.b32.xlu0 %v1072_v40, %s2714_s23 }
 0xe0e   :  { %v1075_v20 = vpop.permute.xlu0 %1074 }
 0xe0f   :  { %v3256_v34 = vadd.f32 %v2571_v30, %v1075_v20 }
 0xe11   :  { %v1079_v2 = vrot.slane %v3256_v34, 2 }
 0xe13   :  { %2453 = vmatmul.msk.f32.vlgmr.msrb.gmra.mxu2 %vm115_vm4, %v1079_v2  ;;  %2454 = vmatmul.msk.f32.vlgmr.msrb.gmra.mxu3 %vm115_vm4, %v1079_v2 }
 0xe14   :  { %1439 = vmatpush.msrb.mxu2 %v3064_v43  ;;  %1459 = vmatpush.msrb.mxu3 %v3097_v57 }
 0xe16   :  { %1440 = vmatpush.msrb.mxu2 %v3066_v44  ;;  %1460 = vmatpush.msrb.mxu3 %v3099_v48 }
 0xe18   :  { %1441 = vmatpush.msrb.mxu2 %v3073_v49  ;;  %1461 = vmatpush.msrb.mxu3 %v3104_v58 }
 0xe1a   :  { %1442 = vmatpush.msrb.mxu2 %v3077_v50  ;;  %1462 = vmatpush.msrb.mxu3 %v3109_v60 }
 0xe1c   :  { %1443 = vmatpush.msrb.mxu2 %v3081_v51  ;;  %1463 = vmatpush.msrb.mxu3 %v3114_v61 }
 0xe1e   :  { %1444 = vmatpush.msrb.mxu2 %v3083_v52  ;;  %1464 = vmatpush.msrb.mxu3 %v3119_v62 }
 0xe20   :  { %1445 = vmatpush.msrb.mxu2 %v3087_v53  ;;  %1465 = vmatpush.msrb.mxu3 %v3124_v63 }
 0xe22   :  { %1446 = vmatpush.msrb.mxu2 %v3091_v54  ;;  %1466 = vmatpush.msrb.mxu3 %v3129_v0 }
 0xe96   :  { %v1099_v3 = vpop.f32.mrf.mxu2  ;;  %v1119_v32 = vpop.f32.mrf.mxu3 }
 0xe97   :  { %v1123_v59 = vrot.slane %v1099_v3, 4  ;;  %v1145_v11 = vadd.f32 %v3201_v12, %v1119_v32 }
 0xe99   :  { %v1125_v4 = vadd.f32 %v1123_v59, %v3194_v31  ;;  %v1147_v16 = vrot.slane %v1145_v11, 4 }
 0xe9b   :  { %v2455_v6 = vmul.f32 -1.442695, %v1125_v4 }
 0xe9d   :  { %2572 = vpow2.f32 %v2455_v6 }
 0xea3   :  { %v2573_v56 = vpop.eup %2572 }
 0xea4   :  { %v1129_v46 = vadd.f32 1.0, %v2573_v56 }
 0xea6   :  { %2574 = vrcp.f32 %v1129_v46  ;;  %v1141_v8 = vand.u32 2147483648, %v1129_v46  ;;  %v1139_v9 = vand.u32 2147483647, %v1129_v46  ;;  %vm1135_vm2 = vweird.f32 %v1129_v46 }
 0xea8   :  { %v1142_v14 = vor.u32 1.1754944e-38, %v1141_v8  ;;  %vm1140_vm5 = vcmp.eq.f32.partialorder %v1139_v9, 8.507059e+37 }
 0xeac   :  { %v2575_v23 = vpop.eup %2574 }
 0xead   :  { %v1131_v39 = vmul.f32 %v2575_v23, %v1129_v46  ;;  %vm1136_vm1 = vweird.f32 %v2575_v23 }
 0xeae   :  { %vm1137_vm3 = vmor %vm1135_vm2, %vm1136_vm1 }
 0xeaf   :  { %v1132_v5 = vsub.f32 1.0, %v1131_v39 }
 0xeb1   :  { %v1133_v55 = vmul.f32 %v2575_v23, %v1132_v5 }
 0xeb3   :  { %v1134_v13 = vadd.f32 %v2575_v23, %v1133_v55 }
 0xeb5   :  { %v1138_v15 = vsel %vm1137_vm3, %v2575_v23, %v1134_v13 }
 0xeb6   :  { %v1143_v17 = vsel %vm1140_vm5, %v1142_v14, %v1138_v15 }
 0xeb7   :  { %v1149_v35 = vmul.f32 %v1147_v16, %v1143_v17 }
 0xeb9   :  { %v1150_v18 = vadd.f32 %v1149_v35, %v3208_v25 }
 0xebb   :  { %2576 = vtanh.f32 %v1150_v18 }
 0xec1   :  { %v2577_v42 = vpop.eup %2576 }
 0xec2   :  { %v1153_v45 = vrot.slane %v2577_v42, 2 }
 0xec4   :  { %v1155_v47 = vsub.f32 %v3256_v34, %v1153_v45 }
 0xec6   :  { %v1157_v1 = vrot.slane %v1155_v47, 6 }
 0xec8   :  { %1158 = vrot.lane.b32.xlu1 %v1157_v1, %s2714_s23 }
 0xf3a   :  { %v1159_v22 = vpop.permute.xlu1 %1158 }
 0xf3b   :  { %v1161_v27 = vmul.f32 %v1159_v22, %v1143_v17 }
 0xf3d   :  { %1163 = vrot.lane.b32.xlu2 %v1161_v27, %s2714_s23 }
 0xf97   :  { %v1164_v28 = vpop.permute.xlu2 %1163 }
 0xf98   :  { %v3283_v29 = vadd.f32 %v2577_v42, %v1164_v28  ;;  %v3325_v42 = vadd.f32 %v3249_v10, %v860_v26 }
 0xf9a   :  { %v1168_v30 = vrot.slane %v3283_v29, 4 }
 0xf9c   :  { %2456 = vmatmul.msk.f32.vlgmr.msra.gmra.mxu0 %vm115_vm4, %v1168_v30  ;;  %2457 = vmatmul.msk.f32.vlgmr.msra.gmra.mxu1 %vm115_vm4, %v1168_v30 }
 0xf9d   :  { %1528 = vmatpush.msra.mxu0 %v3064_v43  ;;  %1548 = vmatpush.msra.mxu1 %v3097_v57 }
 0xf9f   :  { %1529 = vmatpush.msra.mxu0 %v3066_v44  ;;  %1549 = vmatpush.msra.mxu1 %v3099_v48 }
 0xfa1   :  { %1530 = vmatpush.msra.mxu0 %v3073_v49  ;;  %1550 = vmatpush.msra.mxu1 %v3104_v58 }
 0xfa3   :  { %1531 = vmatpush.msra.mxu0 %v3077_v50  ;;  %1551 = vmatpush.msra.mxu1 %v3109_v60 }
 0xfa5   :  { %1532 = vmatpush.msra.mxu0 %v3081_v51  ;;  %1552 = vmatpush.msra.mxu1 %v3114_v61 }
 0xfa7   :  { %1533 = vmatpush.msra.mxu0 %v3083_v52  ;;  %1553 = vmatpush.msra.mxu1 %v3119_v62 }
 0xfa9   :  { %1534 = vmatpush.msra.mxu0 %v3087_v53  ;;  %1554 = vmatpush.msra.mxu1 %v3124_v63 }
 0xfab   :  { %1535 = vmatpush.msra.mxu0 %v3091_v54  ;;  %1555 = vmatpush.msra.mxu1 %v3129_v0 }
0x1019   :  { %v1188_v43 = vpop.f32.mrf.mxu0  ;;  %v1208_v58 = vpop.f32.mrf.mxu1 }
0x101a   :  { %v1212_v44 = vrot.slane %v1188_v43, 2  ;;  %v1234_v54 = vadd.f32 %v3201_v12, %v1208_v58 }
0x101c   :  { %v1214_v49 = vadd.f32 %v1212_v44, %v3194_v31  ;;  %v1236_v33 = vrot.slane %v1234_v54, 2 }
0x101e   :  { %v2458_v50 = vmul.f32 -1.442695, %v1214_v49 }
0x1020   :  { %2578 = vpow2.f32 %v2458_v50 }
0x1026   :  { %v2579_v51 = vpop.eup %2578 }
0x1027   :  { %v1218_v57 = vadd.f32 1.0, %v2579_v51 }
0x1029   :  { %2580 = vrcp.f32 %v1218_v57  ;;  %v1230_v53 = vand.u32 2147483648, %v1218_v57  ;;  %v1228_v62 = vand.u32 2147483647, %v1218_v57  ;;  %vm1224_vm7 = vweird.f32 %v1218_v57 }
0x102b   :  { %v1231_v0 = vor.u32 1.1754944e-38, %v1230_v53  ;;  %vm1229_vm9 = vcmp.eq.f32.partialorder %v1228_v62, 8.507059e+37 }
0x102f   :  { %v2581_v52 = vpop.eup %2580 }
0x1030   :  { %v1220_v48 = vmul.f32 %v2581_v52, %v1218_v57  ;;  %vm1225_vm6 = vweird.f32 %v2581_v52 }
0x1031   :  { %vm1226_vm8 = vmor %vm1224_vm7, %vm1225_vm6 }
0x1032   :  { %v1221_v60 = vsub.f32 1.0, %v1220_v48 }
0x1034   :  { %v1222_v61 = vmul.f32 %v2581_v52, %v1221_v60 }
0x1036   :  { %v1223_v63 = vadd.f32 %v2581_v52, %v1222_v61 }
0x1038   :  { %v1227_v31 = vsel %vm1226_vm8, %v2581_v52, %v1223_v63 }
0x1039   :  { %v1232_v36 = vsel %vm1229_vm9, %v1231_v0, %v1227_v31 }
0x103a   :  { %v1238_v37 = vmul.f32 %v1236_v33, %v1232_v36 }
0x103c   :  { %v1239_v38 = vadd.f32 %v1238_v37, %v3208_v25  ;;  %v3318_v25 = vadd.f32 %v3246_v7, %v859_v21 }
0x103e   :  { %2582 = vtanh.f32 %v1239_v38 }
0x1044   :  { %v2583_v40 = vpop.eup %2582 }
0x1045   :  { %v1242_v20 = vrot.slane %v2583_v40, 2 }
0x1047   :  { %v1244_v2 = vsub.f32 %v3283_v29, %v1242_v20 }
0x1049   :  { %v1246_v3 = vrot.slane %v1244_v2, 6 }
0x104b   :  { %1247 = vrot.lane.b32.xlu0 %v1246_v3, %s2714_s23 }
0x10bd   :  { %v1248_v59 = vpop.permute.xlu0 %1247 }
0x10be   :  { %v1250_v4 = vmul.f32 %v1248_v59, %v1232_v36  ;;  %v1650_v59 = vld [vmem:[#allocation3 + $0xf0] sm:$0xff] }
0x10c0   :  { %1252 = vrot.lane.b32.xlu1 %v1250_v4, %s2714_s23  ;;  %v1651_v4 = vld [vmem:[#allocation3 + $0xf8] sm:$0xff] }
0x1132   :  { %v1253_v6 = vpop.permute.xlu1 %1252 }
0x1133   :  { %v3310_v56 = vadd.f32 %v2583_v40, %v1253_v6  ;;  %v1648_v6 = vld [vmem:[#allocation3 + $0xe0] sm:$0xff] }
0x1135   :  { %v1257_v46 = vrot.slane %v3310_v56, 6 }
0x1137   :  { %2459 = vmatmul.msk.f32.vlgmr.msra.gmra.mxu2 %vm115_vm4, %v1257_v46  ;;  %2460 = vmatmul.msk.f32.vlgmr.msra.gmra.mxu3 %vm115_vm4, %v1257_v46  ;;  %v1649_v46 = vld [vmem:[#allocation3 + $0xe8] sm:$0xff] }
0x1138   :  { %1671 = vmatpush.msra.mxu2 %v1650_v59  ;;  %1694 = vmatpush.msra.mxu3 %v1651_v4  ;;  %v3398_v59 = vld [vmem:[#allocation5 + $0x178] sm:$0xff]  ;;  %v3400_v4 = vld [vmem:[#allocation5 + $0x168] sm:$0xff] }
0x113a   :  { %1672 = vmatpush.msra.mxu2 %v1648_v6  ;;  %1695 = vmatpush.msra.mxu3 %v1649_v46  ;;  %v3405_v6 = vld [vmem:[#allocation5 + $0x158] sm:$0xff]  ;;  %v3410_v46 = vld [vmem:[#allocation5 + $0x148] sm:$0xff] }
0x11ba   :  { %v1277_v23 = vpop.f32.mrf.mxu2  ;;  %v1297_v16 = vpop.f32.mrf.mxu3 }
0x11bb   :  { %v1300_v39 = vadd.f32 %v1277_v23, %v3318_v25  ;;  %v1320_v35 = vadd.f32 %v3201_v12, %v1297_v16  ;;  %v1639_v16 = vld [vmem:[#allocation3 + $0x98] sm:$0xff] }
0x11bd   :  { %v2461_v32 = vmul.f32 -1.442695, %v1300_v39 }
0x11bf   :  { %2584 = vpow2.f32 %v2461_v32  ;;  %v1646_v32 = vld [vmem:[#allocation3 + $0xd0] sm:$0xff] }
0x11c0   :  { %1673 = vmatpush.msra.mxu2 %v1646_v32  ;;  %v3425_v32 = vld [vmem:[#allocation5 + $0x118] sm:$0xff] }
0x11c5   :  { %v2585_v5 = vpop.eup %2584 }
0x11c6   :  { %v1304_v8 = vadd.f32 1.0, %v2585_v5  ;;  %v1647_v5 = vld [vmem:[#allocation3 + $0xd8] sm:$0xff] }
0x11c7   :  { %1696 = vmatpush.msra.mxu3 %v1647_v5  ;;  %v3430_v5 = vld [vmem:[#allocation5 + $0x108] sm:$0xff] }
0x11c8   :  { %2586 = vrcp.f32 %v1304_v8  ;;  %v1316_v13 = vand.u32 2147483648, %v1304_v8  ;;  %v1314_v15 = vand.u32 2147483647, %v1304_v8  ;;  %vm1310_vm14 = vweird.f32 %v1304_v8 }
0x11ca   :  { %v1317_v21 = vor.u32 1.1754944e-38, %v1316_v13  ;;  %vm1315_vm0 = vcmp.eq.f32.partialorder %v1314_v15, 8.507059e+37  ;;  %v1640_v13 = vld [vmem:[#allocation3 + $0xa0] sm:$0xff]  ;;  %v1638_v15 = vld [vmem:[#allocation3 + $0x90] sm:$0xff] }
0x11ce   :  { %v2587_v55 = vpop.eup %2586 }
0x11cf   :  { %v1306_v9 = vmul.f32 %v2587_v55, %v1304_v8  ;;  %vm1311_vm13 = vweird.f32 %v2587_v55  ;;  %v1644_v8 = vld [vmem:[#allocation3 + $0xc0] sm:$0xff] }
0x11d0   :  { %vm1312_vm15 = vmor %vm1310_vm14, %vm1311_vm13  ;;  %1674 = vmatpush.msra.mxu2 %v1644_v8 }
0x11d1   :  { %v1307_v11 = vsub.f32 1.0, %v1306_v9  ;;  %v1642_v9 = vld [vmem:[#allocation3 + $0xb0] sm:$0xff] }
0x11d2   :  { %1675 = vmatpush.msra.mxu2 %v1642_v9 }
0x11d3   :  { %v1308_v14 = vmul.f32 %v2587_v55, %v1307_v11  ;;  %v1643_v11 = vld [vmem:[#allocation3 + $0xb8] sm:$0xff] }
0x11d4   :  { %1676 = vmatpush.msra.mxu2 %v1640_v13 }
0x11d5   :  { %v1309_v17 = vadd.f32 %v2587_v55, %v1308_v14  ;;  %v1641_v14 = vld [vmem:[#allocation3 + $0xa8] sm:$0xff] }
0x11d6   :  { %1677 = vmatpush.msra.mxu2 %v1638_v15 }
0x11d7   :  { %v1313_v7 = vsel %vm1312_vm15, %v2587_v55, %v1309_v17  ;;  %v1645_v55 = vld [vmem:[#allocation3 + $0xc8] sm:$0xff]  ;;  %v1636_v17 = vld [vmem:[#allocation3 + $0x80] sm:$0xff] }
0x11d8   :  { %v1318_v18 = vsel %vm1315_vm0, %v1317_v21, %v1313_v7  ;;  %1697 = vmatpush.msra.mxu3 %v1645_v55  ;;  %v1637_v21 = vld [vmem:[#allocation3 + $0x88] sm:$0xff]  ;;  %1678 = vmatpush.msra.mxu2 %v1636_v17 }
0x11d9   :  { %v1321_v45 = vmul.f32 %v1320_v35, %v1318_v18 }
0x11da   :  { %1698 = vmatpush.msra.mxu3 %v1643_v11 }
0x11db   :  { %v1322_v47 = vadd.f32 %v1321_v45, %v3325_v42  ;;  %v1605_v45 = vsel %vm809_vm10, %v3224_v41, %v3256_v34 }
0x11dc   :  { %1699 = vmatpush.msra.mxu3 %v1641_v14 }
0x11dd   :  { %2588 = vtanh.f32 %v1322_v47  ;;  %v1606_v47 = vsel %vm811_vm11, %v1605_v45, %v3283_v29 }
0x11de   :  { %1700 = vmatpush.msra.mxu3 %v1639_v16 }
0x11e0   :  { %1701 = vmatpush.msra.mxu3 %v1637_v21 }
0x11e3   :  { %v2589_v1 = vpop.eup %2588 }
0x11e4   :  { %v1325_v22 = vrot.slane %v2589_v1, 2 }
0x11e6   :  { %v1327_v27 = vsub.f32 %v3310_v56, %v1325_v22 }
0x11e8   :  { %v1329_v28 = vrot.slane %v1327_v27, 6 }
0x11ea   :  { %1330 = vrot.lane.b32.xlu2 %v1329_v28, %s2714_s23 }
0x1244   :  { %v1331_v30 = vpop.permute.xlu2 %1330 }
0x1245   :  { %v1333_v43 = vmul.f32 %v1331_v30, %v1318_v18 }
0x1247   :  { %1335 = vrot.lane.b32.xlu0 %v1333_v43, %s2714_s23 }
0x12b9   :  { %v1336_v44 = vpop.permute.xlu0 %1335 }
0x12ba   :  { %v3331_v24 = vadd.f32 %v2589_v1, %v1336_v44  ;;  %v1607_v1 = vsel %vm813_vm12, %v1606_v47, %v3310_v56 }
0x12bc   :  { %2462 = vmatmul.msk.f32.vlgmr.msrb.gmra.mxu0 %vm115_vm4, %v3331_v24  ;;  %2463 = vmatmul.msk.f32.vlgmr.msrb.gmra.mxu1 %vm115_vm4, %v3331_v24 }
0x12bd   :  { %1737 = vmatpush.msrb.mxu1 %v3398_v59 }
0x12bf   :  { %1738 = vmatpush.msrb.mxu1 %v3400_v4 }
0x12c1   :  { %1739 = vmatpush.msrb.mxu1 %v3405_v6 }
0x12c3   :  { %1740 = vmatpush.msrb.mxu1 %v3410_v46 }
0x1339   :  { %v1359_v26 = vpop.f32.mrf.mxu0  ;;  %v1379_v58 = vpop.f32.mrf.mxu1 }
0x133a   :  { %v1383_v10 = vrot.slane %v1359_v26, 6  ;;  %v1405_v54 = vadd.f32 %v3201_v12, %v1379_v58 }
0x133c   :  { %v1385_v49 = vadd.f32 %v1383_v10, %v3318_v25  ;;  %v1407_v33 = vrot.slane %v1405_v54, 6 }
0x133e   :  { %v2464_v50 = vmul.f32 -1.442695, %v1385_v49 }
0x1340   :  { %2590 = vpow2.f32 %v2464_v50 }
0x1346   :  { %v2591_v51 = vpop.eup %2590 }
0x1347   :  { %v1389_v57 = vadd.f32 1.0, %v2591_v51 }
0x1349   :  { %2592 = vrcp.f32 %v1389_v57  ;;  %v1401_v53 = vand.u32 2147483648, %v1389_v57  ;;  %v1399_v62 = vand.u32 2147483647, %v1389_v57  ;;  %vm1395_vm2 = vweird.f32 %v1389_v57 }
0x134b   :  { %v1402_v0 = vor.u32 1.1754944e-38, %v1401_v53  ;;  %vm1400_vm5 = vcmp.eq.f32.partialorder %v1399_v62, 8.507059e+37 }
0x134f   :  { %v2593_v52 = vpop.eup %2592 }
0x1350   :  { %v1391_v48 = vmul.f32 %v2593_v52, %v1389_v57  ;;  %vm1396_vm1 = vweird.f32 %v2593_v52 }
0x1351   :  { %vm1397_vm3 = vmor %vm1395_vm2, %vm1396_vm1 }
0x1352   :  { %v1392_v60 = vsub.f32 1.0, %v1391_v48 }
0x1354   :  { %v1393_v61 = vmul.f32 %v2593_v52, %v1392_v60 }
0x1356   :  { %v1394_v63 = vadd.f32 %v2593_v52, %v1393_v61 }
0x1358   :  { %v1398_v31 = vsel %vm1397_vm3, %v2593_v52, %v1394_v63 }
0x1359   :  { %v1403_v36 = vsel %vm1400_vm5, %v1402_v0, %v1398_v31  ;;  %v3365_v0 = vld [vmem:[#allocation5 + $0x170] sm:$0xff]  ;;  %v3367_v31 = vld [vmem:[#allocation5 + $0x160] sm:$0xff] }
0x135a   :  { %v1409_v37 = vmul.f32 %v1407_v33, %v1403_v36  ;;  %1717 = vmatpush.msrb.mxu0 %v3365_v0 }
0x135c   :  { %v1410_v38 = vadd.f32 %v1409_v37, %v3325_v42  ;;  %1718 = vmatpush.msrb.mxu0 %v3367_v31  ;;  %v3374_v37 = vld [vmem:[#allocation5 + $0x150] sm:$0xff] }
0x135e   :  { %2594 = vtanh.f32 %v1410_v38  ;;  %1719 = vmatpush.msrb.mxu0 %v3374_v37  ;;  %v3378_v38 = vld [vmem:[#allocation5 + $0x140] sm:$0xff] }
0x1360   :  { %1720 = vmatpush.msrb.mxu0 %v3378_v38 }
0x1364   :  { %v2595_v40 = vpop.eup %2594 }
0x1365   :  { %v1413_v20 = vrot.slane %v2595_v40, 2 }
0x1367   :  { %v1415_v2 = vsub.f32 %v3331_v24, %v1413_v20  ;;  %v3384_v20 = vld [vmem:[#allocation5 + $0x120] sm:$0xff] }
0x1369   :  { %v1417_v3 = vrot.slane %v1415_v2, 6  ;;  %v3388_v2 = vld [vmem:[#allocation5 + $0x110] sm:$0xff] }
0x136b   :  { %1418 = vrot.lane.b32.xlu1 %v1417_v3, %s2714_s23  ;;  %v3392_v3 = vld [vmem:[#allocation5 + $0x100] sm:$0xff] }
0x13dd   :  { %v1419_v23 = vpop.permute.xlu1 %1418 }
0x13de   :  { %v1421_v39 = vmul.f32 %v1419_v23, %v1403_v36  ;;  %v3415_v23 = vld [vmem:[#allocation5 + $0x138] sm:$0xff] }
0x13df   :  { %1741 = vmatpush.msrb.mxu1 %v3415_v23 }
0x13e0   :  { %1423 = vrot.lane.b32.xlu2 %v1421_v39, %s2714_s23  ;;  %v3420_v39 = vld [vmem:[#allocation5 + $0x128] sm:$0xff] }
0x13e1   :  { %1742 = vmatpush.msrb.mxu1 %v3420_v39 }
0x13e3   :  { %1743 = vmatpush.msrb.mxu1 %v3425_v32 }
0x13e5   :  { %1744 = vmatpush.msrb.mxu1 %v3430_v5 }
0x143a   :  { %v1424_v7 = vpop.permute.xlu2 %1423 }
0x143b   :  { %v3343_v35 = vadd.f32 %v2595_v40, %v1424_v7  ;;  %v3382_v40 = vld [vmem:[#allocation5 + $0x130] sm:$0xff] }
0x143c   :  { %1721 = vmatpush.msrb.mxu0 %v3382_v40 }
0x143d   :  { %v1428_v18 = vrot.slane %v3343_v35, 2 }
0x143e   :  { %1722 = vmatpush.msrb.mxu0 %v3384_v20 }
0x143f   :  { %2465 = vmatmul.msk.f32.vlgmr.msrb.gmra.mxu2 %vm115_vm4, %v1428_v18  ;;  %2466 = vmatmul.msk.f32.vlgmr.msrb.gmra.mxu3 %vm115_vm4, %v1428_v18 }
0x1440   :  { %1795 = vmatpush.msrb.mxu2 %v3365_v0  ;;  %1723 = vmatpush.msrb.mxu0 %v3388_v2 }
0x1441   :  { %1815 = vmatpush.msrb.mxu3 %v3398_v59 }
0x1442   :  { %1796 = vmatpush.msrb.mxu2 %v3367_v31  ;;  %1724 = vmatpush.msrb.mxu0 %v3392_v3 }
0x1443   :  { %1816 = vmatpush.msrb.mxu3 %v3400_v4 }
0x1444   :  { %1797 = vmatpush.msrb.mxu2 %v3374_v37 }
0x1445   :  { %1817 = vmatpush.msrb.mxu3 %v3405_v6 }
0x1446   :  { %1798 = vmatpush.msrb.mxu2 %v3378_v38 }
0x1447   :  { %2473 = vmatmul.msk.f32.vlgmr.msra.gmra.mxu2 %vm115_vm4, %v1607_v1  ;;  %2475 = vmatmul.msk.f32.vlgmr.msra.gmra.mxu3 %vm115_vm4, %v1607_v1 }
0x1448   :  { %1799 = vmatpush.msrb.mxu2 %v3382_v40  ;;  %1818 = vmatpush.msrb.mxu3 %v3410_v46 }
0x144a   :  { %1800 = vmatpush.msrb.mxu2 %v3384_v20  ;;  %1819 = vmatpush.msrb.mxu3 %v3415_v23 }
0x144c   :  { %1801 = vmatpush.msrb.mxu2 %v3388_v2  ;;  %1820 = vmatpush.msrb.mxu3 %v3420_v39 }
0x144e   :  { %1802 = vmatpush.msrb.mxu2 %v3392_v3  ;;  %1821 = vmatpush.msrb.mxu3 %v3425_v32 }
0x1450   :  { %1973 = vmatpush.msra.mxu2 %v3365_v0  ;;  %1822 = vmatpush.msrb.mxu3 %v3430_v5 }
0x1452   :  { %1974 = vmatpush.msra.mxu2 %v3367_v31  ;;  %1993 = vmatpush.msra.mxu3 %v3398_v59 }
0x1454   :  { %1975 = vmatpush.msra.mxu2 %v3374_v37  ;;  %1994 = vmatpush.msra.mxu3 %v3400_v4 }
0x1456   :  { %1976 = vmatpush.msra.mxu2 %v3378_v38  ;;  %1995 = vmatpush.msra.mxu3 %v3405_v6 }
0x1458   :  { %1977 = vmatpush.msra.mxu2 %v3382_v40  ;;  %1996 = vmatpush.msra.mxu3 %v3410_v46 }
0x145a   :  { %1978 = vmatpush.msra.mxu2 %v3384_v20  ;;  %1997 = vmatpush.msra.mxu3 %v3415_v23 }
0x145c   :  { %1979 = vmatpush.msra.mxu2 %v3388_v2  ;;  %1998 = vmatpush.msra.mxu3 %v3420_v39 }
0x145e   :  { %1980 = vmatpush.msra.mxu2 %v3392_v3  ;;  %1999 = vmatpush.msra.mxu3 %v3425_v32 }
0x1460   :  { %2000 = vmatpush.msra.mxu3 %v3430_v5 }
0x14c2   :  { %v1448_v22 = vpop.f32.mrf.mxu2  ;;  %v1468_v26 = vpop.f32.mrf.mxu3 }
0x14c3   :  { %v1472_v27 = vrot.slane %v1448_v22, 4  ;;  %v1494_v50 = vadd.f32 %v3201_v12, %v1468_v26 }
0x14c5   :  { %v1474_v28 = vadd.f32 %v1472_v27, %v3318_v25  ;;  %v1496_v48 = vrot.slane %v1494_v50, 4 }
0x14c7   :  { %v2467_v30 = vmul.f32 -1.442695, %v1474_v28 }
0x14c9   :  { %2596 = vpow2.f32 %v2467_v30 }
0x14ca   :  { %v1680_v16 = vpop.f32.mrf.mxu2 }
0x14cf   :  { %v2597_v43 = vpop.eup %2596 }
0x14d0   :  { %v1478_v44 = vadd.f32 1.0, %v2597_v43 }
0x14d2   :  { %2598 = vrcp.f32 %v1478_v44  ;;  %v1490_v10 = vand.u32 2147483648, %v1478_v44  ;;  %v1488_v56 = vand.u32 2147483647, %v1478_v44  ;;  %vm1484_vm7 = vweird.f32 %v1478_v44 }
0x14d4   :  { %v1491_v57 = vor.u32 1.1754944e-38, %v1490_v10  ;;  %vm1489_vm9 = vcmp.eq.f32.partialorder %v1488_v56, 8.507059e+37 }
0x14d8   :  { %v2599_v41 = vpop.eup %2598 }
0x14d9   :  { %v1480_v34 = vmul.f32 %v2599_v41, %v1478_v44  ;;  %vm1485_vm6 = vweird.f32 %v2599_v41 }
0x14da   :  { %vm1486_vm8 = vmor %vm1484_vm7, %vm1485_vm6 }
0x14db   :  { %v1481_v29 = vsub.f32 1.0, %v1480_v34 }
0x14dd   :  { %v1482_v49 = vmul.f32 %v2599_v41, %v1481_v29 }
0x14df   :  { %v1483_v51 = vadd.f32 %v2599_v41, %v1482_v49 }
0x14e1   :  { %v1487_v52 = vsel %vm1486_vm8, %v2599_v41, %v1483_v51 }
0x14e2   :  { %v1492_v58 = vsel %vm1489_vm9, %v1491_v57, %v1487_v52  ;;  %v3502_v57 = vld [vmem:[%s3647_s5 + $0x2] ss:$0 sm:$0xff] }
0x14e3   :  { %v1498_v60 = vmul.f32 %v1496_v48, %v1492_v58 }
0x14e5   :  { %v1499_v53 = vadd.f32 %v1498_v60, %v3325_v42 }
0x14e7   :  { %2600 = vtanh.f32 %v1499_v53 }
0x14ed   :  { %v3360_v61 = vpop.eup %2600 }
0x14ee   :  { %v1502_v62 = vrot.slane %v3360_v61, 2 }
0x14f0   :  { %v1504_v54 = vsub.f32 %v3343_v35, %v1502_v62 }
0x14f2   :  { %v1506_v63 = vrot.slane %v1504_v54, 6 }
0x14f4   :  { %1507 = vrot.lane.b32.xlu0 %v1506_v63, %s2714_s23 }
0x1566   :  { %v1508_v33 = vpop.permute.xlu0 %1507 }
0x1567   :  { %v1510_v36 = vmul.f32 %v1508_v33, %v1492_v58 }
0x1569   :  { %1512 = vrot.lane.b32.xlu1 %v1510_v36, %s2714_s23  ;;  %v1703_v36 = vpop.f32.mrf.mxu3 }
0x15db   :  { %v1513_v8 = vpop.permute.xlu1 %1512 }
0x15dc   :  { %v3441_v55 = vadd.f32 %v3360_v61, %v1513_v8 }
0x15de   :  { %v1517_v9 = vrot.slane %v3441_v55, 4 }
0x15e0   :  { %2468 = vmatmul.msk.f32.vlgmr.msra.gmra.mxu0 %vm115_vm4, %v1517_v9  ;;  %2469 = vmatmul.msk.f32.vlgmr.msra.gmra.mxu1 %vm115_vm4, %v1517_v9 }
0x15e1   :  { %1884 = vmatpush.msra.mxu0 %v3365_v0  ;;  %1904 = vmatpush.msra.mxu1 %v3398_v59 }
0x15e3   :  { %1885 = vmatpush.msra.mxu0 %v3367_v31  ;;  %1905 = vmatpush.msra.mxu1 %v3400_v4 }
0x15e5   :  { %1886 = vmatpush.msra.mxu0 %v3374_v37  ;;  %1906 = vmatpush.msra.mxu1 %v3405_v6 }
0x15e7   :  { %1887 = vmatpush.msra.mxu0 %v3378_v38  ;;  %1907 = vmatpush.msra.mxu1 %v3410_v46 }
0x15e8   :  { %1725 = vmatmul.f32.vlgmr.msrb.gmra.mxu0 %v2713_v19  ;;  %1745 = vmatmul.f32.vlgmr.msrb.gmra.mxu1 %v2713_v19  ;;  %v3489_v19 = vld [vmem:[%s3646_s4 + $0x4] sm:$0x3] }
0x15e9   :  { %1888 = vmatpush.msra.mxu0 %v3382_v40  ;;  %1908 = vmatpush.msra.mxu1 %v3415_v23  ;;  %v1653_v14 = vperm.slane %v3489_v19, 0  ;;  %v1654_v62 = vperm.slane %v3489_v19, 1 }
0x15eb   :  { %1889 = vmatpush.msra.mxu0 %v3384_v20  ;;  %1909 = vmatpush.msra.mxu1 %v3420_v39  ;;  %v3495_v21 = vadd.f32 %v1680_v16, %v1653_v14 }
0x15ed   :  { %1890 = vmatpush.msra.mxu0 %v3388_v2  ;;  %1910 = vmatpush.msra.mxu1 %v3425_v32 }
0x15ef   :  { %1891 = vmatpush.msra.mxu0 %v3392_v3  ;;  %1911 = vmatpush.msra.mxu1 %v3430_v5 }
0x15f1   :  { %2062 = vmatpush.msrb.mxu0 %v3365_v0  ;;  %2082 = vmatpush.msrb.mxu1 %v3398_v59 }
0x15f3   :  { %2063 = vmatpush.msrb.mxu0 %v3367_v31  ;;  %2083 = vmatpush.msrb.mxu1 %v3400_v4 }
0x15f5   :  { %2064 = vmatpush.msrb.mxu0 %v3374_v37  ;;  %2084 = vmatpush.msrb.mxu1 %v3405_v6 }
0x15f7   :  { %2065 = vmatpush.msrb.mxu0 %v3378_v38  ;;  %2085 = vmatpush.msrb.mxu1 %v3410_v46 }
0x15f9   :  { %2066 = vmatpush.msrb.mxu0 %v3382_v40  ;;  %2086 = vmatpush.msrb.mxu1 %v3415_v23 }
0x15fb   :  { %2067 = vmatpush.msrb.mxu0 %v3384_v20  ;;  %2087 = vmatpush.msrb.mxu1 %v3420_v39 }
0x15fd   :  { %2068 = vmatpush.msrb.mxu0 %v3388_v2  ;;  %2088 = vmatpush.msrb.mxu1 %v3425_v32 }
0x15ff   :  { %2069 = vmatpush.msrb.mxu0 %v3392_v3  ;;  %2089 = vmatpush.msrb.mxu1 %v3430_v5 }
0x165d   :  { %v1537_v11 = vpop.f32.mrf.mxu0  ;;  %v1557_v30 = vpop.f32.mrf.mxu1 }
0x165e   :  { %v1561_v13 = vrot.slane %v1537_v11, 2  ;;  %v1583_v26 = vadd.f32 %v3201_v12, %v1557_v30  ;;  %v1608_v30 = vsel %vm809_vm10, %v3331_v24, %v3343_v35 }
0x1660   :  { %v1563_v15 = vadd.f32 %v1561_v13, %v3318_v25  ;;  %v1585_v51 = vrot.slane %v1583_v26, 2  ;;  %v3509_v13 = vadd.f32 %v1703_v36, %v1654_v62 }
0x1662   :  { %v2470_v17 = vmul.f32 -1.442695, %v1563_v15 }
0x1664   :  { %2602 = vpow2.f32 %v2470_v17 }
0x1665   :  { %v1726_v7 = vpop.f32.mrf.mxu0  ;;  %v1746_v58 = vpop.f32.mrf.mxu1 }
0x1666   :  { %v1749_v18 = vadd.f32 %v1726_v7, %v3495_v21  ;;  %v1769_v33 = vadd.f32 %v3502_v57, %v1746_v58 }
0x1668   :  { %v2477_v45 = vmul.f32 -1.442695, %v1749_v18 }
0x166a   :  { %v2603_v47 = vpop.eup %2602  ;;  %2604 = vpow2.f32 %v2477_v45 }
0x166b   :  { %v1567_v1 = vadd.f32 1.0, %v2603_v47 }
0x166d   :  { %2606 = vrcp.f32 %v1567_v1  ;;  %v1579_v44 = vand.u32 2147483648, %v1567_v1  ;;  %v1577_v34 = vand.u32 2147483647, %v1567_v1  ;;  %vm1573_vm14 = vweird.f32 %v1567_v1 }
0x166f   :  { %v1580_v56 = vor.u32 1.1754944e-38, %v1579_v44  ;;  %vm1578_vm0 = vcmp.eq.f32.partialorder %v1577_v34, 8.507059e+37  ;;  %v1609_v44 = vsel %vm811_vm11, %v1608_v30, %v3441_v55 }
0x1670   :  { %v2605_v22 = vpop.eup %2604 }
0x1671   :  { %v1753_v27 = vadd.f32 1.0, %v2605_v22 }
0x1673   :  { %v2607_v28 = vpop.eup %2606  ;;  %2608 = vrcp.f32 %v1753_v27  ;;  %v1765_v60 = vand.u32 2147483648, %v1753_v27  ;;  %v1763_v61 = vand.u32 2147483647, %v1753_v27  ;;  %vm1759_vm2 = vweird.f32 %v1753_v27 }
0x1674   :  { %v1569_v25 = vmul.f32 %v2607_v28, %v1567_v1  ;;  %vm1574_vm13 = vweird.f32 %v2607_v28 }
0x1675   :  { %vm1575_vm15 = vmor %vm1573_vm14, %vm1574_vm13  ;;  %v1766_v8 = vor.u32 1.1754944e-38, %v1765_v60  ;;  %vm1764_vm5 = vcmp.eq.f32.partialorder %v1763_v61, 8.507059e+37 }
0x1676   :  { %v1570_v43 = vsub.f32 1.0, %v1569_v25 }
0x1678   :  { %v1571_v41 = vmul.f32 %v2607_v28, %v1570_v43 }
0x1679   :  { %v2609_v29 = vpop.eup %2608 }
0x167a   :  { %v1572_v10 = vadd.f32 %v2607_v28, %v1571_v41  ;;  %v1755_v49 = vmul.f32 %v2609_v29, %v1753_v27  ;;  %vm1760_vm1 = vweird.f32 %v2609_v29 }
0x167b   :  { %vm1761_vm3 = vmor %vm1759_vm2, %vm1760_vm1 }
0x167c   :  { %v1576_v50 = vsel %vm1575_vm15, %v2607_v28, %v1572_v10  ;;  %v1756_v52 = vsub.f32 1.0, %v1755_v49 }
0x167d   :  { %v1581_v48 = vsel %vm1578_vm0, %v1580_v56, %v1576_v50 }
0x167e   :  { %v1587_v53 = vmul.f32 %v1585_v51, %v1581_v48  ;;  %v1757_v12 = vmul.f32 %v2609_v29, %v1756_v52 }
0x1680   :  { %v1588_v54 = vadd.f32 %v1587_v53, %v3325_v42  ;;  %v1758_v63 = vadd.f32 %v2609_v29, %v1757_v12 }
0x1682   :  { %2610 = vtanh.f32 %v1588_v54  ;;  %v1762_v9 = vsel %vm1761_vm3, %v2609_v29, %v1758_v63 }
0x1683   :  { %v1767_v11 = vsel %vm1764_vm5, %v1766_v8, %v1762_v9 }
0x1684   :  { %v1770_v15 = vmul.f32 %v1769_v33, %v1767_v11 }
0x1686   :  { %v1771_v16 = vadd.f32 %v1770_v15, %v3509_v13 }
0x1688   :  { %v2611_v17 = vpop.eup %2610  ;;  %2612 = vtanh.f32 %v1771_v16 }
0x1689   :  { %v1591_v42 = vrot.slane %v2611_v17, 2 }
0x168b   :  { %v1593_v7 = vsub.f32 %v3441_v55, %v1591_v42 }
0x168d   :  { %v1595_v18 = vrot.slane %v1593_v7, 6 }
0x168e   :  { %v2613_v45 = vpop.eup %2612 }
0x168f   :  { %1596 = vrot.lane.b32.xlu2 %v1595_v18, %s2714_s23  ;;  %v1773_v47 = vsub.f32 0.0, %v2613_v45 }
0x1691   :  { %1775 = vrot.lane.b32.xlu0 %v1773_v47, %s2714_s23 }
0x16e9   :  { %v1597_v1 = vpop.permute.xlu2 %1596 }
0x16ea   :  { %v1599_v22 = vmul.f32 %v1597_v1, %v1581_v48 }
0x16ec   :  { %1601 = vrot.lane.b32.xlu1 %v1599_v22, %s2714_s23 }
0x1703   :  { %v1776_v27 = vpop.permute.xlu0 %1775 }
0x1704   :  { %v1778_v28 = vmul.f32 %v1776_v27, %v1767_v11 }
0x1706   :  { %1780 = vrot.lane.b32.xlu2 %v1778_v28, %s2714_s23 }
0x175e   :  { %v1602_v25 = vpop.permute.xlu1 %1601 }
0x175f   :  { %v1604_v43 = vadd.f32 %v2611_v17, %v1602_v25 }
0x1760   :  { %v1781_v34 = vpop.permute.xlu2 %1780 }
0x1761   :  { %v1610_v41 = vsel %vm813_vm12, %v1609_v44, %v1604_v43  ;;  %v1783_v26 = vadd.f32 %v2613_v45, %v1781_v34 }
0x1762   :  { %2474 = vmatmul.msk.f32.gmra.mxu2 %vm115_vm4, %v1610_v41  ;;  %2476 = vmatmul.msk.f32.gmra.mxu3 %vm115_vm4, %v1610_v41 }
0x176a   :  { %2478 = vmatmul.msk.f32.vlgmr.msrb.gmra.mxu2 %vm115_vm4, %v1783_v26  ;;  %2479 = vmatmul.msk.f32.vlgmr.msrb.gmra.mxu3 %vm115_vm4, %v1783_v26 }
0x176b   :  { %2144 = vmatpush.msrb.mxu2 %v3365_v0  ;;  %2164 = vmatpush.msrb.mxu3 %v3398_v59 }
0x176d   :  { %2145 = vmatpush.msrb.mxu2 %v3367_v31  ;;  %2165 = vmatpush.msrb.mxu3 %v3400_v4 }
0x176f   :  { %2146 = vmatpush.msrb.mxu2 %v3374_v37  ;;  %2166 = vmatpush.msrb.mxu3 %v3405_v6 }
0x1771   :  { %2147 = vmatpush.msrb.mxu2 %v3378_v38  ;;  %2167 = vmatpush.msrb.mxu3 %v3410_v46 }
0x1773   :  { %2148 = vmatpush.msrb.mxu2 %v3382_v40  ;;  %2168 = vmatpush.msrb.mxu3 %v3415_v23 }
0x1775   :  { %2149 = vmatpush.msrb.mxu2 %v3384_v20  ;;  %2169 = vmatpush.msrb.mxu3 %v3420_v39 }
0x1777   :  { %2150 = vmatpush.msrb.mxu2 %v3388_v2  ;;  %2170 = vmatpush.msrb.mxu3 %v3425_v32 }
0x1779   :  { %2151 = vmatpush.msrb.mxu2 %v3392_v3  ;;  %2171 = vmatpush.msrb.mxu3 %v3430_v5 }
0x17e5   :  { %v3543_v24 = vpop.f32.mrf.mxu2  ;;  %v3546_v56 = vpop.f32.mrf.mxu3 }
0x17ed   :  { %v1804_v35 = vpop.f32.mrf.mxu2  ;;  %v1824_v48 = vpop.f32.mrf.mxu3 }
0x17ee   :  { %v1828_v55 = vrot.slane %v1804_v35, 6  ;;  %v1850_v61 = vadd.f32 %v3502_v57, %v1824_v48 }
0x17f0   :  { %v1830_v29 = vadd.f32 %v1828_v55, %v3495_v21  ;;  %v1852_v36 = vrot.slane %v1850_v61, 6 }
0x17f2   :  { %v2480_v10 = vmul.f32 -1.442695, %v1830_v29 }
0x17f4   :  { %2614 = vpow2.f32 %v2480_v10 }
0x17fa   :  { %v2615_v49 = vpop.eup %2614 }
0x17fb   :  { %v1834_v50 = vadd.f32 1.0, %v2615_v49 }
0x17fd   :  { %2616 = vrcp.f32 %v1834_v50  ;;  %v1846_v60 = vand.u32 2147483648, %v1834_v50  ;;  %v1844_v12 = vand.u32 2147483647, %v1834_v50  ;;  %vm1840_vm11 = vweird.f32 %v1834_v50 }
0x17ff   :  { %v1847_v63 = vor.u32 1.1754944e-38, %v1846_v60  ;;  %vm1845_vm6 = vcmp.eq.f32.partialorder %v1844_v12, 8.507059e+37 }
0x1803   :  { %v2617_v51 = vpop.eup %2616 }
0x1804   :  { %v1836_v52 = vmul.f32 %v2617_v51, %v1834_v50  ;;  %vm1841_vm10 = vweird.f32 %v2617_v51 }
0x1805   :  { %vm1842_vm12 = vmor %vm1840_vm11, %vm1841_vm10 }
0x1806   :  { %v1837_v58 = vsub.f32 1.0, %v1836_v52 }
0x1808   :  { %v1838_v53 = vmul.f32 %v2617_v51, %v1837_v58 }
0x180a   :  { %v1839_v54 = vadd.f32 %v2617_v51, %v1838_v53 }
0x180c   :  { %v1843_v33 = vsel %vm1842_vm12, %v2617_v51, %v1839_v54 }
0x180d   :  { %v1848_v8 = vsel %vm1845_vm6, %v1847_v63, %v1843_v33 }
0x180e   :  { %v1854_v9 = vmul.f32 %v1852_v36, %v1848_v8 }
0x1810   :  { %v1855_v11 = vadd.f32 %v1854_v9, %v3509_v13 }
0x1812   :  { %2618 = vtanh.f32 %v1855_v11 }
0x1818   :  { %v2619_v15 = vpop.eup %2618 }
0x1819   :  { %v1858_v16 = vrot.slane %v2619_v15, 2 }
0x181b   :  { %v1860_v17 = vsub.f32 %v1783_v26, %v1858_v16 }
0x181d   :  { %v1862_v42 = vrot.slane %v1860_v17, 6 }
0x181f   :  { %1863 = vrot.lane.b32.xlu0 %v1862_v42, %s2714_s23 }
0x1891   :  { %v1864_v7 = vpop.permute.xlu0 %1863 }
0x1892   :  { %v1866_v18 = vmul.f32 %v1864_v7, %v1848_v8 }
0x1894   :  { %1868 = vrot.lane.b32.xlu1 %v1866_v18, %s2714_s23 }
0x1906   :  { %v1869_v45 = vpop.permute.xlu1 %1868 }
0x1907   :  { %v1871_v47 = vadd.f32 %v2619_v15, %v1869_v45 }
0x1909   :  { %v1873_v1 = vrot.slane %v1871_v47, 2 }
0x190b   :  { %2481 = vmatmul.msk.f32.vlgmr.msra.gmra.mxu0 %vm115_vm4, %v1873_v1  ;;  %2482 = vmatmul.msk.f32.vlgmr.msra.gmra.mxu1 %vm115_vm4, %v1873_v1 }
0x190c   :  { %2233 = vmatpush.msra.mxu0 %v3365_v0  ;;  %2253 = vmatpush.msra.mxu1 %v3398_v59 }
0x190e   :  { %2234 = vmatpush.msra.mxu0 %v3367_v31  ;;  %2254 = vmatpush.msra.mxu1 %v3400_v4 }
0x1910   :  { %2235 = vmatpush.msra.mxu0 %v3374_v37  ;;  %2255 = vmatpush.msra.mxu1 %v3405_v6 }
0x1912   :  { %2236 = vmatpush.msra.mxu0 %v3378_v38  ;;  %2256 = vmatpush.msra.mxu1 %v3410_v46 }
0x1914   :  { %2237 = vmatpush.msra.mxu0 %v3382_v40  ;;  %2257 = vmatpush.msra.mxu1 %v3415_v23 }
0x1916   :  { %2238 = vmatpush.msra.mxu0 %v3384_v20  ;;  %2258 = vmatpush.msra.mxu1 %v3420_v39 }
0x1918   :  { %2239 = vmatpush.msra.mxu0 %v3388_v2  ;;  %2259 = vmatpush.msra.mxu1 %v3425_v32 }
0x191a   :  { %2240 = vmatpush.msra.mxu0 %v3392_v3  ;;  %2260 = vmatpush.msra.mxu1 %v3430_v5 }
0x1988   :  { %v1893_v22 = vpop.f32.mrf.mxu0  ;;  %v1913_v34 = vpop.f32.mrf.mxu1 }
0x1989   :  { %v1917_v27 = vrot.slane %v1893_v22, 4  ;;  %v1939_v10 = vadd.f32 %v3502_v57, %v1913_v34 }
0x198b   :  { %v1919_v28 = vadd.f32 %v1917_v27, %v3495_v21  ;;  %v1941_v52 = vrot.slane %v1939_v10, 4 }
0x198d   :  { %v2483_v25 = vmul.f32 -1.442695, %v1919_v28 }
0x198f   :  { %2620 = vpow2.f32 %v2483_v25 }
0x1995   :  { %v2621_v30 = vpop.eup %2620 }
0x1996   :  { %v1923_v43 = vadd.f32 1.0, %v2621_v30 }
0x1998   :  { %2622 = vrcp.f32 %v1923_v43  ;;  %v1935_v35 = vand.u32 2147483648, %v1923_v43  ;;  %v1933_v29 = vand.u32 2147483647, %v1923_v43  ;;  %vm1929_vm8 = vweird.f32 %v1923_v43 }
0x199a   :  { %v1936_v50 = vor.u32 1.1754944e-38, %v1935_v35  ;;  %vm1934_vm13 = vcmp.eq.f32.partialorder %v1933_v29, 8.507059e+37 }
0x199e   :  { %v2623_v44 = vpop.eup %2622 }
0x199f   :  { %v1925_v41 = vmul.f32 %v2623_v44, %v1923_v43  ;;  %vm1930_vm7 = vweird.f32 %v2623_v44 }
0x19a0   :  { %vm1931_vm9 = vmor %vm1929_vm8, %vm1930_vm7 }
0x19a1   :  { %v1926_v26 = vsub.f32 1.0, %v1925_v41 }
0x19a3   :  { %v1927_v55 = vmul.f32 %v2623_v44, %v1926_v26 }
0x19a5   :  { %v1928_v49 = vadd.f32 %v2623_v44, %v1927_v55 }
0x19a7   :  { %v1932_v51 = vsel %vm1931_vm9, %v2623_v44, %v1928_v49 }
0x19a8   :  { %v1937_v48 = vsel %vm1934_vm13, %v1936_v50, %v1932_v51 }
0x19a9   :  { %v1943_v58 = vmul.f32 %v1941_v52, %v1937_v48 }
0x19ab   :  { %v1944_v60 = vadd.f32 %v1943_v58, %v3509_v13 }
0x19ad   :  { %2624 = vtanh.f32 %v1944_v60 }
0x19b3   :  { %v2625_v53 = vpop.eup %2624 }
0x19b4   :  { %v1947_v12 = vrot.slane %v2625_v53, 2 }
0x19b6   :  { %v1949_v61 = vsub.f32 %v1871_v47, %v1947_v12 }
0x19b8   :  { %v1951_v54 = vrot.slane %v1949_v61, 6 }
0x19ba   :  { %1952 = vrot.lane.b32.xlu2 %v1951_v54, %s2714_s23 }
0x1a14   :  { %v1953_v63 = vpop.permute.xlu2 %1952 }
0x1a15   :  { %v1955_v33 = vmul.f32 %v1953_v63, %v1937_v48  ;;  %v3610_v48 = vadd.f32 %v3546_v56, %v1654_v62 }
0x1a17   :  { %1957 = vrot.lane.b32.xlu0 %v1955_v33, %s2714_s23 }
0x1a89   :  { %v1958_v36 = vpop.permute.xlu0 %1957 }
0x1a8a   :  { %v1960_v8 = vadd.f32 %v2625_v53, %v1958_v36 }
0x1a8c   :  { %v1962_v9 = vrot.slane %v1960_v8, 4 }
0x1a8e   :  { %2484 = vmatmul.msk.f32.vlgmr.msra.gmra.mxu2 %vm115_vm4, %v1962_v9  ;;  %2485 = vmatmul.msk.f32.vlgmr.msra.gmra.mxu3 %vm115_vm4, %v1962_v9 }
0x1a8f   :  { %2322 = vmatpush.msra.mxu2 %v3365_v0  ;;  %2342 = vmatpush.msra.mxu3 %v3398_v59 }
0x1a91   :  { %2323 = vmatpush.msra.mxu2 %v3367_v31  ;;  %2343 = vmatpush.msra.mxu3 %v3400_v4 }
0x1a93   :  { %2324 = vmatpush.msra.mxu2 %v3374_v37  ;;  %2344 = vmatpush.msra.mxu3 %v3405_v6 }
0x1a95   :  { %2325 = vmatpush.msra.mxu2 %v3378_v38  ;;  %2345 = vmatpush.msra.mxu3 %v3410_v46 }
0x1a97   :  { %2326 = vmatpush.msra.mxu2 %v3382_v40  ;;  %2346 = vmatpush.msra.mxu3 %v3415_v23 }
0x1a99   :  { %2327 = vmatpush.msra.mxu2 %v3384_v20  ;;  %2347 = vmatpush.msra.mxu3 %v3420_v39 }
0x1a9b   :  { %2328 = vmatpush.msra.mxu2 %v3388_v2  ;;  %2348 = vmatpush.msra.mxu3 %v3425_v32 }
0x1a9d   :  { %2329 = vmatpush.msra.mxu2 %v3392_v3  ;;  %2349 = vmatpush.msra.mxu3 %v3430_v5 }
0x1b11   :  { %v1982_v0 = vpop.f32.mrf.mxu2  ;;  %v2002_v6 = vpop.f32.mrf.mxu3 }
0x1b12   :  { %v2006_v31 = vrot.slane %v1982_v0, 2  ;;  %v2028_v3 = vadd.f32 %v3502_v57, %v2002_v6 }
0x1b14   :  { %v2008_v37 = vadd.f32 %v2006_v31, %v3495_v21  ;;  %v2030_v11 = vrot.slane %v2028_v3, 2 }
0x1b16   :  { %v2486_v38 = vmul.f32 -1.442695, %v2008_v37 }
0x1b18   :  { %2626 = vpow2.f32 %v2486_v38 }
0x1b1e   :  { %v2627_v40 = vpop.eup %2626 }
0x1b1f   :  { %v2012_v59 = vadd.f32 1.0, %v2627_v40 }
0x1b21   :  { %2628 = vrcp.f32 %v2012_v59  ;;  %v2024_v2 = vand.u32 2147483648, %v2012_v59  ;;  %v2022_v39 = vand.u32 2147483647, %v2012_v59  ;;  %vm2018_vm15 = vweird.f32 %v2012_v59 }
0x1b23   :  { %v2025_v5 = vor.u32 1.1754944e-38, %v2024_v2  ;;  %vm2023_vm1 = vcmp.eq.f32.partialorder %v2022_v39, 8.507059e+37 }
0x1b27   :  { %v2629_v20 = vpop.eup %2628 }
0x1b28   :  { %v2014_v4 = vmul.f32 %v2629_v20, %v2012_v59  ;;  %vm2019_vm14 = vweird.f32 %v2629_v20 }
0x1b29   :  { %vm2020_vm0 = vmor %vm2018_vm15, %vm2019_vm14 }
0x1b2a   :  { %v2015_v46 = vsub.f32 1.0, %v2014_v4 }
0x1b2c   :  { %v2016_v23 = vmul.f32 %v2629_v20, %v2015_v46 }
0x1b2e   :  { %v2017_v32 = vadd.f32 %v2629_v20, %v2016_v23 }
0x1b30   :  { %v2021_v21 = vsel %vm2020_vm0, %v2629_v20, %v2017_v32 }
0x1b31   :  { %v2026_v15 = vsel %vm2023_vm1, %v2025_v5, %v2021_v21 }
0x1b32   :  { %v2032_v16 = vmul.f32 %v2030_v11, %v2026_v15 }
0x1b34   :  { %v2033_v17 = vadd.f32 %v2032_v16, %v3509_v13  ;;  %v3603_v13 = vadd.f32 %v3543_v24, %v1653_v14 }
0x1b36   :  { %2630 = vtanh.f32 %v2033_v17 }
0x1b3c   :  { %v2631_v42 = vpop.eup %2630 }
0x1b3d   :  { %v2036_v7 = vrot.slane %v2631_v42, 2 }
0x1b3f   :  { %v2038_v18 = vsub.f32 %v1960_v8, %v2036_v7 }
0x1b41   :  { %v2040_v45 = vrot.slane %v2038_v18, 6 }
0x1b43   :  { %2041 = vrot.lane.b32.xlu1 %v2040_v45, %s2714_s23 }
0x1bb5   :  { %v2042_v47 = vpop.permute.xlu1 %2041 }
0x1bb6   :  { %v2044_v1 = vmul.f32 %v2042_v47, %v2026_v15 }
0x1bb8   :  { %2046 = vrot.lane.b32.xlu2 %v2044_v1, %s2714_s23 }
0x1c12   :  { %v2047_v22 = vpop.permute.xlu2 %2046 }
0x1c13   :  { %v2049_v27 = vadd.f32 %v2631_v42, %v2047_v22 }
0x1c15   :  { %v2051_v28 = vrot.slane %v2049_v27, 6 }
0x1c17   :  { %2487 = vmatmul.msk.f32.vlgmr.msrb.gmra.mxu0 %vm115_vm4, %v2051_v28  ;;  %2488 = vmatmul.msk.f32.vlgmr.msrb.gmra.mxu1 %vm115_vm4, %v2051_v28 }
0x1c94   :  { %v2071_v25 = vpop.f32.mrf.mxu0  ;;  %v2091_v49 = vpop.f32.mrf.mxu1 }
0x1c95   :  { %v2094_v30 = vadd.f32 %v2071_v25, %v3603_v13  ;;  %v2114_v51 = vadd.f32 %v3502_v57, %v2091_v49 }
0x1c97   :  { %v2489_v43 = vmul.f32 -1.442695, %v2094_v30 }
0x1c99   :  { %2632 = vpow2.f32 %v2489_v43 }
0x1c9f   :  { %v2633_v44 = vpop.eup %2632 }
0x1ca0   :  { %v2098_v41 = vadd.f32 1.0, %v2633_v44 }
0x1ca2   :  { %2634 = vrcp.f32 %v2098_v41  ;;  %v2110_v55 = vand.u32 2147483648, %v2098_v41  ;;  %v2108_v10 = vand.u32 2147483647, %v2098_v41  ;;  %vm2104_vm3 = vweird.f32 %v2098_v41 }
0x1ca4   :  { %v2111_v14 = vor.u32 1.1754944e-38, %v2110_v55  ;;  %vm2109_vm10 = vcmp.eq.f32.partialorder %v2108_v10, 8.507059e+37 }
0x1ca8   :  { %v2635_v34 = vpop.eup %2634 }
0x1ca9   :  { %v2100_v26 = vmul.f32 %v2635_v34, %v2098_v41  ;;  %vm2105_vm2 = vweird.f32 %v2635_v34 }
0x1caa   :  { %vm2106_vm5 = vmor %vm2104_vm3, %vm2105_vm2  ;;  %vm2404_vm2 = vcmask 523270   ;;  %vm2413_vm3 = vcmask 7174  }
0x1cab   :  { %v2101_v35 = vsub.f32 1.0, %v2100_v26 }
0x1cad   :  { %v2102_v29 = vmul.f32 %v2635_v34, %v2101_v35 }
0x1caf   :  { %v2103_v50 = vadd.f32 %v2635_v34, %v2102_v29 }
0x1cb1   :  { %v2107_v24 = vsel %vm2106_vm5, %v2635_v34, %v2103_v50 }
0x1cb2   :  { %v2112_v52 = vsel %vm2109_vm10, %v2111_v14, %v2107_v24 }
0x1cb3   :  { %v2115_v58 = vmul.f32 %v2114_v51, %v2112_v52 }
0x1cb5   :  { %v2116_v60 = vadd.f32 %v2115_v58, %v3610_v48 }
0x1cb7   :  { %2636 = vtanh.f32 %v2116_v60 }
0x1cbd   :  { %v2637_v53 = vpop.eup %2636 }
0x1cbe   :  { %v2119_v12 = vrot.slane %v2637_v53, 2 }
0x1cc0   :  { %v2121_v61 = vsub.f32 %v2049_v27, %v2119_v12 }
0x1cc2   :  { %v2123_v54 = vrot.slane %v2121_v61, 6 }
0x1cc4   :  { %2124 = vrot.lane.b32.xlu0 %v2123_v54, %s2714_s23 }
0x1d36   :  { %v2125_v63 = vpop.permute.xlu0 %2124 }
0x1d37   :  { %v2127_v33 = vmul.f32 %v2125_v63, %v2112_v52 }
0x1d39   :  { %2129 = vrot.lane.b32.xlu1 %v2127_v33, %s2714_s23 }
0x1dab   :  { %v2130_v36 = vpop.permute.xlu1 %2129 }
0x1dac   :  { %v2132_v8 = vadd.f32 %v2637_v53, %v2130_v36 }
0x1dae   :  { %2490 = vmatmul.msk.f32.vlgmr.msrb.gmra.mxu2 %vm115_vm4, %v2132_v8  ;;  %2491 = vmatmul.msk.f32.vlgmr.msrb.gmra.mxu3 %vm115_vm4, %v2132_v8 }
0x1e31   :  { %v2153_v19 = vpop.f32.mrf.mxu2  ;;  %v2173_v40 = vpop.f32.mrf.mxu3 }
0x1e32   :  { %v2177_v62 = vrot.slane %v2153_v19, 6  ;;  %v2199_v46 = vadd.f32 %v3502_v57, %v2173_v40 }
0x1e34   :  { %v2179_v56 = vadd.f32 %v2177_v62, %v3603_v13  ;;  %v2201_v3 = vrot.slane %v2199_v46, 6 }
0x1e36   :  { %v2492_v9 = vmul.f32 -1.442695, %v2179_v56 }
0x1e38   :  { %2638 = vpow2.f32 %v2492_v9 }
0x1e3e   :  { %v2639_v0 = vpop.eup %2638 }
0x1e3f   :  { %v2183_v31 = vadd.f32 1.0, %v2639_v0 }
0x1e41   :  { %2640 = vrcp.f32 %v2183_v31  ;;  %v2195_v20 = vand.u32 2147483648, %v2183_v31  ;;  %v2193_v6 = vand.u32 2147483647, %v2183_v31  ;;  %vm2189_vm12 = vweird.f32 %v2183_v31 }
0x1e43   :  { %v2196_v23 = vor.u32 1.1754944e-38, %v2195_v20  ;;  %vm2194_vm7 = vcmp.eq.f32.partialorder %v2193_v6, 8.507059e+37 }
0x1e47   :  { %v2641_v37 = vpop.eup %2640 }
0x1e48   :  { %v2185_v38 = vmul.f32 %v2641_v37, %v2183_v31  ;;  %vm2190_vm11 = vweird.f32 %v2641_v37 }
0x1e49   :  { %vm2191_vm6 = vmor %vm2189_vm12, %vm2190_vm11 }
0x1e4a   :  { %v2186_v59 = vsub.f32 1.0, %v2185_v38 }
0x1e4c   :  { %v2187_v4 = vmul.f32 %v2641_v37, %v2186_v59 }
0x1e4e   :  { %v2188_v2 = vadd.f32 %v2641_v37, %v2187_v4 }
0x1e50   :  { %v2192_v39 = vsel %vm2191_vm6, %v2641_v37, %v2188_v2 }
0x1e51   :  { %v2197_v32 = vsel %vm2194_vm7, %v2196_v23, %v2192_v39 }
0x1e52   :  { %v2203_v5 = vmul.f32 %v2201_v3, %v2197_v32 }
0x1e54   :  { %v2204_v21 = vadd.f32 %v2203_v5, %v3610_v48 }
0x1e56   :  { %2642 = vtanh.f32 %v2204_v21 }
0x1e5c   :  { %v2643_v11 = vpop.eup %2642 }
0x1e5d   :  { %v2207_v15 = vrot.slane %v2643_v11, 2 }
0x1e5f   :  { %v2209_v16 = vsub.f32 %v2132_v8, %v2207_v15 }
0x1e61   :  { %v2211_v17 = vrot.slane %v2209_v16, 6 }
0x1e63   :  { %2212 = vrot.lane.b32.xlu2 %v2211_v17, %s2714_s23  ;;  %v2510_v17 = vld [vmem:[%s3648_s6] ss:$0 sm:$0xff] }
0x1ebd   :  { %v2213_v42 = vpop.permute.xlu2 %2212 }
0x1ebe   :  { %v2215_v7 = vmul.f32 %v2213_v42, %v2197_v32 }
0x1ec0   :  { %2217 = vrot.lane.b32.xlu0 %v2215_v7, %s2714_s23 }
0x1f32   :  { %v2218_v18 = vpop.permute.xlu0 %2217 }
0x1f33   :  { %v2220_v45 = vadd.f32 %v2643_v11, %v2218_v18 }
0x1f35   :  { %v2222_v47 = vrot.slane %v2220_v45, 2 }
0x1f37   :  { %2493 = vmatmul.msk.f32.vlgmr.msra.gmra.mxu0 %vm115_vm4, %v2222_v47  ;;  %2494 = vmatmul.msk.f32.vlgmr.msra.gmra.mxu1 %vm115_vm4, %v2222_v47 }
0x1fb4   :  { %v2242_v1 = vpop.f32.mrf.mxu0  ;;  %v2262_v41 = vpop.f32.mrf.mxu1 }
0x1fb5   :  { %v2266_v22 = vrot.slane %v2242_v1, 4  ;;  %v2288_v29 = vadd.f32 %v3502_v57, %v2262_v41 }
0x1fb7   :  { %v2268_v27 = vadd.f32 %v2266_v22, %v3603_v13  ;;  %v2290_v14 = vrot.slane %v2288_v29, 4 }
0x1fb9   :  { %v2495_v28 = vmul.f32 -1.442695, %v2268_v27 }
0x1fbb   :  { %2644 = vpow2.f32 %v2495_v28 }
0x1fc1   :  { %v2645_v25 = vpop.eup %2644 }
0x1fc2   :  { %v2272_v30 = vadd.f32 1.0, %v2645_v25 }
0x1fc4   :  { %2646 = vrcp.f32 %v2272_v30  ;;  %v2284_v26 = vand.u32 2147483648, %v2272_v30  ;;  %v2282_v55 = vand.u32 2147483647, %v2272_v30  ;;  %vm2278_vm9 = vweird.f32 %v2272_v30 }
0x1fc6   :  { %v2285_v49 = vor.u32 1.1754944e-38, %v2284_v26  ;;  %vm2283_vm14 = vcmp.eq.f32.partialorder %v2282_v55, 8.507059e+37 }
0x1fca   :  { %v2647_v43 = vpop.eup %2646 }
0x1fcb   :  { %v2274_v44 = vmul.f32 %v2647_v43, %v2272_v30  ;;  %vm2279_vm8 = vweird.f32 %v2647_v43 }
0x1fcc   :  { %vm2280_vm13 = vmor %vm2278_vm9, %vm2279_vm8 }
0x1fcd   :  { %v2275_v34 = vsub.f32 1.0, %v2274_v44 }
0x1fcf   :  { %v2276_v35 = vmul.f32 %v2647_v43, %v2275_v34 }
0x1fd1   :  { %v2277_v10 = vadd.f32 %v2647_v43, %v2276_v35 }
0x1fd3   :  { %v2281_v50 = vsel %vm2280_vm13, %v2647_v43, %v2277_v10 }
0x1fd4   :  { %v2286_v24 = vsel %vm2283_vm14, %v2285_v49, %v2281_v50 }
0x1fd5   :  { %v2292_v51 = vmul.f32 %v2290_v14, %v2286_v24 }
0x1fd7   :  { %v2293_v52 = vadd.f32 %v2292_v51, %v3610_v48 }
0x1fd9   :  { %2648 = vtanh.f32 %v2293_v52 }
0x1fdf   :  { %v2649_v58 = vpop.eup %2648 }
0x1fe0   :  { %v2296_v60 = vrot.slane %v2649_v58, 2 }
0x1fe2   :  { %v2298_v53 = vsub.f32 %v2220_v45, %v2296_v60  ;;  %v2511_v45 = vld [vmem:[#allocation2] ss:$0 sm:$0xff] }
0x1fe4   :  { %v2300_v12 = vrot.slane %v2298_v53, 6 }
0x1fe6   :  { %2301 = vrot.lane.b32.xlu1 %v2300_v12, %s2714_s23 }
0x2058   :  { %v2302_v61 = vpop.permute.xlu1 %2301 }
0x2059   :  { %v2304_v54 = vmul.f32 %v2302_v61, %v2286_v24 }
0x205b   :  { %2306 = vrot.lane.b32.xlu2 %v2304_v54, %s2714_s23 }
0x20b5   :  { %v2307_v63 = vpop.permute.xlu2 %2306 }
0x20b6   :  { %v2309_v33 = vadd.f32 %v2649_v58, %v2307_v63 }
0x20b8   :  { %v2311_v36 = vrot.slane %v2309_v33, 4 }
0x20ba   :  { %2496 = vmatmul.msk.f32.vlgmr.msra.gmra.mxu2 %vm115_vm4, %v2311_v36  ;;  %2497 = vmatmul.msk.f32.vlgmr.msra.gmra.mxu3 %vm115_vm4, %v2311_v36 }
0x213d   :  { %v2331_v8 = vpop.f32.mrf.mxu2  ;;  %v2351_v38 = vpop.f32.mrf.mxu3 }
0x213e   :  { %v2355_v19 = vrot.slane %v2331_v8, 2  ;;  %v2377_v6 = vadd.f32 %v3502_v57, %v2351_v38 }
0x2140   :  { %v2357_v62 = vadd.f32 %v2355_v19, %v3603_v13  ;;  %v2379_v23 = vrot.slane %v2377_v6, 2 }
0x2142   :  { %v2498_v56 = vmul.f32 -1.442695, %v2357_v62 }
0x2144   :  { %2650 = vpow2.f32 %v2498_v56 }
0x214a   :  { %v2651_v9 = vpop.eup %2650 }
0x214b   :  { %v2361_v0 = vadd.f32 1.0, %v2651_v9 }
0x214d   :  { %2652 = vrcp.f32 %v2361_v0  ;;  %v2373_v59 = vand.u32 2147483648, %v2361_v0  ;;  %v2371_v4 = vand.u32 2147483647, %v2361_v0  ;;  %vm2367_vm4 = vweird.f32 %v2361_v0 }
0x214f   :  { %v2374_v2 = vor.u32 1.1754944e-38, %v2373_v59  ;;  %vm2372_vm1 = vcmp.eq.f32.partialorder %v2371_v4, 8.507059e+37 }
0x2153   :  { %v2653_v31 = vpop.eup %2652 }
0x2154   :  { %v2363_v37 = vmul.f32 %v2653_v31, %v2361_v0  ;;  %vm2368_vm15 = vweird.f32 %v2653_v31 }
0x2155   :  { %vm2369_vm0 = vmor %vm2367_vm4, %vm2368_vm15 }
0x2156   :  { %v2364_v40 = vsub.f32 1.0, %v2363_v37 }
0x2158   :  { %v2365_v20 = vmul.f32 %v2653_v31, %v2364_v40 }
0x215a   :  { %v2366_v46 = vadd.f32 %v2653_v31, %v2365_v20 }
0x215c   :  { %v2370_v13 = vsel %vm2369_vm0, %v2653_v31, %v2366_v46 }
0x215d   :  { %v2375_v39 = vsel %vm2372_vm1, %v2374_v2, %v2370_v13 }
0x215e   :  { %v2381_v3 = vmul.f32 %v2379_v23, %v2375_v39 }
0x2160   :  { %v2382_v32 = vadd.f32 %v2381_v3, %v3610_v48 }
0x2162   :  { %2654 = vtanh.f32 %v2382_v32 }
0x2168   :  { %v2655_v5 = vpop.eup %2654 }
0x2169   :  { %v2385_v21 = vrot.slane %v2655_v5, 2 }
0x216b   :  { %v2387_v11 = vsub.f32 %v2309_v33, %v2385_v21 }
0x216d   :  { %v2389_v15 = vrot.slane %v2387_v11, 6 }
0x216f   :  { %2390 = vrot.lane.b32.xlu0 %v2389_v15, %s2714_s23 }
0x21e1   :  { %v2391_v16 = vpop.permute.xlu0 %2390 }
0x21e2   :  { %v2393_v57 = vmul.f32 %v2391_v16, %v2375_v39 }
0x21e4   :  { %2395 = vrot.lane.b32.xlu1 %v2393_v57, %s2714_s23 }
0x2256   :  { %v2396_v42 = vpop.permute.xlu1 %2395 }
0x2257   :  { %v2398_v7 = vadd.f32 %v2655_v5, %v2396_v42 }
0x2259   :  { %v2403_v18 = vmul.f32 %v2510_v17, %v2398_v7 }
0x225b   :  { %v2405_v48 = vsel %vm2404_vm2, %v2403_v18, 0.0 }
0x225c   :  { %2406 = vadd.xlane.f32.xlu2 %v2405_v48 }
0x22cf   :  { %v2407_v47 = vpop.xlane.xlu2 %2406 }
0x22d0   :  { %v2412_v1 = vadd.f32 %v2511_v45, %v2407_v47 }
0x22d2   :  { %2414 = vst.msk [vmem:[%s3650_s8 - $0x6] sm:$0xc0] %vm2413_vm3, %v2412_v1 }
0x22d3   :  { %2419 = vsyncpa [#allocation4], 1 }
0x22d4   :  { %2420 = vsyncpa [#allocation6], 1 }

</bundles_post_ra>
